<compile_context>
chip_gen: v7x
topology: tpu7x:2x2x1
jax: 0.10.0
libtpu: 0.0.40
codegen_flags: <defaults>
</compile_context>

<pallas_src>
import numpy as np
import jax
import jax.numpy as jnp
from jax.experimental import pallas as pl
from jax.experimental.pallas import tpu as pltpu

TILE_B = 16   # per-invocation batch tile: multiple of 16 (bf16) and 8 (f32) sublanes


# ---------------------------------------------------------------------------
# Fused kernel
# ---------------------------------------------------------------------------
def _branchnet_kernel(x_ref, w1_ref, w2_ref, bias_ref, w3_ref, wf1_ref, wf2_ref,
                      o_ref):
    batch = o_ref.shape[0]                     # TILE_B (sublane aligned)

    def mm(a, b_ref):
        # bf16 operands on the MXU, f32 accumulation.
        return jnp.dot(a, b_ref[...], preferred_element_type=jnp.float32)

    def im2col(x, taps, out_blocks):
        # Concatenate `taps` shifted row-slices along lanes -> one big-K LHS.
        # Every slice starts at a multiple of `batch` rows (tile aligned) and is
        # a multiple of 128 lanes wide, so this is pure aligned vreg copies.
        rows = out_blocks * batch
        return jnp.concatenate(
            [x[i * batch:i * batch + rows, :] for i in range(taps)], axis=1)

    def pool_rows(y):
        # Row half of AvgPool2d(2): VPU add of adjacent h row-blocks (f32).
        h = y.shape[0] // batch
        parts = [0.5 * (y[(2 * p) * batch:(2 * p + 1) * batch, :] +
                        y[(2 * p + 1) * batch:(2 * p + 2) * batch, :])
                 for p in range(h // 2)]
        return jnp.concatenate(parts, axis=0)

    x0 = x_ref[...]                                            # (32B, 128) bf16

    # conv1 (5x5, Cin padded 3->4, N padded 224->256) + ReLU, one matmul
    y1 = jnp.maximum(mm(im2col(x0, 5, 28), w1_ref), 0.0)       # (28B, 256) f32
    t1 = pool_rows(y1).astype(jnp.bfloat16)                    # (14B, 256) bf16

    # fused conv2 || conv2_2 (3x3, PC1 pool-columns folded in) + bias + ReLU
    yf = jnp.maximum(mm(im2col(t1, 3, 12), w2_ref) + bias_ref[...], 0.0)  # (12B,384)
    pf = pool_rows(yf).astype(jnp.bfloat16)                    # (6B, 384) bf16

    # branch 1: conv3 (PC2 folded in) + ReLU, then fc1
    y3 = jnp.maximum(mm(im2col(pf, 3, 4), w3_ref), 0.0).astype(jnp.bfloat16)  # (4B,128)
    o1 = mm(im2col(y3, 4, 1), wf1_ref)                         # (B, 16) f32

    # branch 2: fc2 (PC2 folded in)
    o2 = mm(im2col(pf, 6, 1), wf2_ref)                         # (B, 16) f32

    o_ref[...] = jnp.concatenate([o1, o2], axis=1)             # (B, 32)


# ---------------------------------------------------------------------------
# One-time (init) construction of the structured weight matrices
# ---------------------------------------------------------------------------
def _conv_band(w, width):
    """w: (Cout, Cin, kh, kw) OIHW.  Returns (kh, width*Cin, Wo*Cout) banded
    matrices with B[i, (wo+j)*Cin+ci, wo*Cout+co] = w[co, ci, i, j]."""
    cout, cin, kh, kw = w.shape
    wo_n = width - kw + 1
    mats = np.zeros((kh, width * cin, wo_n * cout), np.float32)
    for i in range(kh):
        for wo in range(wo_n):
            for j in range(kw):
                wc = wo + j
                mats[i, wc * cin:(wc + 1) * cin,
                     wo * cout:(wo + 1) * cout] = w[:, :, i, j].T
    return mats


def _pool_col_matrix(width, channels):
    """(width*C, (width//2)*C): averages w-pairs, identity over channels."""
    q_n = width // 2
    m = np.zeros((width * channels, q_n * channels), np.float32)
    half_eye = 0.5 * np.eye(channels, dtype=np.float32)
    for q in range(q_n):
        for d in (0, 1):
            w = 2 * q + d
            m[w * channels:(w + 1) * channels,
              q * channels:(q + 1) * channels] = half_eye
    return m


def _fc_block_matrix(w_fc, c, h, wdt):
    """PyTorch fc weight (10, c*h*wdt) with (c,h,w) flatten order ->
    (h*wdt*c, 10) with rows ordered (h, w, c) to match the kernel layout."""
    out_f = w_fc.shape[0]
    m = np.transpose(w_fc.reshape(out_f, c, h, wdt), (2, 3, 1, 0))   # (h,w,c,10)
    return m.reshape(h * wdt * c, out_f)


def prepare_params(params, dtype=jnp.bfloat16):
    w1 = np.asarray(params["conv1"], np.float32)        # (8, 3, 5, 5)
    w2 = np.asarray(params["conv2"], np.float32)        # (16, 8, 3, 3)
    w2b = np.asarray(params["conv2_2"], np.float32)     # (16, 8, 3, 3)
    b2b = np.asarray(params["conv2_2_b"], np.float32)   # (16,)
    w3 = np.asarray(params["conv3"], np.float32)        # (32, 16, 3, 3)
    wf1 = np.asarray(params["fc1"], np.float32)         # (10, 512)
    wf2 = np.asarray(params["fc2"], np.float32)         # (10, 576)

    # conv1: Cin pad 3->4 (K per tap = 128), N pad 224->256 (lane aligned)
    w1p = np.zeros((8, 4, 5, 5), np.float32)
    w1p[:, :3] = w1
    b1 = _conv_band(w1p, 32)                             # (5, 128, 224)
    W1 = np.zeros((5, 128, 256), np.float32)
    W1[:, :, :224] = b1
    W1 = W1.reshape(5 * 128, 256)

    # pool-column matrices (folded offline; row-pooling is done on the VPU)
    PC1 = _pool_col_matrix(28, 8)                        # (224, 112)
    PC1p = np.zeros((256, 112), np.float32)
    PC1p[:224] = PC1
    PC2 = _pool_col_matrix(12, 16)                       # (192, 96)

    # fused conv2 || conv2_2 with PC1 folded: (3*256, 384)
    band2 = _conv_band(w2, 14)                           # (3, 112, 192)
    band2b = _conv_band(w2b, 14)                         # (3, 112, 192)
    W2 = np.zeros((3, 256, 384), np.float32)
    for i in range(3):
        W2[i, :, :192] = PC1p @ band2[i]
        W2[i, :, 192:] = PC1p @ band2b[i]
    W2 = W2.reshape(3 * 256, 384)
    bias_f = np.zeros((1, 384), np.float32)
    bias_f[0, 192:] = np.tile(b2b, 12)                   # bias only on conv2_2 half

    # conv3 with PC2 folded; reads only the branch-1 columns (0:192) of pf
    band3 = _conv_band(w3, 6)                            # (3, 96, 128)
    W3 = np.zeros((3, 384, 128), np.float32)
    for i in range(3):
        W3[i, :192, :] = PC2 @ band3[i]
    W3 = W3.reshape(3 * 384, 128)

    # fc1 (branch 1), N padded 10 -> 16
    Wf1 = np.zeros((512, 16), np.float32)
    Wf1[:, :10] = _fc_block_matrix(wf1, 32, 4, 4)

    # fc2 (branch 2) with PC2 folded; reads only the branch-2 columns (192:384)
    f2 = _fc_block_matrix(wf2, 16, 6, 6)                 # (576, 10)
    Wf2 = np.zeros((6, 384, 16), np.float32)
    for hh in range(6):
        Wf2[hh, 192:, :10] = PC2 @ f2[hh * 96:(hh + 1) * 96]
    Wf2 = Wf2.reshape(6 * 384, 16)

    f = lambda a: jnp.asarray(a, dtype)
    return {"w1": f(W1), "w2": f(W2), "bias": jnp.asarray(bias_f, jnp.float32),
            "w3": f(W3), "wf1": f(Wf1), "wf2": f(Wf2)}


# ---------------------------------------------------------------------------
# Forward
# ---------------------------------------------------------------------------
@jax.jit
def branchnet0_forward(x, ops):
    n, c, h, w = x.shape
    bp = ((n + TILE_B - 1) // TILE_B) * TILE_B           # pad batch to tile
    nt = bp // TILE_B

    # Zero-pad batch and channels (3->4), relayout to rows=(h, n), cols=(w, c)
    # per batch tile, cast to bf16 once.  All intermediate activations stay in
    # VMEM inside the fused kernel after this point.
    xp = jnp.zeros((bp, 4, h, w), x.dtype).at[:n, :3].set(x)
    x0 = (xp.reshape(nt, TILE_B, 4, h, w)
            .transpose(0, 3, 1, 4, 2)
            .reshape(nt, h * TILE_B, w * 4)
            .astype(jnp.bfloat16))                       # (nt, 512, 128)

    def full(a):
        nd = a.ndim
        return pl.BlockSpec(a.shape, lambda t: (0,) * nd)

    out = pl.pallas_call(
        _branchnet_kernel,
        out_shape=jax.ShapeDtypeStruct((nt, TILE_B, 32), jnp.float32),
        grid=(nt,),
        in_specs=[pl.BlockSpec((None, h * TILE_B, w * 4), lambda t: (t, 0, 0)),
                  full(ops["w1"]), full(ops["w2"]), full(ops["bias"]),
                  full(ops["w3"]), full(ops["wf1"]), full(ops["wf2"])],
        out_specs=pl.BlockSpec((None, TILE_B, 32), lambda t: (t, 0, 0)),
        compiler_params=pltpu.CompilerParams(dimension_semantics=("parallel",)),
    )(x0, ops["w1"], ops["w2"], ops["bias"], ops["w3"], ops["wf1"], ops["wf2"])

    out = out.reshape(bp, 32)
    return out[:n, 0:10], out[:n, 16:26]


# ---------------------------------------------------------------------------
# Reference (pure JAX) + init + main
# ---------------------------------------------------------------------------
def init_params(key):
    ks = jax.random.split(key, 7)

    def w(k, shape):
        fan_in = int(np.prod(shape[1:]))
        return jax.random.normal(k, shape, jnp.float32) / np.sqrt(fan_in)

    return {
        "conv1": w(ks[0], (8, 3, 5, 5)),
        "conv2": w(ks[1], (16, 8, 3, 3)),
        "conv2_2": w(ks[2], (16, 8, 3, 3)),
        "conv2_2_b": 0.01 * jax.random.normal(ks[3], (16,), jnp.float32),
        "conv3": w(ks[4], (32, 16, 3, 3)),
        "fc1": w(ks[5], (10, 4 * 4 * 32)),
        "fc2": w(ks[6], (10, 6 * 6 * 16)),
    }


def reference_forward(x, params):
    def conv(a, wt, b=None):
        out = jax.lax.conv_general_dilated(
            a, wt, window_strides=(1, 1), padding="VALID",
            dimension_numbers=("NCHW", "OIHW", "NCHW"))
        return out if b is None else out + b[None, :, None, None]

    def pool(a):
        n, c, hh, ww = a.shape
        return a.reshape(n, c, hh // 2, 2, ww // 2, 2).mean(axis=(3, 5))

    out = pool(jax.nn.relu(conv(x, params["conv1"])))
    b1 = jax.nn.relu(conv(out, params["conv2"]))
    b1 = pool(b1)
    b1 = jax.nn.relu(conv(b1, params["conv3"]))
    b1 = b1.reshape(b1.shape[0], -1) @ params["fc1"].T
    b2 = jax.nn.relu(conv(out, params["conv2_2"], params["conv2_2_b"]))
    b2 = pool(b2)
    b2 = b2.reshape(b2.shape[0], -1) @ params["fc2"].T
    return b1, b2


if __name__ == "__main__":
    batch = 2
    x = jax.random.normal(jax.random.PRNGKey(0), (batch, 3, 32, 32), jnp.float32)
    params = init_params(jax.random.PRNGKey(42))
    ops = prepare_params(params)

    b1, b2 = branchnet0_forward(x, ops)
    jax.block_until_ready((b1, b2))

    assert b1.shape == (batch, 10) and b2.shape == (batch, 10)
    assert jnp.all(jnp.isfinite(b1)) and jnp.all(jnp.isfinite(b2))

    # Cross-check against the pure-JAX f32 reference (kernel uses bf16 MXU
    # operands with f32 accumulation -> loose tolerance).
    r1, r2 = reference_forward(x, params)
    assert jnp.allclose(b1, r1, atol=7e-2, rtol=7e-2), float(jnp.max(jnp.abs(b1 - r1)))
    assert jnp.allclose(b2, r2, atol=7e-2, rtol=7e-2), float(jnp.max(jnp.abs(b2 - r2)))

    print("KERNEL_OK")
</pallas_src>

<mosaic_0001>
module attributes {stable_mosaic.version = 11 : i64} {
  func.func @_branchnet_kernel(%arg0: i32, %arg1: memref<1x512x128xbf16, #tpu.memory_space<vmem>>, %arg2: memref<640x256xbf16, #tpu.memory_space<vmem>>, %arg3: memref<768x384xbf16, #tpu.memory_space<vmem>>, %arg4: memref<1x384xf32, #tpu.memory_space<vmem>>, %arg5: memref<1152x128xbf16, #tpu.memory_space<vmem>>, %arg6: memref<512x16xbf16, #tpu.memory_space<vmem>>, %arg7: memref<2304x16xbf16, #tpu.memory_space<vmem>>, %arg8: memref<1x16x32xf32, #tpu.memory_space<vmem>>) attributes {dimension_semantics = [#tpu.dimension_semantics<parallel>], iteration_bounds = array<i64: 1>, scalar_prefetch = 0 : i64, scratch_operands = 0 : i64, tpu.core_type = #tpu.core_type<tc>, window_params = [{transform_indices = @transform_0, window_bounds = array<i64: 1, 512, 128>}, {pipeline_mode = #tpu.pipeline_mode<synchronous>, transform_indices = @transform_1, window_bounds = array<i64: 640, 256>}, {pipeline_mode = #tpu.pipeline_mode<synchronous>, transform_indices = @transform_2, window_bounds = array<i64: 768, 384>}, {pipeline_mode = #tpu.pipeline_mode<synchronous>, transform_indices = @transform_3, window_bounds = array<i64: 1, 384>}, {pipeline_mode = #tpu.pipeline_mode<synchronous>, transform_indices = @transform_4, window_bounds = array<i64: 1152, 128>}, {pipeline_mode = #tpu.pipeline_mode<synchronous>, transform_indices = @transform_5, window_bounds = array<i64: 512, 16>}, {pipeline_mode = #tpu.pipeline_mode<synchronous>, transform_indices = @transform_6, window_bounds = array<i64: 2304, 16>}, {transform_indices = @transform_7, window_bounds = array<i64: 1, 16, 32>}]} {
    %c0 = arith.constant 0 : index
    %c0_0 = arith.constant 0 : index
    %c0_1 = arith.constant 0 : index
    %0 = vector.load %arg1[%c0, %c0_0, %c0_1] : memref<1x512x128xbf16, #tpu.memory_space<vmem>>, vector<1x512x128xbf16>
    %1 = vector.shape_cast %0 : vector<1x512x128xbf16> to vector<512x128xbf16>
    %2 = vector.extract_strided_slice %1 {offsets = [0, 0], sizes = [448, 128], strides = [1, 1]} : vector<512x128xbf16> to vector<448x128xbf16>
    %3 = vector.extract_strided_slice %1 {offsets = [16, 0], sizes = [448, 128], strides = [1, 1]} : vector<512x128xbf16> to vector<448x128xbf16>
    %4 = vector.extract_strided_slice %1 {offsets = [32, 0], sizes = [448, 128], strides = [1, 1]} : vector<512x128xbf16> to vector<448x128xbf16>
    %5 = vector.extract_strided_slice %1 {offsets = [48, 0], sizes = [448, 128], strides = [1, 1]} : vector<512x128xbf16> to vector<448x128xbf16>
    %6 = vector.extract_strided_slice %1 {offsets = [64, 0], sizes = [448, 128], strides = [1, 1]} : vector<512x128xbf16> to vector<448x128xbf16>
    %7 = tpu.concatenate %2, %3, %4, %5, %6 in 1 : vector<448x128xbf16>, vector<448x128xbf16>, vector<448x128xbf16>, vector<448x128xbf16>, vector<448x128xbf16> -> vector<448x640xbf16>
    %c0_2 = arith.constant 0 : index
    %c0_3 = arith.constant 0 : index
    %8 = vector.load %arg2[%c0_2, %c0_3] : memref<640x256xbf16, #tpu.memory_space<vmem>>, vector<640x256xbf16>
    %cst = arith.constant dense<0.000000e+00> : vector<448x256xf32>
    %9 = tpu.matmul %7, %8, %cst {dimension_numbers = #tpu.dot_dimension_numbers<[1], [0], [0], [1], [0, 0, 1, 1], [], []>} : vector<448x640xbf16>, vector<640x256xbf16>, vector<448x256xf32> -> vector<448x256xf32>
    %cst_4 = arith.constant 0.000000e+00 : f32
    %10 = vector.broadcast %cst_4 : f32 to vector<448x256xf32>
    %11 = arith.maximumf %9, %10 : vector<448x256xf32>
    %12 = vector.extract_strided_slice %11 {offsets = [0, 0], sizes = [16, 256], strides = [1, 1]} : vector<448x256xf32> to vector<16x256xf32>
    %13 = vector.extract_strided_slice %11 {offsets = [16, 0], sizes = [16, 256], strides = [1, 1]} : vector<448x256xf32> to vector<16x256xf32>
    %14 = arith.addf %12, %13 : vector<16x256xf32>
    %cst_5 = arith.constant 5.000000e-01 : f32
    %15 = vector.broadcast %cst_5 : f32 to vector<16x256xf32>
    %16 = arith.mulf %15, %14 : vector<16x256xf32>
    %17 = vector.extract_strided_slice %11 {offsets = [32, 0], sizes = [16, 256], strides = [1, 1]} : vector<448x256xf32> to vector<16x256xf32>
    %18 = vector.extract_strided_slice %11 {offsets = [48, 0], sizes = [16, 256], strides = [1, 1]} : vector<448x256xf32> to vector<16x256xf32>
    %19 = arith.addf %17, %18 : vector<16x256xf32>
    %cst_6 = arith.constant 5.000000e-01 : f32
    %20 = vector.broadcast %cst_6 : f32 to vector<16x256xf32>
    %21 = arith.mulf %20, %19 : vector<16x256xf32>
    %22 = vector.extract_strided_slice %11 {offsets = [64, 0], sizes = [16, 256], strides = [1, 1]} : vector<448x256xf32> to vector<16x256xf32>
    %23 = vector.extract_strided_slice %11 {offsets = [80, 0], sizes = [16, 256], strides = [1, 1]} : vector<448x256xf32> to vector<16x256xf32>
    %24 = arith.addf %22, %23 : vector<16x256xf32>
    %cst_7 = arith.constant 5.000000e-01 : f32
    %25 = vector.broadcast %cst_7 : f32 to vector<16x256xf32>
    %26 = arith.mulf %25, %24 : vector<16x256xf32>
    %27 = vector.extract_strided_slice %11 {offsets = [96, 0], sizes = [16, 256], strides = [1, 1]} : vector<448x256xf32> to vector<16x256xf32>
    %28 = vector.extract_strided_slice %11 {offsets = [112, 0], sizes = [16, 256], strides = [1, 1]} : vector<448x256xf32> to vector<16x256xf32>
    %29 = arith.addf %27, %28 : vector<16x256xf32>
    %cst_8 = arith.constant 5.000000e-01 : f32
    %30 = vector.broadcast %cst_8 : f32 to vector<16x256xf32>
    %31 = arith.mulf %30, %29 : vector<16x256xf32>
    %32 = vector.extract_strided_slice %11 {offsets = [128, 0], sizes = [16, 256], strides = [1, 1]} : vector<448x256xf32> to vector<16x256xf32>
    %33 = vector.extract_strided_slice %11 {offsets = [144, 0], sizes = [16, 256], strides = [1, 1]} : vector<448x256xf32> to vector<16x256xf32>
    %34 = arith.addf %32, %33 : vector<16x256xf32>
    %cst_9 = arith.constant 5.000000e-01 : f32
    %35 = vector.broadcast %cst_9 : f32 to vector<16x256xf32>
    %36 = arith.mulf %35, %34 : vector<16x256xf32>
    %37 = vector.extract_strided_slice %11 {offsets = [160, 0], sizes = [16, 256], strides = [1, 1]} : vector<448x256xf32> to vector<16x256xf32>
    %38 = vector.extract_strided_slice %11 {offsets = [176, 0], sizes = [16, 256], strides = [1, 1]} : vector<448x256xf32> to vector<16x256xf32>
    %39 = arith.addf %37, %38 : vector<16x256xf32>
    %cst_10 = arith.constant 5.000000e-01 : f32
    %40 = vector.broadcast %cst_10 : f32 to vector<16x256xf32>
    %41 = arith.mulf %40, %39 : vector<16x256xf32>
    %42 = vector.extract_strided_slice %11 {offsets = [192, 0], sizes = [16, 256], strides = [1, 1]} : vector<448x256xf32> to vector<16x256xf32>
    %43 = vector.extract_strided_slice %11 {offsets = [208, 0], sizes = [16, 256], strides = [1, 1]} : vector<448x256xf32> to vector<16x256xf32>
    %44 = arith.addf %42, %43 : vector<16x256xf32>
    %cst_11 = arith.constant 5.000000e-01 : f32
    %45 = vector.broadcast %cst_11 : f32 to vector<16x256xf32>
    %46 = arith.mulf %45, %44 : vector<16x256xf32>
    %47 = vector.extract_strided_slice %11 {offsets = [224, 0], sizes = [16, 256], strides = [1, 1]} : vector<448x256xf32> to vector<16x256xf32>
    %48 = vector.extract_strided_slice %11 {offsets = [240, 0], sizes = [16, 256], strides = [1, 1]} : vector<448x256xf32> to vector<16x256xf32>
    %49 = arith.addf %47, %48 : vector<16x256xf32>
    %cst_12 = arith.constant 5.000000e-01 : f32
    %50 = vector.broadcast %cst_12 : f32 to vector<16x256xf32>
    %51 = arith.mulf %50, %49 : vector<16x256xf32>
    %52 = vector.extract_strided_slice %11 {offsets = [256, 0], sizes = [16, 256], strides = [1, 1]} : vector<448x256xf32> to vector<16x256xf32>
    %53 = vector.extract_strided_slice %11 {offsets = [272, 0], sizes = [16, 256], strides = [1, 1]} : vector<448x256xf32> to vector<16x256xf32>
    %54 = arith.addf %52, %53 : vector<16x256xf32>
    %cst_13 = arith.constant 5.000000e-01 : f32
    %55 = vector.broadcast %cst_13 : f32 to vector<16x256xf32>
    %56 = arith.mulf %55, %54 : vector<16x256xf32>
    %57 = vector.extract_strided_slice %11 {offsets = [288, 0], sizes = [16, 256], strides = [1, 1]} : vector<448x256xf32> to vector<16x256xf32>
    %58 = vector.extract_strided_slice %11 {offsets = [304, 0], sizes = [16, 256], strides = [1, 1]} : vector<448x256xf32> to vector<16x256xf32>
    %59 = arith.addf %57, %58 : vector<16x256xf32>
    %cst_14 = arith.constant 5.000000e-01 : f32
    %60 = vector.broadcast %cst_14 : f32 to vector<16x256xf32>
    %61 = arith.mulf %60, %59 : vector<16x256xf32>
    %62 = vector.extract_strided_slice %11 {offsets = [320, 0], sizes = [16, 256], strides = [1, 1]} : vector<448x256xf32> to vector<16x256xf32>
    %63 = vector.extract_strided_slice %11 {offsets = [336, 0], sizes = [16, 256], strides = [1, 1]} : vector<448x256xf32> to vector<16x256xf32>
    %64 = arith.addf %62, %63 : vector<16x256xf32>
    %cst_15 = arith.constant 5.000000e-01 : f32
    %65 = vector.broadcast %cst_15 : f32 to vector<16x256xf32>
    %66 = arith.mulf %65, %64 : vector<16x256xf32>
    %67 = vector.extract_strided_slice %11 {offsets = [352, 0], sizes = [16, 256], strides = [1, 1]} : vector<448x256xf32> to vector<16x256xf32>
    %68 = vector.extract_strided_slice %11 {offsets = [368, 0], sizes = [16, 256], strides = [1, 1]} : vector<448x256xf32> to vector<16x256xf32>
    %69 = arith.addf %67, %68 : vector<16x256xf32>
    %cst_16 = arith.constant 5.000000e-01 : f32
    %70 = vector.broadcast %cst_16 : f32 to vector<16x256xf32>
    %71 = arith.mulf %70, %69 : vector<16x256xf32>
    %72 = vector.extract_strided_slice %11 {offsets = [384, 0], sizes = [16, 256], strides = [1, 1]} : vector<448x256xf32> to vector<16x256xf32>
    %73 = vector.extract_strided_slice %11 {offsets = [400, 0], sizes = [16, 256], strides = [1, 1]} : vector<448x256xf32> to vector<16x256xf32>
    %74 = arith.addf %72, %73 : vector<16x256xf32>
    %cst_17 = arith.constant 5.000000e-01 : f32
    %75 = vector.broadcast %cst_17 : f32 to vector<16x256xf32>
    %76 = arith.mulf %75, %74 : vector<16x256xf32>
    %77 = vector.extract_strided_slice %11 {offsets = [416, 0], sizes = [16, 256], strides = [1, 1]} : vector<448x256xf32> to vector<16x256xf32>
    %78 = vector.extract_strided_slice %11 {offsets = [432, 0], sizes = [16, 256], strides = [1, 1]} : vector<448x256xf32> to vector<16x256xf32>
    %79 = arith.addf %77, %78 : vector<16x256xf32>
    %cst_18 = arith.constant 5.000000e-01 : f32
    %80 = vector.broadcast %cst_18 : f32 to vector<16x256xf32>
    %81 = arith.mulf %80, %79 : vector<16x256xf32>
    %82 = tpu.concatenate %16, %21, %26, %31, %36, %41, %46, %51, %56, %61, %66, %71, %76, %81 in 0 : vector<16x256xf32>, vector<16x256xf32>, vector<16x256xf32>, vector<16x256xf32>, vector<16x256xf32>, vector<16x256xf32>, vector<16x256xf32>, vector<16x256xf32>, vector<16x256xf32>, vector<16x256xf32>, vector<16x256xf32>, vector<16x256xf32>, vector<16x256xf32>, vector<16x256xf32> -> vector<224x256xf32>
    %83 = arith.truncf %82 : vector<224x256xf32> to vector<224x256xbf16>
    %84 = vector.extract_strided_slice %83 {offsets = [0, 0], sizes = [192, 256], strides = [1, 1]} : vector<224x256xbf16> to vector<192x256xbf16>
    %85 = vector.extract_strided_slice %83 {offsets = [16, 0], sizes = [192, 256], strides = [1, 1]} : vector<224x256xbf16> to vector<192x256xbf16>
    %86 = vector.extract_strided_slice %83 {offsets = [32, 0], sizes = [192, 256], strides = [1, 1]} : vector<224x256xbf16> to vector<192x256xbf16>
    %87 = tpu.concatenate %84, %85, %86 in 1 : vector<192x256xbf16>, vector<192x256xbf16>, vector<192x256xbf16> -> vector<192x768xbf16>
    %c0_19 = arith.constant 0 : index
    %c0_20 = arith.constant 0 : index
    %88 = vector.load %arg3[%c0_19, %c0_20] : memref<768x384xbf16, #tpu.memory_space<vmem>>, vector<768x384xbf16>
    %cst_21 = arith.constant dense<0.000000e+00> : vector<192x384xf32>
    %89 = tpu.matmul %87, %88, %cst_21 {dimension_numbers = #tpu.dot_dimension_numbers<[1], [0], [0], [1], [0, 0, 1, 1], [], []>} : vector<192x768xbf16>, vector<768x384xbf16>, vector<192x384xf32> -> vector<192x384xf32>
    %c0_22 = arith.constant 0 : index
    %c0_23 = arith.constant 0 : index
    %90 = vector.load %arg4[%c0_22, %c0_23] : memref<1x384xf32, #tpu.memory_space<vmem>>, vector<1x384xf32>
    %91 = vector.broadcast %90 : vector<1x384xf32> to vector<192x384xf32>
    %92 = arith.addf %89, %91 : vector<192x384xf32>
    %cst_24 = arith.constant 0.000000e+00 : f32
    %93 = vector.broadcast %cst_24 : f32 to vector<192x384xf32>
    %94 = arith.maximumf %92, %93 : vector<192x384xf32>
    %95 = vector.extract_strided_slice %94 {offsets = [0, 0], sizes = [16, 384], strides = [1, 1]} : vector<192x384xf32> to vector<16x384xf32>
    %96 = vector.extract_strided_slice %94 {offsets = [16, 0], sizes = [16, 384], strides = [1, 1]} : vector<192x384xf32> to vector<16x384xf32>
    %97 = arith.addf %95, %96 : vector<16x384xf32>
    %cst_25 = arith.constant 5.000000e-01 : f32
    %98 = vector.broadcast %cst_25 : f32 to vector<16x384xf32>
    %99 = arith.mulf %98, %97 : vector<16x384xf32>
    %100 = vector.extract_strided_slice %94 {offsets = [32, 0], sizes = [16, 384], strides = [1, 1]} : vector<192x384xf32> to vector<16x384xf32>
    %101 = vector.extract_strided_slice %94 {offsets = [48, 0], sizes = [16, 384], strides = [1, 1]} : vector<192x384xf32> to vector<16x384xf32>
    %102 = arith.addf %100, %101 : vector<16x384xf32>
    %cst_26 = arith.constant 5.000000e-01 : f32
    %103 = vector.broadcast %cst_26 : f32 to vector<16x384xf32>
    %104 = arith.mulf %103, %102 : vector<16x384xf32>
    %105 = vector.extract_strided_slice %94 {offsets = [64, 0], sizes = [16, 384], strides = [1, 1]} : vector<192x384xf32> to vector<16x384xf32>
    %106 = vector.extract_strided_slice %94 {offsets = [80, 0], sizes = [16, 384], strides = [1, 1]} : vector<192x384xf32> to vector<16x384xf32>
    %107 = arith.addf %105, %106 : vector<16x384xf32>
    %cst_27 = arith.constant 5.000000e-01 : f32
    %108 = vector.broadcast %cst_27 : f32 to vector<16x384xf32>
    %109 = arith.mulf %108, %107 : vector<16x384xf32>
    %110 = vector.extract_strided_slice %94 {offsets = [96, 0], sizes = [16, 384], strides = [1, 1]} : vector<192x384xf32> to vector<16x384xf32>
    %111 = vector.extract_strided_slice %94 {offsets = [112, 0], sizes = [16, 384], strides = [1, 1]} : vector<192x384xf32> to vector<16x384xf32>
    %112 = arith.addf %110, %111 : vector<16x384xf32>
    %cst_28 = arith.constant 5.000000e-01 : f32
    %113 = vector.broadcast %cst_28 : f32 to vector<16x384xf32>
    %114 = arith.mulf %113, %112 : vector<16x384xf32>
    %115 = vector.extract_strided_slice %94 {offsets = [128, 0], sizes = [16, 384], strides = [1, 1]} : vector<192x384xf32> to vector<16x384xf32>
    %116 = vector.extract_strided_slice %94 {offsets = [144, 0], sizes = [16, 384], strides = [1, 1]} : vector<192x384xf32> to vector<16x384xf32>
    %117 = arith.addf %115, %116 : vector<16x384xf32>
    %cst_29 = arith.constant 5.000000e-01 : f32
    %118 = vector.broadcast %cst_29 : f32 to vector<16x384xf32>
    %119 = arith.mulf %118, %117 : vector<16x384xf32>
    %120 = vector.extract_strided_slice %94 {offsets = [160, 0], sizes = [16, 384], strides = [1, 1]} : vector<192x384xf32> to vector<16x384xf32>
    %121 = vector.extract_strided_slice %94 {offsets = [176, 0], sizes = [16, 384], strides = [1, 1]} : vector<192x384xf32> to vector<16x384xf32>
    %122 = arith.addf %120, %121 : vector<16x384xf32>
    %cst_30 = arith.constant 5.000000e-01 : f32
    %123 = vector.broadcast %cst_30 : f32 to vector<16x384xf32>
    %124 = arith.mulf %123, %122 : vector<16x384xf32>
    %125 = tpu.concatenate %99, %104, %109, %114, %119, %124 in 0 : vector<16x384xf32>, vector<16x384xf32>, vector<16x384xf32>, vector<16x384xf32>, vector<16x384xf32>, vector<16x384xf32> -> vector<96x384xf32>
    %126 = arith.truncf %125 : vector<96x384xf32> to vector<96x384xbf16>
    %127 = vector.extract_strided_slice %126 {offsets = [0, 0], sizes = [64, 384], strides = [1, 1]} : vector<96x384xbf16> to vector<64x384xbf16>
    %128 = vector.extract_strided_slice %126 {offsets = [16, 0], sizes = [64, 384], strides = [1, 1]} : vector<96x384xbf16> to vector<64x384xbf16>
    %129 = vector.extract_strided_slice %126 {offsets = [32, 0], sizes = [64, 384], strides = [1, 1]} : vector<96x384xbf16> to vector<64x384xbf16>
    %130 = tpu.concatenate %127, %128, %129 in 1 : vector<64x384xbf16>, vector<64x384xbf16>, vector<64x384xbf16> -> vector<64x1152xbf16>
    %c0_31 = arith.constant 0 : index
    %c0_32 = arith.constant 0 : index
    %131 = vector.load %arg5[%c0_31, %c0_32] : memref<1152x128xbf16, #tpu.memory_space<vmem>>, vector<1152x128xbf16>
    %cst_33 = arith.constant dense<0.000000e+00> : vector<64x128xf32>
    %132 = tpu.matmul %130, %131, %cst_33 {dimension_numbers = #tpu.dot_dimension_numbers<[1], [0], [0], [1], [0, 0, 1, 1], [], []>} : vector<64x1152xbf16>, vector<1152x128xbf16>, vector<64x128xf32> -> vector<64x128xf32>
    %cst_34 = arith.constant 0.000000e+00 : f32
    %133 = vector.broadcast %cst_34 : f32 to vector<64x128xf32>
    %134 = arith.maximumf %132, %133 : vector<64x128xf32>
    %135 = arith.truncf %134 : vector<64x128xf32> to vector<64x128xbf16>
    %136 = vector.extract_strided_slice %135 {offsets = [0, 0], sizes = [16, 128], strides = [1, 1]} : vector<64x128xbf16> to vector<16x128xbf16>
    %137 = vector.extract_strided_slice %135 {offsets = [16, 0], sizes = [16, 128], strides = [1, 1]} : vector<64x128xbf16> to vector<16x128xbf16>
    %138 = vector.extract_strided_slice %135 {offsets = [32, 0], sizes = [16, 128], strides = [1, 1]} : vector<64x128xbf16> to vector<16x128xbf16>
    %139 = vector.extract_strided_slice %135 {offsets = [48, 0], sizes = [16, 128], strides = [1, 1]} : vector<64x128xbf16> to vector<16x128xbf16>
    %140 = tpu.concatenate %136, %137, %138, %139 in 1 : vector<16x128xbf16>, vector<16x128xbf16>, vector<16x128xbf16>, vector<16x128xbf16> -> vector<16x512xbf16>
    %c0_35 = arith.constant 0 : index
    %c0_36 = arith.constant 0 : index
    %141 = vector.load %arg6[%c0_35, %c0_36] : memref<512x16xbf16, #tpu.memory_space<vmem>>, vector<512x16xbf16>
    %cst_37 = arith.constant dense<0.000000e+00> : vector<16x16xf32>
    %142 = tpu.matmul %140, %141, %cst_37 {dimension_numbers = #tpu.dot_dimension_numbers<[1], [0], [0], [1], [0, 0, 1, 1], [], []>} : vector<16x512xbf16>, vector<512x16xbf16>, vector<16x16xf32> -> vector<16x16xf32>
    %143 = vector.extract_strided_slice %126 {offsets = [0, 0], sizes = [16, 384], strides = [1, 1]} : vector<96x384xbf16> to vector<16x384xbf16>
    %144 = vector.extract_strided_slice %126 {offsets = [16, 0], sizes = [16, 384], strides = [1, 1]} : vector<96x384xbf16> to vector<16x384xbf16>
    %145 = vector.extract_strided_slice %126 {offsets = [32, 0], sizes = [16, 384], strides = [1, 1]} : vector<96x384xbf16> to vector<16x384xbf16>
    %146 = vector.extract_strided_slice %126 {offsets = [48, 0], sizes = [16, 384], strides = [1, 1]} : vector<96x384xbf16> to vector<16x384xbf16>
    %147 = vector.extract_strided_slice %126 {offsets = [64, 0], sizes = [16, 384], strides = [1, 1]} : vector<96x384xbf16> to vector<16x384xbf16>
    %148 = vector.extract_strided_slice %126 {offsets = [80, 0], sizes = [16, 384], strides = [1, 1]} : vector<96x384xbf16> to vector<16x384xbf16>
    %149 = tpu.concatenate %143, %144, %145, %146, %147, %148 in 1 : vector<16x384xbf16>, vector<16x384xbf16>, vector<16x384xbf16>, vector<16x384xbf16>, vector<16x384xbf16>, vector<16x384xbf16> -> vector<16x2304xbf16>
    %c0_38 = arith.constant 0 : index
    %c0_39 = arith.constant 0 : index
    %150 = vector.load %arg7[%c0_38, %c0_39] : memref<2304x16xbf16, #tpu.memory_space<vmem>>, vector<2304x16xbf16>
    %cst_40 = arith.constant dense<0.000000e+00> : vector<16x16xf32>
    %151 = tpu.matmul %149, %150, %cst_40 {dimension_numbers = #tpu.dot_dimension_numbers<[1], [0], [0], [1], [0, 0, 1, 1], [], []>} : vector<16x2304xbf16>, vector<2304x16xbf16>, vector<16x16xf32> -> vector<16x16xf32>
    %152 = tpu.concatenate %142, %151 in 1 : vector<16x16xf32>, vector<16x16xf32> -> vector<16x32xf32>
    %c0_41 = arith.constant 0 : index
    %c0_42 = arith.constant 0 : index
    %c0_43 = arith.constant 0 : index
    %153 = vector.load %arg8[%c0_41, %c0_42, %c0_43] : memref<1x16x32xf32, #tpu.memory_space<vmem>>, vector<1x16x32xf32>
    %154 = vector.shape_cast %153 : vector<1x16x32xf32> to vector<16x32xf32>
    %155 = vector.shape_cast %152 : vector<16x32xf32> to vector<1x16x32xf32>
    tpu.vector_store %arg8[%c0_41, %c0_42, %c0_43], %155 {strides = array<i32>} : memref<1x16x32xf32, #tpu.memory_space<vmem>>, vector<1x16x32xf32>,
    return
  }
  func.func @transform_0(%arg0: i32) -> (i32, i32, i32) {
    %c0_i32 = arith.constant 0 : i32
    %c0_i32_0 = arith.constant 0 : i32
    %c0_i32_1 = arith.constant 0 : i32
    return %arg0, %c0_i32, %c0_i32_0 : i32, i32, i32
  }
  func.func @transform_1(%arg0: i32) -> (i32, i32) {
    %c0_i32 = arith.constant 0 : i32
    %c0_i32_0 = arith.constant 0 : i32
    %c0_i32_1 = arith.constant 0 : i32
    return %c0_i32, %c0_i32_0 : i32, i32
  }
  func.func @transform_2(%arg0: i32) -> (i32, i32) {
    %c0_i32 = arith.constant 0 : i32
    %c0_i32_0 = arith.constant 0 : i32
    %c0_i32_1 = arith.constant 0 : i32
    return %c0_i32, %c0_i32_0 : i32, i32
  }
  func.func @transform_3(%arg0: i32) -> (i32, i32) {
    %c0_i32 = arith.constant 0 : i32
    %c0_i32_0 = arith.constant 0 : i32
    %c0_i32_1 = arith.constant 0 : i32
    return %c0_i32, %c0_i32_0 : i32, i32
  }
  func.func @transform_4(%arg0: i32) -> (i32, i32) {
    %c0_i32 = arith.constant 0 : i32
    %c0_i32_0 = arith.constant 0 : i32
    %c0_i32_1 = arith.constant 0 : i32
    return %c0_i32, %c0_i32_0 : i32, i32
  }
  func.func @transform_5(%arg0: i32) -> (i32, i32) {
    %c0_i32 = arith.constant 0 : i32
    %c0_i32_0 = arith.constant 0 : i32
    %c0_i32_1 = arith.constant 0 : i32
    return %c0_i32, %c0_i32_0 : i32, i32
  }
  func.func @transform_6(%arg0: i32) -> (i32, i32) {
    %c0_i32 = arith.constant 0 : i32
    %c0_i32_0 = arith.constant 0 : i32
    %c0_i32_1 = arith.constant 0 : i32
    return %c0_i32, %c0_i32_0 : i32, i32
  }
  func.func @transform_7(%arg0: i32) -> (i32, i32, i32) {
    %c0_i32 = arith.constant 0 : i32
    %c0_i32_0 = arith.constant 0 : i32
    %c0_i32_1 = arith.constant 0 : i32
    return %arg0, %c0_i32, %c0_i32_0 : i32, i32, i32
  }
}

</mosaic_0001>

<bundles_post_ra>
// kernel: branchnet0_forward.1
= control target key start
LH: loop header
LB: loop body
LE: loop exit
PB: predicated region body
PF: predicated region fallthrough
CT: control target
= control target key end

     0   :  { %vm6719_vm0 = vcmask 130048   ;;  %vm6722_vm1 = vcmask 261120   ;;  %s11258_s1 = inlined_call_operand.vmem [shape: bf16[640,256], index: 1, kind: input, shape index: {}]   ;;  %s11259_s0 = inlined_call_operand.vmem [shape: bf16[1,512,128], index: 0, kind: input, shape index: {}]   ;;  %s11260_s2 = inlined_call_operand.vmem [shape: bf16[768,384], index: 2, kind: input, shape index: {}]   ;;  %s11261_s4 = inlined_call_operand.vmem [shape: bf16[1152,128], index: 4, kind: input, shape index: {}]   ;;  %s11262_s3 = inlined_call_operand.vmem [shape: f32[1,384], index: 3, kind: input, shape index: {}]   ;;  %s11263_s5 = inlined_call_operand.vmem [shape: bf16[512,16], index: 5, kind: input, shape index: {}]   ;;  %s11264_s6 = inlined_call_operand.vmem [shape: bf16[2304,16], index: 6, kind: input, shape index: {}]   ;;  %s11265_s7 = inlined_call_operand.vmem [shape: f32[1,16,32], index: 7, kind: output, shape index: {}]  }
   0x1   :  { %v8305_v0 = vld [vmem:[%s11258_s1 + $0x4] ss:$8 sps:$4 sm:$0xff]   ;;  %v8307_v1 = vld [vmem:[%s11258_s1] ss:$8 sps:$4 sm:$0xff]   ;;  %v8308_v2 = vld [vmem:[%s11258_s1 + $0x14] ss:$8 sps:$4 sm:$0xff]  }
   0x2   :  { %763 = vmatprep.subr.bf16.mxu0 %v8305_v0  ;;  %v8310_v3 = vld [vmem:[%s11258_s1 + $0x10] ss:$8 sps:$4 sm:$0xff]   ;;  %v8311_v4 = vld [vmem:[%s11258_s1 + $0x24] ss:$8 sps:$4 sm:$0xff]   ;;  %v8313_v5 = vld [vmem:[%s11258_s1 + $0x20] ss:$8 sps:$4 sm:$0xff]  }
   0x3   :  { %764 = vmatpush1.bf16.msra.mxu0 %v8307_v1  ;;  %v8314_v6 = vld [vmem:[%s11258_s1 + $0x34] ss:$8 sps:$4 sm:$0xff]   ;;  %v8316_v7 = vld [vmem:[%s11258_s1 + $0x30] ss:$8 sps:$4 sm:$0xff]   ;;  %v8317_v8 = vld [vmem:[%s11258_s1 + $0x44] ss:$8 sps:$4 sm:$0xff]  }
   0x4   :  { %765 = vmatprep.subr.bf16.mxu0 %v8308_v2  ;;  %v8319_v9 = vld [vmem:[%s11258_s1 + $0x40] ss:$8 sps:$4 sm:$0xff]   ;;  %v8320_v10 = vld [vmem:[%s11258_s1 + $0x54] ss:$8 sps:$4 sm:$0xff]   ;;  %v8322_v11 = vld [vmem:[%s11258_s1 + $0x50] ss:$8 sps:$4 sm:$0xff]  }
   0x5   :  { %v8323_v12 = vld [vmem:[%s11258_s1 + $0x64] ss:$8 sps:$4 sm:$0xff]   ;;  %v8325_v14 = vld [vmem:[%s11258_s1 + $0x60] ss:$8 sps:$4 sm:$0xff]   ;;  %v8326_v15 = vld [vmem:[%s11258_s1 + $0x74] ss:$8 sps:$4 sm:$0xff]  }
   0x6   :  { %v8353_v13 = vld [vmem:[%s11259_s0 + $0x8] sm:$0xff]   ;;  %v8328_v16 = vld [vmem:[%s11258_s1 + $0x70] ss:$8 sps:$4 sm:$0xff]   ;;  %v8332_v19 = vld [vmem:[%s11258_s1 + $0x94] ss:$8 sps:$4 sm:$0xff]  }
   0x7   :  { %766 = vmatpush1.bf16.msra.mxu0 %v8310_v3  ;;  %795 = vmatprep.mubr.bf16.mxu0 %v8353_v13  ;;  %v8329_v17 = vld [vmem:[%s11258_s1 + $0x84] ss:$8 sps:$4 sm:$0xff]   ;;  %v8331_v18 = vld [vmem:[%s11258_s1 + $0x80] ss:$8 sps:$4 sm:$0xff]   ;;  %v8334_v20 = vld [vmem:[%s11258_s1 + $0x90] ss:$8 sps:$4 sm:$0xff]  }
   0x8   :  { %767 = vmatprep.subr.bf16.mxu0 %v8311_v4  ;;  %v8335_v21 = vld [vmem:[%s11258_s1 + $0xa4] ss:$8 sps:$4 sm:$0xff]   ;;  %v8337_v22 = vld [vmem:[%s11258_s1 + $0xa0] ss:$8 sps:$4 sm:$0xff]   ;;  %v8338_v23 = vld [vmem:[%s11258_s1 + $0xb4] ss:$8 sps:$4 sm:$0xff]  }
   0x9   :  { %v8340_v24 = vld [vmem:[%s11258_s1 + $0xb0] ss:$8 sps:$4 sm:$0xff]   ;;  %v8341_v25 = vld [vmem:[%s11258_s1 + $0xc4] ss:$8 sps:$4 sm:$0xff]   ;;  %v8343_v26 = vld [vmem:[%s11258_s1 + $0xc0] ss:$8 sps:$4 sm:$0xff]  }
   0xa   :  { %v8344_v27 = vld [vmem:[%s11258_s1 + $0xd4] ss:$8 sps:$4 sm:$0xff]   ;;  %v8346_v28 = vld [vmem:[%s11258_s1 + $0xd0] ss:$8 sps:$4 sm:$0xff]   ;;  %v8347_v29 = vld [vmem:[%s11258_s1 + $0xe4] ss:$8 sps:$4 sm:$0xff]  }
   0xb   :  { %768 = vmatpush1.bf16.msra.mxu0 %v8313_v5  ;;  %v8349_v30 = vld [vmem:[%s11258_s1 + $0xe0] ss:$8 sps:$4 sm:$0xff]   ;;  %v8350_v31 = vld [vmem:[%s11258_s1 + $0xf4] ss:$8 sps:$4 sm:$0xff]   ;;  %v8352_v32 = vld [vmem:[%s11258_s1 + $0xf0] ss:$8 sps:$4 sm:$0xff]  }
   0xc   :  { %769 = vmatprep.subr.bf16.mxu0 %v8314_v6  ;;  %v8357_v33 = vld [vmem:[%s11258_s1 + $0x104] ss:$8 sps:$4 sm:$0xff]   ;;  %v8355_v35 = vld [vmem:[%s11258_s1 + $0x100] ss:$8 sps:$4 sm:$0xff]   ;;  %v9050_v36 = vld [vmem:[%s11259_s0 + $0x10] sm:$0xff]  }
   0xd   :  { %v8354_v34 = vld [vmem:[%s11259_s0] sm:$0xff]   ;;  %v8361_v37 = vld [vmem:[%s11258_s1 + $0x114] ss:$8 sps:$4 sm:$0xff]   ;;  %v8359_v38 = vld [vmem:[%s11258_s1 + $0x110] ss:$8 sps:$4 sm:$0xff]  }
   0xe   :  { %v8366_v39 = vld [vmem:[%s11258_s1 + $0x124] ss:$8 sps:$4 sm:$0xff]   ;;  %v9065_v40 = vld [vmem:[%s11259_s0 + $0x18] sm:$0xff]   ;;  %v8364_v41 = vld [vmem:[%s11258_s1 + $0x120] ss:$8 sps:$4 sm:$0xff]  }
   0xf   :  { %770 = vmatpush1.bf16.msra.mxu0 %v8316_v7  ;;  %v8371_v42 = vld [vmem:[%s11258_s1 + $0x134] ss:$8 sps:$4 sm:$0xff]   ;;  %v8369_v43 = vld [vmem:[%s11258_s1 + $0x130] ss:$8 sps:$4 sm:$0xff]   ;;  %v8376_v44 = vld [vmem:[%s11258_s1 + $0x144] ss:$8 sps:$4 sm:$0xff]  }
  0x10   :  { %771 = vmatprep.subr.bf16.mxu0 %v8317_v8  ;;  %v9083_v45 = vld [vmem:[%s11259_s0 + $0x20] sm:$0xff]   ;;  %v8380_v47 = vld [vmem:[%s11258_s1 + $0x154] ss:$8 sps:$4 sm:$0xff]   ;;  %v8378_v48 = vld [vmem:[%s11258_s1 + $0x150] ss:$8 sps:$4 sm:$0xff]  }
  0x11   :  { %v8374_v46 = vld [vmem:[%s11258_s1 + $0x140] ss:$8 sps:$4 sm:$0xff]   ;;  %v8385_v49 = vld [vmem:[%s11258_s1 + $0x164] ss:$8 sps:$4 sm:$0xff]   ;;  %v8390_v52 = vld [vmem:[%s11258_s1 + $0x174] ss:$8 sps:$4 sm:$0xff]  }
  0x12   :  { %v9102_v50 = vld [vmem:[%s11259_s0 + $0x28] sm:$0xff]   ;;  %v8388_v53 = vld [vmem:[%s11258_s1 + $0x170] ss:$8 sps:$4 sm:$0xff]   ;;  %v8399_v57 = vld [vmem:[%s11258_s1 + $0x194] ss:$8 sps:$4 sm:$0xff]  }
  0x13   :  { %772 = vmatpush1.bf16.msra.mxu0 %v8319_v9  ;;  %v8383_v51 = vld [vmem:[%s11258_s1 + $0x160] ss:$8 sps:$4 sm:$0xff]   ;;  %v8395_v54 = vld [vmem:[%s11258_s1 + $0x184] ss:$8 sps:$4 sm:$0xff]   ;;  %v9121_v55 = vld [vmem:[%s11259_s0 + $0x30] sm:$0xff]  }
  0x14   :  { %773 = vmatprep.subr.bf16.mxu0 %v8320_v10  ;;  %v8393_v56 = vld [vmem:[%s11258_s1 + $0x180] ss:$8 sps:$4 sm:$0xff]   ;;  %v8397_v58 = vld [vmem:[%s11258_s1 + $0x190] ss:$8 sps:$4 sm:$0xff]   ;;  %v8404_v59 = vld [vmem:[%s11258_s1 + $0x1a4] ss:$8 sps:$4 sm:$0xff]  }
  0x15   :  { %v9140_v60 = vld [vmem:[%s11259_s0 + $0x38] sm:$0xff]   ;;  %v8402_v61 = vld [vmem:[%s11258_s1 + $0x1a0] ss:$8 sps:$4 sm:$0xff]   ;;  %v8414_v0 = vld [vmem:[%s11258_s1 + $0x1c4] ss:$8 sps:$4 sm:$0xff]  }
  0x16   :  { %v8409_v62 = vld [vmem:[%s11258_s1 + $0x1b4] ss:$8 sps:$4 sm:$0xff]   ;;  %v8407_v63 = vld [vmem:[%s11258_s1 + $0x1b0] ss:$8 sps:$4 sm:$0xff]   ;;  %v9159_v1 = vld [vmem:[%s11259_s0 + $0x40] sm:$0xff]  }
  0x17   :  { %774 = vmatpush1.bf16.msra.mxu0 %v8322_v11  ;;  %v8412_v2 = vld [vmem:[%s11258_s1 + $0x1c0] ss:$8 sps:$4 sm:$0xff]   ;;  %v8418_v3 = vld [vmem:[%s11258_s1 + $0x1d4] ss:$8 sps:$4 sm:$0xff]   ;;  %v8416_v4 = vld [vmem:[%s11258_s1 + $0x1d0] ss:$8 sps:$4 sm:$0xff]  }
  0x18   :  { %775 = vmatprep.subr.bf16.mxu0 %v8323_v12  ;;  %v9175_v5 = vld [vmem:[%s11259_s0 + $0x48] sm:$0xff]   ;;  %v9182_v6 = vld [vmem:[%s11259_s0 + $0x50] sm:$0xff]   ;;  %v9195_v9 = vld [vmem:[%s11259_s0 + $0x58] sm:$0xff]  }
  0x19   :  { %v8421_v7 = vld [vmem:[%s11258_s1 + $0x1e0] ss:$8 sps:$4 sm:$0xff]   ;;  %v8423_v8 = vld [vmem:[%s11258_s1 + $0x1e4] ss:$8 sps:$4 sm:$0xff]   ;;  %v8426_v11 = vld [vmem:[%s11258_s1 + $0x1f0] ss:$8 sps:$4 sm:$0xff]  }
  0x1a   :  { %v9202_v10 = vld [vmem:[%s11259_s0 + $0x60] sm:$0xff]   ;;  %v8428_v12 = vld [vmem:[%s11258_s1 + $0x1f4] ss:$8 sps:$4 sm:$0xff]  }
  0x1b   :  { %776 = vmatpush1.bf16.msra.mxu0 %v8325_v14  ;;  %v9222_v14 = vld [vmem:[%s11259_s0 + $0x70] sm:$0xff]  }
  0x1c   :  { %777 = vmatprep.subr.bf16.mxu0 %v8326_v15  ;;  %v8432_v15 = vld [vmem:[%s11258_s1 + $0x204] ss:$8 sps:$4 sm:$0xff]  }
  0x1f   :  { %778 = vmatpush1.bf16.msra.mxu0 %v8328_v16  ;;  %v9232_v16 = vld [vmem:[%s11259_s0 + $0x78] sm:$0xff]  }
  0x20   :  { %779 = vmatprep.subr.bf16.mxu0 %v8329_v17  ;;  %v9239_v17 = vld [vmem:[%s11259_s0 + $0x80] sm:$0xff]  }
  0x23   :  { %780 = vmatpush1.bf16.msra.mxu0 %v8331_v18  ;;  %v9246_v18 = vld [vmem:[%s11259_s0 + $0x88] sm:$0xff]  }
  0x24   :  { %781 = vmatprep.subr.bf16.mxu0 %v8332_v19  ;;  %v9253_v19 = vld [vmem:[%s11259_s0 + $0x90] sm:$0xff]  }
  0x27   :  { %782 = vmatpush1.bf16.msra.mxu0 %v8334_v20  ;;  %v9260_v20 = vld [vmem:[%s11259_s0 + $0x98] sm:$0xff]  }
  0x28   :  { %783 = vmatprep.subr.bf16.mxu0 %v8335_v21  ;;  %v9267_v21 = vld [vmem:[%s11259_s0 + $0xa0] sm:$0xff]  }
  0x2b   :  { %784 = vmatpush1.bf16.msra.mxu0 %v8337_v22  ;;  %v9274_v22 = vld [vmem:[%s11259_s0 + $0xa8] sm:$0xff]  }
  0x2c   :  { %785 = vmatprep.subr.bf16.mxu0 %v8338_v23  ;;  %v9281_v23 = vld [vmem:[%s11259_s0 + $0xb0] sm:$0xff]  }
  0x2f   :  { %786 = vmatpush1.bf16.msra.mxu0 %v8340_v24  ;;  %v9288_v24 = vld [vmem:[%s11259_s0 + $0xb8] sm:$0xff]  }
  0x30   :  { %787 = vmatprep.subr.bf16.mxu0 %v8341_v25  ;;  %v9295_v25 = vld [vmem:[%s11259_s0 + $0xc0] sm:$0xff]  }
  0x33   :  { %788 = vmatpush1.bf16.msra.mxu0 %v8343_v26  ;;  %v9302_v26 = vld [vmem:[%s11259_s0 + $0xc8] sm:$0xff]  }
  0x34   :  { %789 = vmatprep.subr.bf16.mxu0 %v8344_v27  ;;  %v9309_v27 = vld [vmem:[%s11259_s0 + $0xd0] sm:$0xff]  }
  0x37   :  { %790 = vmatpush1.bf16.msra.mxu0 %v8346_v28  ;;  %v9316_v28 = vld [vmem:[%s11259_s0 + $0xd8] sm:$0xff]  }
  0x38   :  { %791 = vmatprep.subr.bf16.mxu0 %v8347_v29  ;;  %v9323_v29 = vld [vmem:[%s11259_s0 + $0xe0] sm:$0xff]  }
  0x3b   :  { %792 = vmatpush1.bf16.msra.mxu0 %v8349_v30  ;;  %v8430_v30 = vld [vmem:[%s11258_s1 + $0x200] ss:$8 sps:$4 sm:$0xff]  }
  0x3c   :  { %793 = vmatprep.subr.bf16.mxu0 %v8350_v31  ;;  %v8435_v31 = vld [vmem:[%s11258_s1 + $0x214] ss:$8 sps:$4 sm:$0xff]  }
  0x3f   :  { %794 = vmatpush1.bf16.msra.mxu0 %v8352_v32  ;;  %v8433_v32 = vld [vmem:[%s11258_s1 + $0x210] ss:$8 sps:$4 sm:$0xff]  }
  0x40   :  { %1076 = vmatprep.subr.bf16.mxu0 %v8357_v33  ;;  %v8438_v33 = vld [vmem:[%s11258_s1 + $0x224] ss:$8 sps:$4 sm:$0xff]  }
  0x42   :  { %796 = vmatmul.mubr.bf16.vlgmr.msra.gmra.mrb[0].mxu0 %v8354_v34  ;;  %v8436_v34 = vld [vmem:[%s11258_s1 + $0x220] ss:$8 sps:$4 sm:$0xff]  }
  0x43   :  { %1077 = vmatpush1.bf16.msra.mxu0 %v8355_v35  ;;  %805 = vmatprep.mubr.bf16.mxu0 %v9050_v36  ;;  %v8441_v35 = vld [vmem:[%s11258_s1 + $0x234] ss:$8 sps:$4 sm:$0xff]  }
  0x44   :  { %1078 = vmatprep.subr.bf16.mxu0 %v8361_v37  ;;  %v8444_v37 = vld [vmem:[%s11258_s1 + $0x244] ss:$8 sps:$4 sm:$0xff]  }
  0x47   :  { %1079 = vmatpush1.bf16.msra.mxu0 %v8359_v38  ;;  %v8442_v38 = vld [vmem:[%s11258_s1 + $0x240] ss:$8 sps:$4 sm:$0xff]  }
  0x48   :  { %1080 = vmatprep.subr.bf16.mxu0 %v8366_v39  ;;  %v8447_v39 = vld [vmem:[%s11258_s1 + $0x254] ss:$8 sps:$4 sm:$0xff]  }
  0x4a   :  { %806 = vmatmul.mubr.bf16.gmra.mrb[4].mxu0 %v8353_v13  ;;  %v9215_v13 = vld [vmem:[%s11259_s0 + $0x68] sm:$0xff]  }
  0x4b   :  { %815 = vmatprep.mubr.bf16.mxu0 %v9065_v40  ;;  %1081 = vmatpush1.bf16.msra.mxu0 %v8364_v41  ;;  %v8448_v41 = vld [vmem:[%s11258_s1 + $0x260] ss:$8 sps:$4 sm:$0xff]  }
  0x4c   :  { %1082 = vmatprep.subr.bf16.mxu0 %v8371_v42  ;;  %v8450_v42 = vld [vmem:[%s11258_s1 + $0x264] ss:$8 sps:$4 sm:$0xff]  }
  0x4f   :  { %1083 = vmatpush1.bf16.msra.mxu0 %v8369_v43  ;;  %v8451_v43 = vld [vmem:[%s11258_s1 + $0x270] ss:$8 sps:$4 sm:$0xff]  }
  0x50   :  { %1084 = vmatprep.subr.bf16.mxu0 %v8376_v44  ;;  %v8453_v44 = vld [vmem:[%s11258_s1 + $0x274] ss:$8 sps:$4 sm:$0xff]  }
  0x52   :  { %816 = vmatmul.mubr.bf16.gmra.mrb[8].mxu0 %v9050_v36 }
  0x53   :  { %825 = vmatprep.mubr.bf16.mxu0 %v9083_v45  ;;  %1085 = vmatpush1.bf16.msra.mxu0 %v8374_v46  ;;  %v9427_v46 = vld [vmem:[%s11259_s0 + $0xe8] sm:$0xff]  }
  0x54   :  { %1086 = vmatprep.subr.bf16.mxu0 %v8380_v47  ;;  %v9434_v47 = vld [vmem:[%s11259_s0 + $0xf0] sm:$0xff]  }
  0x57   :  { %1087 = vmatpush1.bf16.msra.mxu0 %v8378_v48  ;;  %v8897_v48 = vmov 0  }
  0x58   :  { %1088 = vmatprep.subr.bf16.mxu0 %v8385_v49  ;;  %v8458_v49 = vld [vmem:[%s11260_s2] ss:$12 sps:$4 sm:$0xff]  }
  0x5a   :  { %826 = vmatmul.mubr.bf16.gmra.mrb[12].mxu0 %v9065_v40 }
  0x5b   :  { %835 = vmatprep.mubr.bf16.mxu0 %v9102_v50  ;;  %1089 = vmatpush1.bf16.msra.mxu0 %v8383_v51  ;;  %v8461_v51 = vld [vmem:[%s11260_s2 + $0x18] ss:$12 sps:$4 sm:$0xff]  }
  0x5c   :  { %1090 = vmatprep.subr.bf16.mxu0 %v8390_v52  ;;  %v8462_v52 = vld [vmem:[%s11260_s2 + $0x34] ss:$12 sps:$4 sm:$0xff]  }
  0x5f   :  { %1091 = vmatpush1.bf16.msra.mxu0 %v8388_v53  ;;  %v8464_v53 = vld [vmem:[%s11260_s2 + $0x30] ss:$12 sps:$4 sm:$0xff]  }
  0x60   :  { %1092 = vmatprep.subr.bf16.mxu0 %v8395_v54  ;;  %v8465_v54 = vld [vmem:[%s11260_s2 + $0x4c] ss:$12 sps:$4 sm:$0xff]  }
  0x62   :  { %836 = vmatmul.mubr.bf16.gmra.mrb[16].mxu0 %v9083_v45 }
  0x63   :  { %845 = vmatprep.mubr.bf16.mxu0 %v9121_v55  ;;  %1093 = vmatpush1.bf16.msra.mxu0 %v8393_v56  ;;  %v8468_v56 = vld [vmem:[%s11260_s2 + $0x64] ss:$12 sps:$4 sm:$0xff]  }
  0x64   :  { %1094 = vmatprep.subr.bf16.mxu0 %v8399_v57  ;;  %v8470_v57 = vld [vmem:[%s11260_s2 + $0x60] ss:$12 sps:$4 sm:$0xff]  }
  0x67   :  { %1095 = vmatpush1.bf16.msra.mxu0 %v8397_v58  ;;  %v8471_v58 = vld [vmem:[%s11260_s2 + $0x7c] ss:$12 sps:$4 sm:$0xff]  }
  0x68   :  { %1096 = vmatprep.subr.bf16.mxu0 %v8404_v59  ;;  %v8473_v59 = vld [vmem:[%s11260_s2 + $0x78] ss:$12 sps:$4 sm:$0xff]  }
  0x6a   :  { %846 = vmatmul.mubr.bf16.gmra.mrb[20].mxu0 %v9102_v50 }
  0x6b   :  { %855 = vmatprep.mubr.bf16.mxu0 %v9140_v60  ;;  %1097 = vmatpush1.bf16.msra.mxu0 %v8402_v61  ;;  %v8476_v61 = vld [vmem:[%s11260_s2 + $0x90] ss:$12 sps:$4 sm:$0xff]  }
  0x6c   :  { %1098 = vmatprep.subr.bf16.mxu0 %v8409_v62  ;;  %v8477_v62 = vld [vmem:[%s11260_s2 + $0xac] ss:$12 sps:$4 sm:$0xff]  }
  0x6f   :  { %1099 = vmatpush1.bf16.msra.mxu0 %v8407_v63  ;;  %v8479_v63 = vld [vmem:[%s11260_s2 + $0xa8] ss:$12 sps:$4 sm:$0xff]  }
  0x70   :  { %1100 = vmatprep.subr.bf16.mxu0 %v8414_v0  ;;  %v8480_v0 = vld [vmem:[%s11260_s2 + $0xc4] ss:$12 sps:$4 sm:$0xff]  }
  0x72   :  { %856 = vmatmul.mubr.bf16.gmra.mrb[24].mxu0 %v9121_v55 }
  0x73   :  { %865 = vmatprep.mubr.bf16.mxu0 %v9159_v1  ;;  %1101 = vmatpush1.bf16.msra.mxu0 %v8412_v2  ;;  %v8483_v2 = vld [vmem:[%s11260_s2 + $0xdc] ss:$12 sps:$4 sm:$0xff]  }
  0x74   :  { %1102 = vmatprep.subr.bf16.mxu0 %v8418_v3  ;;  %v8485_v3 = vld [vmem:[%s11260_s2 + $0xd8] ss:$12 sps:$4 sm:$0xff]  }
  0x77   :  { %1103 = vmatpush1.bf16.msra.mxu0 %v8416_v4  ;;  %v8486_v4 = vld [vmem:[%s11260_s2 + $0xf4] ss:$12 sps:$4 sm:$0xff]  }
  0x78   :  { %1104 = vmatprep.subr.bf16.mxu0 %v8423_v8  ;;  %v8493_v8 = vld [vmem:[%s11260_s2 + $0x124] ss:$12 sps:$4 sm:$0xff]  }
  0x7a   :  { %866 = vmatmul.mubr.bf16.gmra.mrb[28].mxu0 %v9140_v60 }
  0x7b   :  { %875 = vmatprep.mubr.bf16.mxu0 %v9175_v5  ;;  %1105 = vmatpush1.bf16.msra.mxu0 %v8421_v7  ;;  %v8491_v7 = vld [vmem:[%s11260_s2 + $0x108] ss:$12 sps:$4 sm:$0xff]  }
  0x7c   :  { %1106 = vmatprep.subr.bf16.mxu0 %v8428_v12  ;;  %v8499_v12 = vld [vmem:[%s11260_s2 + $0x154] ss:$12 sps:$4 sm:$0xff]  }
  0x7f   :  { %1107 = vmatpush1.bf16.msra.mxu0 %v8426_v11  ;;  %v8498_v11 = vld [vmem:[%s11260_s2 + $0x138] ss:$12 sps:$4 sm:$0xff]  }
  0x80   :  { %1389 = vmatprep.subr.bf16.mxu0 %v8432_v15  ;;  %v8504_v15 = vld [vmem:[%s11260_s2 + $0x168] ss:$12 sps:$4 sm:$0xff]  }
  0x82   :  { %876 = vmatmul.mubr.bf16.gmra.mrb[32].mxu0 %v9159_v1 }
  0x83   :  { %885 = vmatprep.mubr.bf16.mxu0 %v9182_v6 }
  0x8a   :  { %886 = vmatmul.mubr.bf16.gmra.mrb[36].mxu0 %v9175_v5 }
  0x8b   :  { %895 = vmatprep.mubr.bf16.mxu0 %v9195_v9 }
  0x92   :  { %896 = vmatmul.mubr.bf16.gmra.mrb[40].mxu0 %v9182_v6 }
  0x93   :  { %905 = vmatprep.mubr.bf16.mxu0 %v9202_v10 }
  0x9a   :  { %906 = vmatmul.mubr.bf16.gmra.mrb[44].mxu0 %v9195_v9 }
  0x9b   :  { %915 = vmatprep.mubr.bf16.mxu0 %v9215_v13 }
  0xa2   :  { %916 = vmatmul.mubr.bf16.gmra.mrb[48].mxu0 %v9202_v10 }
  0xa3   :  { %925 = vmatprep.mubr.bf16.mxu0 %v9222_v14 }
  0xaa   :  { %926 = vmatmul.mubr.bf16.gmra.mrb[52].mxu0 %v9215_v13 }
  0xab   :  { %935 = vmatprep.mubr.bf16.mxu0 %v9232_v16 }
  0xb2   :  { %936 = vmatmul.mubr.bf16.gmra.mrb[56].mxu0 %v9222_v14 }
  0xb3   :  { %945 = vmatprep.mubr.bf16.mxu0 %v9239_v17 }
  0xba   :  { %946 = vmatmul.mubr.bf16.gmra.mrb[60].mxu0 %v9232_v16 }
  0xbb   :  { %955 = vmatprep.mubr.bf16.mxu0 %v9246_v18 }
  0xc2   :  { %956 = vmatmul.mubr.bf16.gmra.mrb[64].mxu0 %v9239_v17 }
  0xc3   :  { %965 = vmatprep.mubr.bf16.mxu0 %v9253_v19 }
  0xca   :  { %966 = vmatmul.mubr.bf16.gmra.mrb[68].mxu0 %v9246_v18 }
  0xcb   :  { %975 = vmatprep.mubr.bf16.mxu0 %v9260_v20 }
  0xd2   :  { %976 = vmatmul.mubr.bf16.gmra.mrb[72].mxu0 %v9253_v19 }
  0xd3   :  { %985 = vmatprep.mubr.bf16.mxu0 %v9267_v21 }
  0xda   :  { %986 = vmatmul.mubr.bf16.gmra.mrb[76].mxu0 %v9260_v20 }
  0xdb   :  { %995 = vmatprep.mubr.bf16.mxu0 %v9274_v22 }
  0xe2   :  { %996 = vmatmul.mubr.bf16.gmra.mrb[80].mxu0 %v9267_v21 }
  0xe3   :  { %1005 = vmatprep.mubr.bf16.mxu0 %v9281_v23 }
  0xea   :  { %1006 = vmatmul.mubr.bf16.gmra.mrb[84].mxu0 %v9274_v22 }
  0xeb   :  { %1015 = vmatprep.mubr.bf16.mxu0 %v9288_v24 }
  0xf2   :  { %1016 = vmatmul.mubr.bf16.gmra.mrb[88].mxu0 %v9281_v23 }
  0xf3   :  { %1025 = vmatprep.mubr.bf16.mxu0 %v9295_v25 }
  0xfa   :  { %1026 = vmatmul.mubr.bf16.gmra.mrb[92].mxu0 %v9288_v24 }
  0xfb   :  { %1035 = vmatprep.mubr.bf16.mxu0 %v9302_v26 }
 0x102   :  { %1036 = vmatmul.mubr.bf16.gmra.mrb[96].mxu0 %v9295_v25 }
 0x103   :  { %1045 = vmatprep.mubr.bf16.mxu0 %v9309_v27 }
 0x10a   :  { %1046 = vmatmul.mubr.bf16.gmra.mrb[100].mxu0 %v9302_v26 }
 0x10b   :  { %1055 = vmatprep.mubr.bf16.mxu0 %v9316_v28 }
 0x112   :  { %1056 = vmatmul.mubr.bf16.gmra.mrb[104].mxu0 %v9309_v27 }
 0x113   :  { %1065 = vmatprep.mubr.bf16.mxu0 %v9323_v29 }
 0x11a   :  { %1066 = vmatmul.mubr.bf16.gmra.mrb[108].mxu0 %v9316_v28 }
 0x11b   :  { %1108 = vmatprep.mubr.bf16.mxu0 %v9065_v40 }
 0x122   :  { %1109 = vmatmul.mubr.bf16.vlgmr.msra.gmra.mrb[0].mxu0 %v9050_v36  ;;  %v8439_v36 = vld [vmem:[%s11258_s1 + $0x230] ss:$8 sps:$4 sm:$0xff]  }
 0x123   :  { %1390 = vmatpush1.bf16.msra.mxu0 %v8430_v30  ;;  %1118 = vmatprep.mubr.bf16.mxu0 %v9083_v45 }
 0x124   :  { %1391 = vmatprep.subr.bf16.mxu0 %v8435_v31 }
 0x127   :  { %1392 = vmatpush1.bf16.msra.mxu0 %v8433_v32 }
 0x128   :  { %1393 = vmatprep.subr.bf16.mxu0 %v8438_v33 }
 0x12a   :  { %1119 = vmatmul.mubr.bf16.gmra.mrb[4].mxu0 %v9065_v40  ;;  %v8445_v40 = vld [vmem:[%s11258_s1 + $0x250] ss:$8 sps:$4 sm:$0xff]  }
 0x12b   :  { %1128 = vmatprep.mubr.bf16.mxu0 %v9102_v50  ;;  %1394 = vmatpush1.bf16.msra.mxu0 %v8436_v34 }
 0x12c   :  { %1395 = vmatprep.subr.bf16.mxu0 %v8441_v35 }
 0x12f   :  { %1396 = vmatpush1.bf16.msra.mxu0 %v8439_v36 }
 0x130   :  { %1397 = vmatprep.subr.bf16.mxu0 %v8444_v37 }
 0x132   :  { %1129 = vmatmul.mubr.bf16.gmra.mrb[8].mxu0 %v9083_v45 }
 0x133   :  { %1138 = vmatprep.mubr.bf16.mxu0 %v9121_v55  ;;  %1398 = vmatpush1.bf16.msra.mxu0 %v8442_v38 }
 0x134   :  { %1399 = vmatprep.subr.bf16.mxu0 %v8447_v39 }
 0x137   :  { %1400 = vmatpush1.bf16.msra.mxu0 %v8445_v40 }
 0x138   :  { %1401 = vmatprep.subr.bf16.mxu0 %v8450_v42 }
 0x13a   :  { %1139 = vmatmul.mubr.bf16.gmra.mrb[12].mxu0 %v9102_v50 }
 0x13b   :  { %1148 = vmatprep.mubr.bf16.mxu0 %v9140_v60  ;;  %1402 = vmatpush1.bf16.msra.mxu0 %v8448_v41 }
 0x13c   :  { %1403 = vmatprep.subr.bf16.mxu0 %v8453_v44 }
 0x13f   :  { %1404 = vmatpush1.bf16.msra.mxu0 %v8451_v43 }
 0x142   :  { %1149 = vmatmul.mubr.bf16.gmra.mrb[16].mxu0 %v9121_v55 }
 0x143   :  { %1158 = vmatprep.mubr.bf16.mxu0 %v9159_v1 }
 0x14a   :  { %1159 = vmatmul.mubr.bf16.gmra.mrb[20].mxu0 %v9140_v60 }
 0x14b   :  { %1168 = vmatprep.mubr.bf16.mxu0 %v9175_v5 }
 0x152   :  { %1169 = vmatmul.mubr.bf16.gmra.mrb[24].mxu0 %v9159_v1 }
 0x153   :  { %1178 = vmatprep.mubr.bf16.mxu0 %v9182_v6 }
 0x15a   :  { %1179 = vmatmul.mubr.bf16.gmra.mrb[28].mxu0 %v9175_v5 }
 0x15b   :  { %1188 = vmatprep.mubr.bf16.mxu0 %v9195_v9 }
 0x162   :  { %1189 = vmatmul.mubr.bf16.gmra.mrb[32].mxu0 %v9182_v6 }
 0x163   :  { %1198 = vmatprep.mubr.bf16.mxu0 %v9202_v10 }
 0x16a   :  { %1199 = vmatmul.mubr.bf16.gmra.mrb[36].mxu0 %v9195_v9 }
 0x16b   :  { %1208 = vmatprep.mubr.bf16.mxu0 %v9215_v13 }
 0x172   :  { %1209 = vmatmul.mubr.bf16.gmra.mrb[40].mxu0 %v9202_v10 }
 0x173   :  { %1218 = vmatprep.mubr.bf16.mxu0 %v9222_v14 }
 0x17a   :  { %1219 = vmatmul.mubr.bf16.gmra.mrb[44].mxu0 %v9215_v13 }
 0x17b   :  { %1228 = vmatprep.mubr.bf16.mxu0 %v9232_v16 }
 0x182   :  { %1229 = vmatmul.mubr.bf16.gmra.mrb[48].mxu0 %v9222_v14 }
 0x183   :  { %1238 = vmatprep.mubr.bf16.mxu0 %v9239_v17 }
 0x18a   :  { %1239 = vmatmul.mubr.bf16.gmra.mrb[52].mxu0 %v9232_v16 }
 0x18b   :  { %1248 = vmatprep.mubr.bf16.mxu0 %v9246_v18 }
 0x192   :  { %1249 = vmatmul.mubr.bf16.gmra.mrb[56].mxu0 %v9239_v17 }
 0x193   :  { %1258 = vmatprep.mubr.bf16.mxu0 %v9253_v19 }
 0x19a   :  { %1259 = vmatmul.mubr.bf16.gmra.mrb[60].mxu0 %v9246_v18 }
 0x19b   :  { %1268 = vmatprep.mubr.bf16.mxu0 %v9260_v20 }
 0x1a2   :  { %1269 = vmatmul.mubr.bf16.gmra.mrb[64].mxu0 %v9253_v19 }
 0x1a3   :  { %1278 = vmatprep.mubr.bf16.mxu0 %v9267_v21 }
 0x1aa   :  { %1279 = vmatmul.mubr.bf16.gmra.mrb[68].mxu0 %v9260_v20 }
 0x1ab   :  { %1288 = vmatprep.mubr.bf16.mxu0 %v9274_v22 }
 0x1b2   :  { %1289 = vmatmul.mubr.bf16.gmra.mrb[72].mxu0 %v9267_v21 }
 0x1b3   :  { %1298 = vmatprep.mubr.bf16.mxu0 %v9281_v23 }
 0x1ba   :  { %1299 = vmatmul.mubr.bf16.gmra.mrb[76].mxu0 %v9274_v22 }
 0x1bb   :  { %1308 = vmatprep.mubr.bf16.mxu0 %v9288_v24 }
 0x1c2   :  { %1309 = vmatmul.mubr.bf16.gmra.mrb[80].mxu0 %v9281_v23 }
 0x1c3   :  { %1318 = vmatprep.mubr.bf16.mxu0 %v9295_v25 }
 0x1ca   :  { %1319 = vmatmul.mubr.bf16.gmra.mrb[84].mxu0 %v9288_v24 }
 0x1cb   :  { %1328 = vmatprep.mubr.bf16.mxu0 %v9302_v26 }
 0x1d2   :  { %1329 = vmatmul.mubr.bf16.gmra.mrb[88].mxu0 %v9295_v25 }
 0x1d3   :  { %1338 = vmatprep.mubr.bf16.mxu0 %v9309_v27 }
 0x1da   :  { %1339 = vmatmul.mubr.bf16.gmra.mrb[92].mxu0 %v9302_v26 }
 0x1db   :  { %1348 = vmatprep.mubr.bf16.mxu0 %v9316_v28 }
 0x1e2   :  { %1349 = vmatmul.mubr.bf16.gmra.mrb[96].mxu0 %v9309_v27 }
 0x1e3   :  { %1358 = vmatprep.mubr.bf16.mxu0 %v9323_v29 }
 0x1ea   :  { %1359 = vmatmul.mubr.bf16.gmra.mrb[100].mxu0 %v9316_v28 }
 0x1eb   :  { %1368 = vmatprep.mubr.bf16.mxu0 %v9427_v46 }
 0x1f2   :  { %1369 = vmatmul.mubr.bf16.gmra.mrb[104].mxu0 %v9323_v29 }
 0x1f3   :  { %1378 = vmatprep.mubr.bf16.mxu0 %v9434_v47 }
 0x1fa   :  { %1379 = vmatmul.mubr.bf16.gmra.mrb[108].mxu0 %v9427_v46 }
 0x1fb   :  { %1421 = vmatprep.mubr.bf16.mxu0 %v8897_v48 }
 0x202   :  { %1422 = vmatmul.mubr.bf16.vlgmr.msra.gmra.mrb[0].mxu0 %v9083_v45  ;;  %v8456_v45 = vld [vmem:[%s11260_s2 + $0x4] ss:$12 sps:$4 sm:$0xff]  }
 0x203   :  { %1431 = vmatprep.mubr.bf16.mxu0 %v8897_v48  ;;  %2931 = vmatprep.subr.bf16.mxu1 %v8456_v45 }
 0x204   :  { %2932 = vmatpush1.bf16.msra.mxu1 %v8458_v49  ;;  %v8510_v49 = vld [vmem:[%s11260_s2 + $0x19c] ss:$12 sps:$4 sm:$0xff]  }
 0x20a   :  { %1432 = vmatmul.mubr.bf16.gmra.mrb[4].mxu0 %v9102_v50  ;;  %v8459_v50 = vld [vmem:[%s11260_s2 + $0x1c] ss:$12 sps:$4 sm:$0xff]  }
 0x20b   :  { %1441 = vmatprep.mubr.bf16.mxu0 %v8897_v48  ;;  %2933 = vmatprep.subr.bf16.mxu1 %v8459_v50  ;;  %v8508_v50 = vld [vmem:[%s11260_s2 + $0x198] ss:$12 sps:$4 sm:$0xff]  }
 0x20c   :  { %2934 = vmatpush1.bf16.msra.mxu1 %v8461_v51  ;;  %v8513_v51 = vld [vmem:[%s11260_s2 + $0x1b4] ss:$12 sps:$4 sm:$0xff]  }
 0x20d   :  { %2935 = vmatprep.subr.bf16.mxu1 %v8462_v52 }
 0x210   :  { %2936 = vmatpush1.bf16.msra.mxu1 %v8464_v53 }
 0x211   :  { %2937 = vmatprep.subr.bf16.mxu1 %v8465_v54 }
 0x212   :  { %1442 = vmatmul.mubr.bf16.gmra.mrb[8].mxu0 %v9121_v55  ;;  %v8467_v55 = vld [vmem:[%s11260_s2 + $0x48] ss:$12 sps:$4 sm:$0xff]  }
 0x213   :  { %1451 = vmatprep.mubr.bf16.mxu0 %v8897_v48 }
 0x214   :  { %2938 = vmatpush1.bf16.msra.mxu1 %v8467_v55 }
 0x215   :  { %2939 = vmatprep.subr.bf16.mxu1 %v8468_v56 }
 0x218   :  { %2940 = vmatpush1.bf16.msra.mxu1 %v8470_v57 }
 0x219   :  { %2941 = vmatprep.subr.bf16.mxu1 %v8471_v58 }
 0x21a   :  { %1452 = vmatmul.mubr.bf16.gmra.mrb[12].mxu0 %v9140_v60  ;;  %v8474_v60 = vld [vmem:[%s11260_s2 + $0x94] ss:$12 sps:$4 sm:$0xff]  }
 0x21b   :  { %1461 = vmatprep.mubr.bf16.mxu0 %v8897_v48 }
 0x21c   :  { %2942 = vmatpush1.bf16.msra.mxu1 %v8473_v59  ;;  %v8511_v59 = vld [vmem:[%s11260_s2 + $0x1b0] ss:$12 sps:$4 sm:$0xff]  }
 0x21d   :  { %2943 = vmatprep.subr.bf16.mxu1 %v8474_v60 }
 0x220   :  { %2944 = vmatpush1.bf16.msra.mxu1 %v8476_v61 }
 0x221   :  { %2945 = vmatprep.subr.bf16.mxu1 %v8477_v62 }
 0x222   :  { %1462 = vmatmul.mubr.bf16.gmra.mrb[16].mxu0 %v9159_v1  ;;  %v8482_v1 = vld [vmem:[%s11260_s2 + $0xc0] ss:$12 sps:$4 sm:$0xff]  }
 0x223   :  { %1471 = vmatprep.mubr.bf16.mxu0 %v8897_v48 }
 0x224   :  { %2946 = vmatpush1.bf16.msra.mxu1 %v8479_v63 }
 0x225   :  { %2947 = vmatprep.subr.bf16.mxu1 %v8480_v0  ;;  %v8516_v0 = vld [vmem:[%s11260_s2 + $0x1cc] ss:$12 sps:$4 sm:$0xff]  }
 0x228   :  { %2948 = vmatpush1.bf16.msra.mxu1 %v8482_v1 }
 0x229   :  { %2949 = vmatprep.subr.bf16.mxu1 %v8483_v2 }
 0x22a   :  { %1472 = vmatmul.mubr.bf16.gmra.mrb[20].mxu0 %v9175_v5  ;;  %v8488_v5 = vld [vmem:[%s11260_s2 + $0xf0] ss:$12 sps:$4 sm:$0xff]  }
 0x22b   :  { %1481 = vmatprep.mubr.bf16.mxu0 %v8897_v48 }
 0x22c   :  { %2950 = vmatpush1.bf16.msra.mxu1 %v8485_v3 }
 0x22d   :  { %2951 = vmatprep.subr.bf16.mxu1 %v8486_v4 }
 0x230   :  { %2952 = vmatpush1.bf16.msra.mxu1 %v8488_v5 }
 0x232   :  { %1482 = vmatmul.mubr.bf16.gmra.mrb[24].mxu0 %v9182_v6  ;;  %v8489_v6 = vld [vmem:[%s11260_s2 + $0x10c] ss:$12 sps:$4 sm:$0xff]  }
 0x233   :  { %1491 = vmatprep.mubr.bf16.mxu0 %v8897_v48  ;;  %2953 = vmatprep.subr.bf16.mxu1 %v8489_v6  ;;  %v8514_v6 = vld [vmem:[%s11260_s2 + $0x1c8] ss:$12 sps:$4 sm:$0xff]  }
 0x234   :  { %2954 = vmatpush1.bf16.msra.mxu1 %v8491_v7 }
 0x235   :  { %2955 = vmatprep.subr.bf16.mxu1 %v8493_v8 }
 0x23a   :  { %1492 = vmatmul.mubr.bf16.gmra.mrb[28].mxu0 %v9195_v9  ;;  %v8495_v9 = vld [vmem:[%s11260_s2 + $0x120] ss:$12 sps:$4 sm:$0xff]  }
 0x23b   :  { %1501 = vmatprep.mubr.bf16.mxu0 %v8897_v48  ;;  %2956 = vmatpush1.bf16.msra.mxu1 %v8495_v9  ;;  %v8519_v9 = vld [vmem:[%s11260_s2 + $0x1e4] ss:$12 sps:$4 sm:$0xff]  }
 0x242   :  { %1502 = vmatmul.mubr.bf16.gmra.mrb[32].mxu0 %v9202_v10  ;;  %v8496_v10 = vld [vmem:[%s11260_s2 + $0x13c] ss:$12 sps:$4 sm:$0xff]  }
 0x243   :  { %1511 = vmatprep.mubr.bf16.mxu0 %v8897_v48  ;;  %2957 = vmatprep.subr.bf16.mxu1 %v8496_v10 }
 0x244   :  { %2958 = vmatpush1.bf16.msra.mxu1 %v8498_v11 }
 0x245   :  { %2959 = vmatprep.subr.bf16.mxu1 %v8499_v12 }
 0x24a   :  { %1512 = vmatmul.mubr.bf16.gmra.mrb[36].mxu0 %v9215_v13  ;;  %v8501_v13 = vld [vmem:[%s11260_s2 + $0x150] ss:$12 sps:$4 sm:$0xff]  }
 0x24b   :  { %1521 = vmatprep.mubr.bf16.mxu0 %v8897_v48  ;;  %2960 = vmatpush1.bf16.msra.mxu1 %v8501_v13 }
 0x252   :  { %1522 = vmatmul.mubr.bf16.gmra.mrb[40].mxu0 %v9222_v14  ;;  %v8502_v14 = vld [vmem:[%s11260_s2 + $0x16c] ss:$12 sps:$4 sm:$0xff]  }
 0x253   :  { %1531 = vmatprep.mubr.bf16.mxu0 %v8897_v48  ;;  %2961 = vmatprep.subr.bf16.mxu1 %v8502_v14 }
 0x254   :  { %2962 = vmatpush1.bf16.msra.mxu1 %v8504_v15 }
 0x25a   :  { %1532 = vmatmul.mubr.bf16.gmra.mrb[44].mxu0 %v9232_v16  ;;  %v8507_v16 = vld [vmem:[%s11260_s2 + $0x184] ss:$12 sps:$4 sm:$0xff]  }
 0x25b   :  { %1541 = vmatprep.mubr.bf16.mxu0 %v8897_v48  ;;  %3084 = vmatprep.subr.bf16.mxu1 %v8507_v16 }
 0x262   :  { %1542 = vmatmul.mubr.bf16.gmra.mrb[48].mxu0 %v9239_v17 }
 0x263   :  { %1551 = vmatprep.mubr.bf16.mxu0 %v8897_v48 }
 0x26a   :  { %1552 = vmatmul.mubr.bf16.gmra.mrb[52].mxu0 %v9246_v18 }
 0x26b   :  { %1561 = vmatprep.mubr.bf16.mxu0 %v8897_v48 }
 0x272   :  { %1562 = vmatmul.mubr.bf16.gmra.mrb[56].mxu0 %v9253_v19  ;;  %v8492_v19 = vld [vmem:[%s11259_s0 + $0xf8] sm:$0xff]  }
 0x273   :  { %1571 = vmatprep.mubr.bf16.mxu0 %v8897_v48 }
 0x27a   :  { %1572 = vmatmul.mubr.bf16.gmra.mrb[60].mxu0 %v9260_v20 }
 0x27b   :  { %1581 = vmatprep.mubr.bf16.mxu0 %v8897_v48 }
 0x282   :  { %1582 = vmatmul.mubr.bf16.gmra.mrb[64].mxu0 %v9267_v21 }
 0x283   :  { %1591 = vmatprep.mubr.bf16.mxu0 %v8897_v48 }
 0x28a   :  { %1592 = vmatmul.mubr.bf16.gmra.mrb[68].mxu0 %v9274_v22 }
 0x28b   :  { %1601 = vmatprep.mubr.bf16.mxu0 %v8897_v48 }
 0x292   :  { %1602 = vmatmul.mubr.bf16.gmra.mrb[72].mxu0 %v9281_v23 }
 0x293   :  { %1611 = vmatprep.mubr.bf16.mxu0 %v8897_v48 }
 0x29a   :  { %1612 = vmatmul.mubr.bf16.gmra.mrb[76].mxu0 %v9288_v24 }
 0x29b   :  { %1621 = vmatprep.mubr.bf16.mxu0 %v8897_v48 }
 0x2a2   :  { %1622 = vmatmul.mubr.bf16.gmra.mrb[80].mxu0 %v9295_v25 }
 0x2a3   :  { %1631 = vmatprep.mubr.bf16.mxu0 %v8897_v48 }
 0x2aa   :  { %1632 = vmatmul.mubr.bf16.gmra.mrb[84].mxu0 %v9302_v26 }
 0x2ab   :  { %1641 = vmatprep.mubr.bf16.mxu0 %v8897_v48 }
 0x2b2   :  { %1642 = vmatmul.mubr.bf16.gmra.mrb[88].mxu0 %v9309_v27 }
 0x2b3   :  { %1651 = vmatprep.mubr.bf16.mxu0 %v8897_v48 }
 0x2ba   :  { %1652 = vmatmul.mubr.bf16.gmra.mrb[92].mxu0 %v9316_v28 }
 0x2bb   :  { %1661 = vmatprep.mubr.bf16.mxu0 %v8897_v48 }
 0x2c2   :  { %1662 = vmatmul.mubr.bf16.gmra.mrb[96].mxu0 %v9323_v29 }
 0x2c3   :  { %1671 = vmatprep.mubr.bf16.mxu0 %v8897_v48 }
 0x2ca   :  { %1672 = vmatmul.mubr.bf16.gmra.mrb[100].mxu0 %v9427_v46 }
 0x2cb   :  { %1681 = vmatprep.mubr.bf16.mxu0 %v8897_v48 }
 0x2d2   :  { %1682 = vmatmul.mubr.bf16.gmra.mrb[104].mxu0 %v9434_v47 }
 0x2d3   :  { %1691 = vmatprep.mubr.bf16.mxu0 %v8897_v48  ;;  %v8505_v48 = vld [vmem:[%s11260_s2 + $0x180] ss:$12 sps:$4 sm:$0xff]  }
 0x2d5   :  { %v1423_v17 = vpop.f32.mrb[0].mxu0 }
 0x2d6   :  { %v1425_v18 = vpop.f32.mrb[1].mxu0  ;;  %v1702_v23 = vmax.f32 %v1423_v17, 0.0  ;;  %v8517_v17 = vld [vmem:[%s11260_s2 + $0x1e0] ss:$12 sps:$4 sm:$0xff]  }
 0x2d7   :  { %v1427_v20 = vpop.f32.mrb[2].mxu0  ;;  %v1703_v26 = vmax.f32 %v1425_v18, 0.0 }
 0x2d8   :  { %v1429_v21 = vpop.f32.mrb[3].mxu0  ;;  %v1704_v29 = vmax.f32 %v1427_v20, 0.0  ;;  %v8520_v20 = vld [vmem:[%s11260_s2 + $0x1f8] ss:$12 sps:$4 sm:$0xff]  }
 0x2d9   :  { %v1705_v33 = vmax.f32 %v1429_v21, 0.0  ;;  %v8525_v21 = vld [vmem:[%s11260_s2 + $0x214] ss:$12 sps:$4 sm:$0xff]  }
 0x2da   :  { %1692 = vmatmul.mubr.bf16.gmra.mrb[108].mxu0 %v8492_v19  ;;  %v8522_v19 = vld [vmem:[%s11260_s2 + $0x1fc] ss:$12 sps:$4 sm:$0xff]  }
 0x2dd   :  { %v1433_v22 = vpop.f32.mrb[4].mxu0 }
 0x2de   :  { %v1706_v24 = vmax.f32 %v1433_v22, 0.0  ;;  %v1435_v25 = vpop.f32.mrb[5].mxu0 }
 0x2df   :  { %v1707_v27 = vmax.f32 %v1435_v25, 0.0  ;;  %v1437_v28 = vpop.f32.mrb[6].mxu0 }
 0x2e0   :  { %v1814_v30 = vadd.f32 %v1706_v24, %v1702_v23  ;;  %v1708_v31 = vmax.f32 %v1437_v28, 0.0  ;;  %v1439_v32 = vpop.f32.mrb[7].mxu0 }
 0x2e1   :  { %v1815_v34 = vadd.f32 %v1707_v27, %v1703_v26  ;;  %v1709_v35 = vmax.f32 %v1439_v32, 0.0 }
 0x2e2   :  { %v1816_v36 = vadd.f32 %v1708_v31, %v1704_v29  ;;  %v1818_v38 = vmul.f32 0.5, %v1814_v30  ;;  %v8523_v29 = vld [vmem:[%s11260_s2 + $0x210] ss:$12 sps:$4 sm:$0xff]  }
 0x2e3   :  { %v1817_v37 = vadd.f32 %v1709_v35, %v1705_v33  ;;  %v1819_v40 = vmul.f32 0.5, %v1815_v34  ;;  %v8528_v34 = vld [vmem:[%s11260_s2 + $0x22c] ss:$12 sps:$4 sm:$0xff]  }
 0x2e4   :  { %v1820_v39 = vmul.f32 0.5, %v1816_v36 }
 0x2e5   :  { %v1821_v41 = vmul.f32 0.5, %v1817_v37  ;;  %v1443_v42 = vpop.f32.mrb[8].mxu0 }
 0x2e6   :  { %v1445_v43 = vpop.f32.mrb[9].mxu0  ;;  %v9596_v44 = vpack.c.bf16 %v1820_v39, %v1818_v38  ;;  %v1710_v53 = vmax.f32 %v1443_v42, 0.0 }
 0x2e7   :  { %v1447_v46 = vpop.f32.mrb[10].mxu0  ;;  %v9598_v47 = vpack.c.bf16 %v1821_v41, %v1819_v40  ;;  %v1711_v56 = vmax.f32 %v1445_v43, 0.0  ;;  %v8526_v40 = vld [vmem:[%s11260_s2 + $0x228] ss:$12 sps:$4 sm:$0xff]   ;;  %v8531_v43 = vld [vmem:[%s11260_s2 + $0x244] ss:$12 sps:$4 sm:$0xff]  }
 0x2e8   :  { %v1449_v45 = vpop.f32.mrb[11].mxu0  ;;  %v1712_v60 = vmax.f32 %v1447_v46, 0.0 }
 0x2e9   :  { %2963 = vmatprep.mubr.bf16.mxu1 %v9598_v47  ;;  %v1713_v1 = vmax.f32 %v1449_v45, 0.0 }
 0x2ea   :  { %2964 = vmatmul.mubr.bf16.vlgmr.msra.gmra.mrb[0].mxu1 %v9596_v44 }
 0x2eb   :  { %3085 = vmatpush1.bf16.msra.mxu1 %v8505_v48 }
 0x2ec   :  { %3086 = vmatprep.subr.bf16.mxu1 %v8510_v49 }
 0x2ed   :  { %v1453_v52 = vpop.f32.mrb[12].mxu0 }
 0x2ee   :  { %v1714_v54 = vmax.f32 %v1453_v52, 0.0  ;;  %v1455_v55 = vpop.f32.mrb[13].mxu0 }
 0x2ef   :  { %v1715_v57 = vmax.f32 %v1455_v55, 0.0  ;;  %v1457_v58 = vpop.f32.mrb[14].mxu0  ;;  %3087 = vmatpush1.bf16.msra.mxu1 %v8508_v50  ;;  %v8534_v55 = vld [vmem:[%s11260_s2 + $0x25c] ss:$12 sps:$4 sm:$0xff]  }
 0x2f0   :  { %v1822_v61 = vadd.f32 %v1714_v54, %v1710_v53  ;;  %v1716_v62 = vmax.f32 %v1457_v58, 0.0  ;;  %v1459_v63 = vpop.f32.mrb[15].mxu0  ;;  %3088 = vmatprep.subr.bf16.mxu1 %v8513_v51  ;;  %v8529_v53 = vld [vmem:[%s11260_s2 + $0x240] ss:$12 sps:$4 sm:$0xff]  }
 0x2f1   :  { %v1823_v2 = vadd.f32 %v1715_v57, %v1711_v56  ;;  %v1717_v3 = vmax.f32 %v1459_v63, 0.0  ;;  %v8532_v56 = vld [vmem:[%s11260_s2 + $0x258] ss:$12 sps:$4 sm:$0xff]   ;;  %v8537_v57 = vld [vmem:[%s11260_s2 + $0x274] ss:$12 sps:$4 sm:$0xff]  }
 0x2f2   :  { %v1824_v4 = vadd.f32 %v1716_v62, %v1712_v60  ;;  %v1826_v7 = vmul.f32 0.5, %v1822_v61 }
 0x2f3   :  { %v1825_v5 = vadd.f32 %v1717_v3, %v1713_v1  ;;  %3089 = vmatpush1.bf16.msra.mxu1 %v8511_v59  ;;  %v1827_v10 = vmul.f32 0.5, %v1823_v2  ;;  %v8535_v1 = vld [vmem:[%s11260_s2 + $0x270] ss:$12 sps:$4 sm:$0xff]  }
 0x2f4   :  { %v1828_v8 = vmul.f32 0.5, %v1824_v4  ;;  %3090 = vmatprep.subr.bf16.mxu1 %v8516_v0 }
 0x2f5   :  { %v1829_v11 = vmul.f32 0.5, %v1825_v5  ;;  %v1463_v12 = vpop.f32.mrb[16].mxu0 }
 0x2f6   :  { %v9626_v13 = vpack.c.bf16 %v1828_v8, %v1826_v7  ;;  %v1465_v14 = vpop.f32.mrb[17].mxu0  ;;  %v1718_v23 = vmax.f32 %v1463_v12, 0.0  ;;  %v8538_v12 = vld [vmem:[%s11260_s2 + $0x288] ss:$12 sps:$4 sm:$0xff]  }
 0x2f7   :  { %v9628_v15 = vpack.c.bf16 %v1829_v11, %v1827_v10  ;;  %v1467_v16 = vpop.f32.mrb[18].mxu0  ;;  %3091 = vmatpush1.bf16.msra.mxu1 %v8514_v6  ;;  %v1719_v26 = vmax.f32 %v1465_v14, 0.0  ;;  %v8540_v6 = vld [vmem:[%s11260_s2 + $0x28c] ss:$12 sps:$4 sm:$0xff]  }
 0x2f8   :  { %v1469_v18 = vpop.f32.mrb[19].mxu0  ;;  %3092 = vmatprep.subr.bf16.mxu1 %v8519_v9  ;;  %v1720_v30 = vmax.f32 %v1467_v16, 0.0 }
 0x2f9   :  { %2973 = vmatprep.mubr.bf16.mxu1 %v9628_v15  ;;  %v1721_v35 = vmax.f32 %v1469_v18, 0.0 }
 0x2fa   :  { %2974 = vmatmul.mubr.bf16.gmra.mrb[4].mxu1 %v9626_v13 }
 0x2fb   :  { %3093 = vmatpush1.bf16.msra.mxu1 %v8517_v17  ;;  %v8543_v17 = vld [vmem:[%s11260_s2 + $0x2a4] ss:$12 sps:$4 sm:$0xff]  }
 0x2fc   :  { %3094 = vmatprep.subr.bf16.mxu1 %v8522_v19 }
 0x2fd   :  { %v1473_v22 = vpop.f32.mrb[20].mxu0 }
 0x2fe   :  { %v1722_v24 = vmax.f32 %v1473_v22, 0.0  ;;  %v1475_v25 = vpop.f32.mrb[21].mxu0 }
 0x2ff   :  { %v1723_v27 = vmax.f32 %v1475_v25, 0.0  ;;  %v1477_v28 = vpop.f32.mrb[22].mxu0  ;;  %3095 = vmatpush1.bf16.msra.mxu1 %v8520_v20  ;;  %v8541_v25 = vld [vmem:[%s11260_s2 + $0x2a0] ss:$12 sps:$4 sm:$0xff]  }
 0x300   :  { %v1830_v31 = vadd.f32 %v1722_v24, %v1718_v23  ;;  %v1724_v32 = vmax.f32 %v1477_v28, 0.0  ;;  %v1479_v33 = vpop.f32.mrb[23].mxu0  ;;  %3096 = vmatprep.subr.bf16.mxu1 %v8525_v21  ;;  %v8544_v28 = vld [vmem:[%s11260_s2 + $0x2b8] ss:$12 sps:$4 sm:$0xff]  }
 0x301   :  { %v1831_v36 = vadd.f32 %v1723_v27, %v1719_v26  ;;  %v1725_v37 = vmax.f32 %v1479_v33, 0.0  ;;  %v8546_v27 = vld [vmem:[%s11260_s2 + $0x2bc] ss:$12 sps:$4 sm:$0xff]  }
 0x302   :  { %v1832_v38 = vadd.f32 %v1724_v32, %v1720_v30  ;;  %v1834_v41 = vmul.f32 0.5, %v1830_v31 }
 0x303   :  { %v1833_v39 = vadd.f32 %v1725_v37, %v1721_v35  ;;  %3097 = vmatpush1.bf16.msra.mxu1 %v8523_v29  ;;  %v1835_v46 = vmul.f32 0.5, %v1831_v36  ;;  %v8549_v29 = vld [vmem:[%s11260_s2 + $0x2d4] ss:$12 sps:$4 sm:$0xff]   ;;  %v8547_v37 = vld [vmem:[%s11260_s2 + $0x2d0] ss:$12 sps:$4 sm:$0xff]  }
 0x304   :  { %v1836_v42 = vmul.f32 0.5, %v1832_v38  ;;  %3098 = vmatprep.subr.bf16.mxu1 %v8528_v34 }
 0x305   :  { %v1837_v48 = vmul.f32 0.5, %v1833_v39  ;;  %v1483_v45 = vpop.f32.mrb[24].mxu0 }
 0x306   :  { %v9656_v49 = vpack.c.bf16 %v1836_v42, %v1834_v41  ;;  %v1485_v50 = vpop.f32.mrb[25].mxu0  ;;  %v1726_v59 = vmax.f32 %v1483_v45, 0.0  ;;  %v8552_v42 = vld [vmem:[%s11260_s2 + $0x2ec] ss:$12 sps:$4 sm:$0xff]  }
 0x307   :  { %v9658_v51 = vpack.c.bf16 %v1837_v48, %v1835_v46  ;;  %v1487_v52 = vpop.f32.mrb[26].mxu0  ;;  %3099 = vmatpush1.bf16.msra.mxu1 %v8526_v40  ;;  %v1727_v62 = vmax.f32 %v1485_v50, 0.0 }
 0x308   :  { %v1489_v54 = vpop.f32.mrb[27].mxu0  ;;  %3100 = vmatprep.subr.bf16.mxu1 %v8531_v43  ;;  %v1728_v2 = vmax.f32 %v1487_v52, 0.0  ;;  %v8550_v52 = vld [vmem:[%s11260_s2 + $0x2e8] ss:$12 sps:$4 sm:$0xff]  }
 0x309   :  { %2983 = vmatprep.mubr.bf16.mxu1 %v9658_v51  ;;  %v1729_v7 = vmax.f32 %v1489_v54, 0.0 }
 0x30a   :  { %2984 = vmatmul.mubr.bf16.gmra.mrb[8].mxu1 %v9656_v49 }
 0x30b   :  { %3101 = vmatpush1.bf16.msra.mxu1 %v8529_v53 }
 0x30c   :  { %3102 = vmatprep.subr.bf16.mxu1 %v8534_v55 }
 0x30d   :  { %v1493_v58 = vpop.f32.mrb[28].mxu0 }
 0x30e   :  { %v1730_v60 = vmax.f32 %v1493_v58, 0.0  ;;  %v1495_v61 = vpop.f32.mrb[29].mxu0 }
 0x30f   :  { %v1731_v63 = vmax.f32 %v1495_v61, 0.0  ;;  %v1497_v0 = vpop.f32.mrb[30].mxu0  ;;  %3103 = vmatpush1.bf16.msra.mxu1 %v8532_v56 }
 0x310   :  { %v1838_v3 = vadd.f32 %v1730_v60, %v1726_v59  ;;  %v1732_v4 = vmax.f32 %v1497_v0, 0.0  ;;  %v1499_v5 = vpop.f32.mrb[31].mxu0  ;;  %3104 = vmatprep.subr.bf16.mxu1 %v8537_v57 }
 0x311   :  { %v1839_v8 = vadd.f32 %v1731_v63, %v1727_v62  ;;  %v1733_v9 = vmax.f32 %v1499_v5, 0.0  ;;  %v8555_v62 = vld [vmem:[%s11260_s2 + $0x304] ss:$12 sps:$4 sm:$0xff]  }
 0x312   :  { %v1840_v10 = vadd.f32 %v1732_v4, %v1728_v2  ;;  %v1842_v14 = vmul.f32 0.5, %v1838_v3 }
 0x313   :  { %v1841_v11 = vadd.f32 %v1733_v9, %v1729_v7  ;;  %3105 = vmatpush1.bf16.msra.mxu1 %v8535_v1  ;;  %v1843_v18 = vmul.f32 0.5, %v1839_v8 }
 0x314   :  { %v1844_v16 = vmul.f32 0.5, %v1840_v10  ;;  %3106 = vmatprep.subr.bf16.mxu1 %v8540_v6 }
 0x315   :  { %v1845_v19 = vmul.f32 0.5, %v1841_v11  ;;  %v1503_v20 = vpop.f32.mrb[32].mxu0 }
 0x316   :  { %v9686_v21 = vpack.c.bf16 %v1844_v16, %v1842_v14  ;;  %v1505_v22 = vpop.f32.mrb[33].mxu0  ;;  %v1734_v31 = vmax.f32 %v1503_v20, 0.0 }
 0x317   :  { %v9688_v23 = vpack.c.bf16 %v1845_v19, %v1843_v18  ;;  %v1507_v24 = vpop.f32.mrb[34].mxu0  ;;  %3107 = vmatpush1.bf16.msra.mxu1 %v8538_v12  ;;  %v1735_v34 = vmax.f32 %v1505_v22, 0.0 }
 0x318   :  { %v1509_v26 = vpop.f32.mrb[35].mxu0  ;;  %3108 = vmatprep.subr.bf16.mxu1 %v8543_v17  ;;  %v1736_v38 = vmax.f32 %v1507_v24, 0.0 }
 0x319   :  { %2993 = vmatprep.mubr.bf16.mxu1 %v9688_v23  ;;  %v1737_v43 = vmax.f32 %v1509_v26, 0.0 }
 0x31a   :  { %2994 = vmatmul.mubr.bf16.gmra.mrb[12].mxu1 %v9686_v21 }
 0x31b   :  { %3109 = vmatpush1.bf16.msra.mxu1 %v8541_v25 }
 0x31c   :  { %3110 = vmatprep.subr.bf16.mxu1 %v8546_v27 }
 0x31d   :  { %v1513_v30 = vpop.f32.mrb[36].mxu0 }
 0x31e   :  { %v1738_v32 = vmax.f32 %v1513_v30, 0.0  ;;  %v1515_v33 = vpop.f32.mrb[37].mxu0 }
 0x31f   :  { %v1739_v35 = vmax.f32 %v1515_v33, 0.0  ;;  %v1517_v36 = vpop.f32.mrb[38].mxu0  ;;  %3111 = vmatpush1.bf16.msra.mxu1 %v8544_v28 }
 0x320   :  { %v1846_v39 = vadd.f32 %v1738_v32, %v1734_v31  ;;  %v1740_v40 = vmax.f32 %v1517_v36, 0.0  ;;  %v1519_v41 = vpop.f32.mrb[39].mxu0  ;;  %3112 = vmatprep.subr.bf16.mxu1 %v8549_v29 }
 0x321   :  { %v1847_v46 = vadd.f32 %v1739_v35, %v1735_v34  ;;  %v1741_v48 = vmax.f32 %v1519_v41, 0.0 }
 0x322   :  { %v1848_v45 = vadd.f32 %v1740_v40, %v1736_v38  ;;  %v1850_v53 = vmul.f32 0.5, %v1846_v39 }
 0x323   :  { %v1849_v50 = vadd.f32 %v1741_v48, %v1737_v43  ;;  %3113 = vmatpush1.bf16.msra.mxu1 %v8547_v37  ;;  %v1851_v55 = vmul.f32 0.5, %v1847_v46 }
 0x324   :  { %v1852_v54 = vmul.f32 0.5, %v1848_v45  ;;  %3114 = vmatprep.subr.bf16.mxu1 %v8552_v42 }
 0x325   :  { %v1853_v56 = vmul.f32 0.5, %v1849_v50  ;;  %v1523_v57 = vpop.f32.mrb[40].mxu0 }
 0x326   :  { %v9713_v58 = vpack.c.bf16 %v1852_v54, %v1850_v53  ;;  %v1525_v59 = vpop.f32.mrb[41].mxu0  ;;  %v1742_v1 = vmax.f32 %v1523_v57, 0.0 }
 0x327   :  { %v9715_v60 = vpack.c.bf16 %v1853_v56, %v1851_v55  ;;  %v1527_v61 = vpop.f32.mrb[42].mxu0  ;;  %3115 = vmatpush1.bf16.msra.mxu1 %v8550_v52  ;;  %v1743_v4 = vmax.f32 %v1525_v59, 0.0 }
 0x328   :  { %v1529_v63 = vpop.f32.mrb[43].mxu0  ;;  %3237 = vmatprep.subr.bf16.mxu1 %v8555_v62  ;;  %v1744_v7 = vmax.f32 %v1527_v61, 0.0 }
 0x329   :  { %3003 = vmatprep.mubr.bf16.mxu1 %v9715_v60  ;;  %v1745_v11 = vmax.f32 %v1529_v63, 0.0 }
 0x32a   :  { %3004 = vmatmul.mubr.bf16.gmra.mrb[16].mxu1 %v9713_v58 }
 0x32d   :  { %v1533_v0 = vpop.f32.mrb[44].mxu0 }
 0x32e   :  { %v1746_v2 = vmax.f32 %v1533_v0, 0.0  ;;  %v1535_v3 = vpop.f32.mrb[45].mxu0 }
 0x32f   :  { %v1747_v5 = vmax.f32 %v1535_v3, 0.0  ;;  %v1537_v6 = vpop.f32.mrb[46].mxu0 }
 0x330   :  { %v1854_v8 = vadd.f32 %v1746_v2, %v1742_v1  ;;  %v1748_v9 = vmax.f32 %v1537_v6, 0.0  ;;  %v1539_v10 = vpop.f32.mrb[47].mxu0 }
 0x331   :  { %v1855_v12 = vadd.f32 %v1747_v5, %v1743_v4  ;;  %v1749_v14 = vmax.f32 %v1539_v10, 0.0 }
 0x332   :  { %v1856_v16 = vadd.f32 %v1748_v9, %v1744_v7  ;;  %v1858_v18 = vmul.f32 0.5, %v1854_v8 }
 0x333   :  { %v1857_v17 = vadd.f32 %v1749_v14, %v1745_v11  ;;  %v1859_v20 = vmul.f32 0.5, %v1855_v12 }
 0x334   :  { %v1860_v19 = vmul.f32 0.5, %v1856_v16 }
 0x335   :  { %v1861_v22 = vmul.f32 0.5, %v1857_v17  ;;  %v1543_v24 = vpop.f32.mrb[48].mxu0 }
 0x336   :  { %v9722_v25 = vpack.c.bf16 %v1860_v19, %v1858_v18  ;;  %v1545_v26 = vpop.f32.mrb[49].mxu0  ;;  %v1750_v31 = vmax.f32 %v1543_v24, 0.0 }
 0x337   :  { %v9724_v27 = vpack.c.bf16 %v1861_v22, %v1859_v20  ;;  %v1547_v28 = vpop.f32.mrb[50].mxu0  ;;  %v1751_v34 = vmax.f32 %v1545_v26, 0.0 }
 0x338   :  { %v1549_v29 = vpop.f32.mrb[51].mxu0  ;;  %v1752_v37 = vmax.f32 %v1547_v28, 0.0 }
 0x339   :  { %3013 = vmatprep.mubr.bf16.mxu1 %v9724_v27  ;;  %v1753_v41 = vmax.f32 %v1549_v29, 0.0 }
 0x33a   :  { %3014 = vmatmul.mubr.bf16.gmra.mrb[20].mxu1 %v9722_v25 }
 0x33d   :  { %v1553_v30 = vpop.f32.mrb[52].mxu0 }
 0x33e   :  { %v1754_v32 = vmax.f32 %v1553_v30, 0.0  ;;  %v1555_v33 = vpop.f32.mrb[53].mxu0 }
 0x33f   :  { %v1755_v35 = vmax.f32 %v1555_v33, 0.0  ;;  %v1557_v36 = vpop.f32.mrb[54].mxu0 }
 0x340   :  { %v1862_v38 = vadd.f32 %v1754_v32, %v1750_v31  ;;  %v1756_v39 = vmax.f32 %v1557_v36, 0.0  ;;  %v1559_v40 = vpop.f32.mrb[55].mxu0 }
 0x341   :  { %v1863_v42 = vadd.f32 %v1755_v35, %v1751_v34  ;;  %v1757_v43 = vmax.f32 %v1559_v40, 0.0 }
 0x342   :  { %v1864_v46 = vadd.f32 %v1756_v39, %v1752_v37  ;;  %v1866_v45 = vmul.f32 0.5, %v1862_v38 }
 0x343   :  { %v1865_v48 = vadd.f32 %v1757_v43, %v1753_v41  ;;  %v1867_v52 = vmul.f32 0.5, %v1863_v42 }
 0x344   :  { %v1868_v50 = vmul.f32 0.5, %v1864_v46 }
 0x345   :  { %v1869_v53 = vmul.f32 0.5, %v1865_v48  ;;  %v1563_v54 = vpop.f32.mrb[56].mxu0 }
 0x346   :  { %v9728_v55 = vpack.c.bf16 %v1868_v50, %v1866_v45  ;;  %v1565_v56 = vpop.f32.mrb[57].mxu0  ;;  %v1758_v63 = vmax.f32 %v1563_v54, 0.0 }
 0x347   :  { %v9730_v57 = vpack.c.bf16 %v1869_v53, %v1867_v52  ;;  %v1567_v59 = vpop.f32.mrb[58].mxu0  ;;  %v1759_v2 = vmax.f32 %v1565_v56, 0.0 }
 0x348   :  { %v1569_v61 = vpop.f32.mrb[59].mxu0  ;;  %v1760_v5 = vmax.f32 %v1567_v59, 0.0 }
 0x349   :  { %3023 = vmatprep.mubr.bf16.mxu1 %v9730_v57  ;;  %v1761_v9 = vmax.f32 %v1569_v61, 0.0 }
 0x34a   :  { %3024 = vmatmul.mubr.bf16.gmra.mrb[24].mxu1 %v9728_v55 }
 0x34d   :  { %v1573_v62 = vpop.f32.mrb[60].mxu0 }
 0x34e   :  { %v1762_v0 = vmax.f32 %v1573_v62, 0.0  ;;  %v1575_v1 = vpop.f32.mrb[61].mxu0 }
 0x34f   :  { %v1763_v3 = vmax.f32 %v1575_v1, 0.0  ;;  %v1577_v4 = vpop.f32.mrb[62].mxu0 }
 0x350   :  { %v1870_v6 = vadd.f32 %v1762_v0, %v1758_v63  ;;  %v1764_v7 = vmax.f32 %v1577_v4, 0.0  ;;  %v1579_v8 = vpop.f32.mrb[63].mxu0 }
 0x351   :  { %v1871_v10 = vadd.f32 %v1763_v3, %v1759_v2  ;;  %v1765_v11 = vmax.f32 %v1579_v8, 0.0 }
 0x352   :  { %v1872_v12 = vadd.f32 %v1764_v7, %v1760_v5  ;;  %v1874_v16 = vmul.f32 0.5, %v1870_v6 }
 0x353   :  { %v1873_v14 = vadd.f32 %v1765_v11, %v1761_v9  ;;  %v1875_v18 = vmul.f32 0.5, %v1871_v10 }
 0x354   :  { %v1876_v17 = vmul.f32 0.5, %v1872_v12 }
 0x355   :  { %v1877_v19 = vmul.f32 0.5, %v1873_v14  ;;  %v1583_v20 = vpop.f32.mrb[64].mxu0 }
 0x356   :  { %v9734_v22 = vpack.c.bf16 %v1876_v17, %v1874_v16  ;;  %v1585_v24 = vpop.f32.mrb[65].mxu0  ;;  %v1766_v31 = vmax.f32 %v1583_v20, 0.0 }
 0x357   :  { %v9736_v26 = vpack.c.bf16 %v1877_v19, %v1875_v18  ;;  %v1587_v28 = vpop.f32.mrb[66].mxu0  ;;  %v1767_v34 = vmax.f32 %v1585_v24, 0.0 }
 0x358   :  { %v1589_v29 = vpop.f32.mrb[67].mxu0  ;;  %v1768_v37 = vmax.f32 %v1587_v28, 0.0 }
 0x359   :  { %3033 = vmatprep.mubr.bf16.mxu1 %v9736_v26  ;;  %v1769_v41 = vmax.f32 %v1589_v29, 0.0 }
 0x35a   :  { %3034 = vmatmul.mubr.bf16.gmra.mrb[28].mxu1 %v9734_v22 }
 0x35d   :  { %v1593_v30 = vpop.f32.mrb[68].mxu0 }
 0x35e   :  { %v1770_v32 = vmax.f32 %v1593_v30, 0.0  ;;  %v1595_v33 = vpop.f32.mrb[69].mxu0 }
 0x35f   :  { %v1771_v35 = vmax.f32 %v1595_v33, 0.0  ;;  %v1597_v36 = vpop.f32.mrb[70].mxu0 }
 0x360   :  { %v1878_v38 = vadd.f32 %v1770_v32, %v1766_v31  ;;  %v1772_v39 = vmax.f32 %v1597_v36, 0.0  ;;  %v1599_v40 = vpop.f32.mrb[71].mxu0 }
 0x361   :  { %v1879_v42 = vadd.f32 %v1771_v35, %v1767_v34  ;;  %v1773_v43 = vmax.f32 %v1599_v40, 0.0 }
 0x362   :  { %v1880_v46 = vadd.f32 %v1772_v39, %v1768_v37  ;;  %v1882_v45 = vmul.f32 0.5, %v1878_v38 }
 0x363   :  { %v1881_v48 = vadd.f32 %v1773_v43, %v1769_v41  ;;  %v1883_v52 = vmul.f32 0.5, %v1879_v42 }
 0x364   :  { %v1884_v50 = vmul.f32 0.5, %v1880_v46 }
 0x365   :  { %v1885_v53 = vmul.f32 0.5, %v1881_v48  ;;  %v1603_v54 = vpop.f32.mrb[72].mxu0 }
 0x366   :  { %v9740_v56 = vpack.c.bf16 %v1884_v50, %v1882_v45  ;;  %v1605_v59 = vpop.f32.mrb[73].mxu0  ;;  %v1774_v1 = vmax.f32 %v1603_v54, 0.0 }
 0x367   :  { %v9742_v61 = vpack.c.bf16 %v1885_v53, %v1883_v52  ;;  %v1607_v62 = vpop.f32.mrb[74].mxu0  ;;  %v1775_v4 = vmax.f32 %v1605_v59, 0.0 }
 0x368   :  { %v1609_v63 = vpop.f32.mrb[75].mxu0  ;;  %v1776_v7 = vmax.f32 %v1607_v62, 0.0 }
 0x369   :  { %3043 = vmatprep.mubr.bf16.mxu1 %v9742_v61  ;;  %v1777_v11 = vmax.f32 %v1609_v63, 0.0 }
 0x36a   :  { %3044 = vmatmul.mubr.bf16.gmra.mrb[32].mxu1 %v9740_v56 }
 0x36d   :  { %v1613_v0 = vpop.f32.mrb[76].mxu0 }
 0x36e   :  { %v1778_v2 = vmax.f32 %v1613_v0, 0.0  ;;  %v1615_v3 = vpop.f32.mrb[77].mxu0 }
 0x36f   :  { %v1779_v5 = vmax.f32 %v1615_v3, 0.0  ;;  %v1617_v6 = vpop.f32.mrb[78].mxu0 }
 0x370   :  { %v1886_v8 = vadd.f32 %v1778_v2, %v1774_v1  ;;  %v1780_v9 = vmax.f32 %v1617_v6, 0.0  ;;  %v1619_v10 = vpop.f32.mrb[79].mxu0 }
 0x371   :  { %v1887_v12 = vadd.f32 %v1779_v5, %v1775_v4  ;;  %v1781_v14 = vmax.f32 %v1619_v10, 0.0 }
 0x372   :  { %v1888_v16 = vadd.f32 %v1780_v9, %v1776_v7  ;;  %v1890_v18 = vmul.f32 0.5, %v1886_v8 }
 0x373   :  { %v1889_v17 = vadd.f32 %v1781_v14, %v1777_v11  ;;  %v1891_v20 = vmul.f32 0.5, %v1887_v12 }
 0x374   :  { %v1892_v19 = vmul.f32 0.5, %v1888_v16 }
 0x375   :  { %v1893_v24 = vmul.f32 0.5, %v1889_v17  ;;  %v1623_v28 = vpop.f32.mrb[80].mxu0 }
 0x376   :  { %v9746_v29 = vpack.c.bf16 %v1892_v19, %v1890_v18  ;;  %v1625_v30 = vpop.f32.mrb[81].mxu0  ;;  %v1782_v35 = vmax.f32 %v1623_v28, 0.0 }
 0x377   :  { %v9748_v31 = vpack.c.bf16 %v1893_v24, %v1891_v20  ;;  %v1627_v32 = vpop.f32.mrb[82].mxu0  ;;  %v1783_v38 = vmax.f32 %v1625_v30, 0.0 }
 0x378   :  { %v1629_v33 = vpop.f32.mrb[83].mxu0  ;;  %v1784_v41 = vmax.f32 %v1627_v32, 0.0 }
 0x379   :  { %3053 = vmatprep.mubr.bf16.mxu1 %v9748_v31  ;;  %v1785_v48 = vmax.f32 %v1629_v33, 0.0 }
 0x37a   :  { %3054 = vmatmul.mubr.bf16.gmra.mrb[36].mxu1 %v9746_v29 }
 0x37d   :  { %v1633_v34 = vpop.f32.mrb[84].mxu0 }
 0x37e   :  { %v1786_v36 = vmax.f32 %v1633_v34, 0.0  ;;  %v1635_v37 = vpop.f32.mrb[85].mxu0 }
 0x37f   :  { %v1787_v39 = vmax.f32 %v1635_v37, 0.0  ;;  %v1637_v40 = vpop.f32.mrb[86].mxu0 }
 0x380   :  { %v1894_v42 = vadd.f32 %v1786_v36, %v1782_v35  ;;  %v1788_v43 = vmax.f32 %v1637_v40, 0.0  ;;  %v1639_v46 = vpop.f32.mrb[87].mxu0 }
 0x381   :  { %v1895_v45 = vadd.f32 %v1787_v39, %v1783_v38  ;;  %v1789_v50 = vmax.f32 %v1639_v46, 0.0 }
 0x382   :  { %v1896_v52 = vadd.f32 %v1788_v43, %v1784_v41  ;;  %v1898_v54 = vmul.f32 0.5, %v1894_v42 }
 0x383   :  { %v1897_v53 = vadd.f32 %v1789_v50, %v1785_v48  ;;  %v1899_v62 = vmul.f32 0.5, %v1895_v45 }
 0x384   :  { %v1900_v59 = vmul.f32 0.5, %v1896_v52 }
 0x385   :  { %v1901_v63 = vmul.f32 0.5, %v1897_v53  ;;  %v1643_v0 = vpop.f32.mrb[88].mxu0  ;;  %v8553_v53 = vld [vmem:[%s11260_s2 + $0x300] ss:$12 sps:$4 sm:$0xff]  }
 0x386   :  { %v9752_v1 = vpack.c.bf16 %v1900_v59, %v1898_v54  ;;  %v1645_v2 = vpop.f32.mrb[89].mxu0  ;;  %v1790_v7 = vmax.f32 %v1643_v0, 0.0  ;;  %v8558_v0 = vld [vmem:[%s11260_s2 + $0x31c] ss:$12 sps:$4 sm:$0xff]  }
 0x387   :  { %v9754_v3 = vpack.c.bf16 %v1901_v63, %v1899_v62  ;;  %v1647_v4 = vpop.f32.mrb[90].mxu0  ;;  %v1791_v10 = vmax.f32 %v1645_v2, 0.0 }
 0x388   :  { %v1649_v5 = vpop.f32.mrb[91].mxu0  ;;  %v1792_v14 = vmax.f32 %v1647_v4, 0.0 }
 0x389   :  { %3063 = vmatprep.mubr.bf16.mxu1 %v9754_v3  ;;  %v1793_v19 = vmax.f32 %v1649_v5, 0.0 }
 0x38a   :  { %3064 = vmatmul.mubr.bf16.gmra.mrb[40].mxu1 %v9752_v1 }
 0x38d   :  { %v1653_v6 = vpop.f32.mrb[92].mxu0 }
 0x38e   :  { %v1794_v8 = vmax.f32 %v1653_v6, 0.0  ;;  %v1655_v9 = vpop.f32.mrb[93].mxu0 }
 0x38f   :  { %v1795_v11 = vmax.f32 %v1655_v9, 0.0  ;;  %v1657_v12 = vpop.f32.mrb[94].mxu0 }
 0x390   :  { %v1902_v16 = vadd.f32 %v1794_v8, %v1790_v7  ;;  %v1796_v17 = vmax.f32 %v1657_v12, 0.0  ;;  %v1659_v18 = vpop.f32.mrb[95].mxu0  ;;  %v8556_v8 = vld [vmem:[%s11260_s2 + $0x318] ss:$12 sps:$4 sm:$0xff]  }
 0x391   :  { %v1903_v20 = vadd.f32 %v1795_v11, %v1791_v10  ;;  %v1797_v24 = vmax.f32 %v1659_v18, 0.0  ;;  %v8561_v11 = vld [vmem:[%s11260_s2 + $0x334] ss:$12 sps:$4 sm:$0xff]  }
 0x392   :  { %v1904_v28 = vadd.f32 %v1796_v17, %v1792_v14  ;;  %v1906_v32 = vmul.f32 0.5, %v1902_v16 }
 0x393   :  { %v1905_v30 = vadd.f32 %v1797_v24, %v1793_v19  ;;  %v1907_v34 = vmul.f32 0.5, %v1903_v20  ;;  %v8559_v24 = vld [vmem:[%s11260_s2 + $0x330] ss:$12 sps:$4 sm:$0xff]  }
 0x394   :  { %v1908_v33 = vmul.f32 0.5, %v1904_v28 }
 0x395   :  { %v1909_v35 = vmul.f32 0.5, %v1905_v30  ;;  %v1663_v36 = vpop.f32.mrb[96].mxu0  ;;  %v8564_v30 = vld [vmem:[%s11260_s2 + $0x34c] ss:$12 sps:$4 sm:$0xff]  }
 0x396   :  { %v9758_v37 = vpack.c.bf16 %v1908_v33, %v1906_v32  ;;  %v1665_v38 = vpop.f32.mrb[97].mxu0  ;;  %v1798_v43 = vmax.f32 %v1663_v36, 0.0  ;;  %v8562_v32 = vld [vmem:[%s11260_s2 + $0x348] ss:$12 sps:$4 sm:$0xff]   ;;  %v8567_v33 = vld [vmem:[%s11260_s2 + $0x364] ss:$12 sps:$4 sm:$0xff]  }
 0x397   :  { %v9760_v39 = vpack.c.bf16 %v1909_v35, %v1907_v34  ;;  %v1667_v40 = vpop.f32.mrb[98].mxu0  ;;  %v1799_v45 = vmax.f32 %v1665_v38, 0.0 }
 0x398   :  { %v1669_v41 = vpop.f32.mrb[99].mxu0  ;;  %v1800_v54 = vmax.f32 %v1667_v40, 0.0 }
 0x399   :  { %3073 = vmatprep.mubr.bf16.mxu1 %v9760_v39  ;;  %v1801_v2 = vmax.f32 %v1669_v41, 0.0 }
 0x39a   :  { %3074 = vmatmul.mubr.bf16.gmra.mrb[44].mxu1 %v9758_v37 }
 0x39b   :  { %3116 = vmatprep.mubr.bf16.mxu1 %v9628_v15 }
 0x39d   :  { %v1673_v42 = vpop.f32.mrb[100].mxu0 }
 0x39e   :  { %v1802_v46 = vmax.f32 %v1673_v42, 0.0  ;;  %v1675_v48 = vpop.f32.mrb[101].mxu0 }
 0x39f   :  { %v1803_v50 = vmax.f32 %v1675_v48, 0.0  ;;  %v1677_v52 = vpop.f32.mrb[102].mxu0 }
 0x3a0   :  { %v1910_v59 = vadd.f32 %v1802_v46, %v1798_v43  ;;  %v1804_v62 = vmax.f32 %v1677_v52, 0.0  ;;  %v1679_v63 = vpop.f32.mrb[103].mxu0  ;;  %v8565_v43 = vld [vmem:[%s11260_s2 + $0x360] ss:$12 sps:$4 sm:$0xff]   ;;  %v8570_v52 = vld [vmem:[%s11260_s2 + $0x37c] ss:$12 sps:$4 sm:$0xff]  }
 0x3a1   :  { %v1911_v4 = vadd.f32 %v1803_v50, %v1799_v45  ;;  %v1805_v5 = vmax.f32 %v1679_v63, 0.0 }
 0x3a2   :  { %v1912_v6 = vadd.f32 %v1804_v62, %v1800_v54  ;;  %3117 = vmatmul.mubr.bf16.vlgmr.msra.gmra.mrb[0].mxu1 %v9626_v13  ;;  %v1914_v9 = vmul.f32 0.5, %v1910_v59 }
 0x3a3   :  { %v1913_v7 = vadd.f32 %v1805_v5, %v1801_v2  ;;  %3126 = vmatprep.mubr.bf16.mxu1 %v9658_v51  ;;  %3238 = vmatpush1.bf16.msra.mxu1 %v8553_v53  ;;  %v1915_v12 = vmul.f32 0.5, %v1911_v4  ;;  %v8573_v5 = vld [vmem:[%s11260_s2 + $0x394] ss:$12 sps:$4 sm:$0xff]  }
 0x3a4   :  { %v1916_v10 = vmul.f32 0.5, %v1912_v6  ;;  %3239 = vmatprep.subr.bf16.mxu1 %v8558_v0  ;;  %v8568_v0 = vld [vmem:[%s11260_s2 + $0x378] ss:$12 sps:$4 sm:$0xff]  }
 0x3a5   :  { %v1917_v14 = vmul.f32 0.5, %v1913_v7  ;;  %v1683_v16 = vpop.f32.mrb[104].mxu0 }
 0x3a6   :  { %v9779_v17 = vpack.c.bf16 %v1916_v10, %v1914_v9  ;;  %v1685_v18 = vpop.f32.mrb[105].mxu0  ;;  %v1806_v35 = vmax.f32 %v1683_v16, 0.0  ;;  %v8571_v9 = vld [vmem:[%s11260_s2 + $0x390] ss:$12 sps:$4 sm:$0xff]   ;;  %v8577_v16 = vld [vmem:[%s11260_s2 + $0x3c0] ss:$12 sps:$4 sm:$0xff]  }
 0x3a7   :  { %v9781_v19 = vpack.c.bf16 %v1917_v14, %v1915_v12  ;;  %v1687_v20 = vpop.f32.mrb[106].mxu0  ;;  %3240 = vmatpush1.bf16.msra.mxu1 %v8556_v8  ;;  %v1807_v40 = vmax.f32 %v1685_v18, 0.0  ;;  %v8574_v12 = vld [vmem:[%s11260_s2 + $0x3a8] ss:$12 sps:$4 sm:$0xff]   ;;  %v8579_v14 = vld [vmem:[%s11260_s2 + $0x3c4] ss:$12 sps:$4 sm:$0xff]  }
 0x3a8   :  { %v1689_v28 = vpop.f32.mrb[107].mxu0  ;;  %3241 = vmatprep.subr.bf16.mxu1 %v8561_v11  ;;  %v1808_v46 = vmax.f32 %v1687_v20, 0.0  ;;  %v8576_v11 = vld [vmem:[%s11260_s2 + $0x3ac] ss:$12 sps:$4 sm:$0xff]   ;;  %v8582_v18 = vld [vmem:[%s11260_s2 + $0x3dc] ss:$12 sps:$4 sm:$0xff]  }
 0x3a9   :  { %v1809_v53 = vmax.f32 %v1689_v28, 0.0  ;;  %v8580_v20 = vld [vmem:[%s11260_s2 + $0x3d8] ss:$12 sps:$4 sm:$0xff]   ;;  %v8583_v28 = vld [vmem:[%s11260_s2 + $0x3f0] ss:$12 sps:$4 sm:$0xff]  }
 0x3aa   :  { %3127 = vmatmul.mubr.bf16.gmra.mrb[4].mxu1 %v9656_v49 }
 0x3ab   :  { %3136 = vmatprep.mubr.bf16.mxu1 %v9688_v23  ;;  %3242 = vmatpush1.bf16.msra.mxu1 %v8559_v24  ;;  %v8585_v24 = vld [vmem:[%s11260_s2 + $0x3f4] ss:$12 sps:$4 sm:$0xff]  }
 0x3ac   :  { %3243 = vmatprep.subr.bf16.mxu1 %v8564_v30  ;;  %v8588_v30 = vld [vmem:[%s11260_s2 + $0x40c] ss:$12 sps:$4 sm:$0xff]  }
 0x3ad   :  { %v1693_v34 = vpop.f32.mrb[108].mxu0 }
 0x3ae   :  { %v1810_v36 = vmax.f32 %v1693_v34, 0.0  ;;  %v1695_v38 = vpop.f32.mrb[109].mxu0  ;;  %v8589_v34 = vld [vmem:[%s11260_s2 + $0x420] ss:$12 sps:$4 sm:$0xff]  }
 0x3af   :  { %v1811_v41 = vmax.f32 %v1695_v38, 0.0  ;;  %v1697_v42 = vpop.f32.mrb[110].mxu0  ;;  %3244 = vmatpush1.bf16.msra.mxu1 %v8562_v32  ;;  %v8586_v32 = vld [vmem:[%s11260_s2 + $0x408] ss:$12 sps:$4 sm:$0xff]  }
 0x3b0   :  { %v1918_v48 = vadd.f32 %v1810_v36, %v1806_v35  ;;  %v1812_v45 = vmax.f32 %v1697_v42, 0.0  ;;  %v1699_v50 = vpop.f32.mrb[111].mxu0  ;;  %3245 = vmatprep.subr.bf16.mxu1 %v8567_v33  ;;  %v8591_v33 = vld [vmem:[%s11260_s2 + $0x424] ss:$12 sps:$4 sm:$0xff]   ;;  %v8594_v35 = vld [vmem:[%s11260_s2 + $0x43c] ss:$12 sps:$4 sm:$0xff]  }
 0x3b1   :  { %v1919_v54 = vadd.f32 %v1811_v41, %v1807_v40  ;;  %v1813_v59 = vmax.f32 %v1699_v50, 0.0  ;;  %v8592_v36 = vld [vmem:[%s11260_s2 + $0x438] ss:$12 sps:$4 sm:$0xff]   ;;  %v8597_v38 = vld [vmem:[%s11260_s2 + $0x454] ss:$12 sps:$4 sm:$0xff]  }
 0x3b2   :  { %v1920_v62 = vadd.f32 %v1812_v45, %v1808_v46  ;;  %3137 = vmatmul.mubr.bf16.gmra.mrb[8].mxu1 %v9686_v21  ;;  %v1922_v2 = vmul.f32 0.5, %v1918_v48  ;;  %v8595_v40 = vld [vmem:[%s11260_s2 + $0x450] ss:$12 sps:$4 sm:$0xff]   ;;  %v8600_v41 = vld [vmem:[%s11260_s2 + $0x46c] ss:$12 sps:$4 sm:$0xff]  }
 0x3b3   :  { %v1921_v63 = vadd.f32 %v1813_v59, %v1809_v53  ;;  %3146 = vmatprep.mubr.bf16.mxu1 %v9715_v60  ;;  %3246 = vmatpush1.bf16.msra.mxu1 %v8565_v43  ;;  %v1923_v6 = vmul.f32 0.5, %v1919_v54  ;;  %v8598_v42 = vld [vmem:[%s11260_s2 + $0x468] ss:$12 sps:$4 sm:$0xff]   ;;  %v8603_v48 = vld [vmem:[%s11260_s2 + $0xe0] ss:$12 sps:$4 sm:$0xff]  }
 0x3b4   :  { %v1924_v4 = vmul.f32 0.5, %v1920_v62  ;;  %3247 = vmatprep.subr.bf16.mxu1 %v8570_v52  ;;  %v8601_v43 = vld [vmem:[%s11260_s2 + $0xc8] ss:$12 sps:$4 sm:$0xff]   ;;  %v8604_v45 = vld [vmem:[%s11260_s2 + $0x20] ss:$12 sps:$4 sm:$0xff]  }
 0x3b5   :  { %v1925_v7 = vmul.f32 0.5, %v1921_v63  ;;  %v8602_v46 = vld [vmem:[%s11260_s2 + $0x8] ss:$12 sps:$4 sm:$0xff]   ;;  %v8605_v50 = vld [vmem:[%s11260_s2 + $0xf8] ss:$12 sps:$4 sm:$0xff]  }
 0x3b6   :  { %v9811_v8 = vpack.c.bf16 %v1924_v4, %v1922_v2  ;;  %v8606_v52 = vld [vmem:[%s11260_s2 + $0x38] ss:$12 sps:$4 sm:$0xff]   ;;  %v8607_v53 = vld [vmem:[%s11260_s2 + $0x110] ss:$12 sps:$4 sm:$0xff]   ;;  %v8609_v59 = vld [vmem:[%s11260_s2 + $0x128] ss:$12 sps:$4 sm:$0xff]  }
 0x3b7   :  { %3248 = vmatpush1.bf16.msra.mxu1 %v8568_v0  ;;  %v9816_v10 = vpack.c.bf16 %v1925_v7, %v1923_v6  ;;  %v8608_v54 = vld [vmem:[%s11260_s2 + $0x50] ss:$12 sps:$4 sm:$0xff]   ;;  %v8610_v62 = vld [vmem:[%s11260_s2 + $0x68] ss:$12 sps:$4 sm:$0xff]   ;;  %v8611_v63 = vld [vmem:[%s11260_s2 + $0x140] ss:$12 sps:$4 sm:$0xff]  }
 0x3b8   :  { %3249 = vmatprep.subr.bf16.mxu1 %v8573_v5  ;;  %v8612_v0 = vld [vmem:[%s11260_s2 + $0x80] ss:$12 sps:$4 sm:$0xff]   ;;  %v8613_v2 = vld [vmem:[%s11260_s2 + $0x158] ss:$12 sps:$4 sm:$0xff]   ;;  %v8615_v5 = vld [vmem:[%s11260_s2 + $0x170] ss:$12 sps:$4 sm:$0xff]  }
 0x3b9   :  { %v8614_v4 = vld [vmem:[%s11260_s2 + $0x98] ss:$12 sps:$4 sm:$0xff]   ;;  %v8616_v6 = vld [vmem:[%s11260_s2 + $0xb0] ss:$12 sps:$4 sm:$0xff]   ;;  %v8617_v7 = vld [vmem:[%s11260_s2 + $0x248] ss:$12 sps:$4 sm:$0xff]  }
 0x3ba   :  { %3147 = vmatmul.mubr.bf16.gmra.mrb[12].mxu1 %v9713_v58 }
 0x3bb   :  { %3156 = vmatprep.mubr.bf16.mxu1 %v9724_v27  ;;  %3250 = vmatpush1.bf16.msra.mxu1 %v8571_v9  ;;  %v8618_v9 = vld [vmem:[%s11260_s2 + $0x188] ss:$12 sps:$4 sm:$0xff]  }
 0x3bc   :  { %3251 = vmatprep.subr.bf16.mxu1 %v8576_v11  ;;  %v8619_v11 = vld [vmem:[%s11260_s2 + $0x260] ss:$12 sps:$4 sm:$0xff]  }
 0x3bf   :  { %3252 = vmatpush1.bf16.msra.mxu1 %v8574_v12  ;;  %v8620_v12 = vld [vmem:[%s11260_s2 + $0x1a0] ss:$12 sps:$4 sm:$0xff]  }
 0x3c0   :  { %3253 = vmatprep.subr.bf16.mxu1 %v8579_v14  ;;  %v8622_v14 = vld [vmem:[%s11260_s2 + $0x1b8] ss:$12 sps:$4 sm:$0xff]  }
 0x3c2   :  { %3157 = vmatmul.mubr.bf16.gmra.mrb[16].mxu1 %v9722_v25 }
 0x3c3   :  { %3166 = vmatprep.mubr.bf16.mxu1 %v9730_v57  ;;  %3254 = vmatpush1.bf16.msra.mxu1 %v8577_v16  ;;  %v8624_v16 = vld [vmem:[%s11260_s2 + $0x1d0] ss:$12 sps:$4 sm:$0xff]  }
 0x3c4   :  { %3255 = vmatprep.subr.bf16.mxu1 %v8582_v18  ;;  %v8625_v18 = vld [vmem:[%s11260_s2 + $0x2a8] ss:$12 sps:$4 sm:$0xff]  }
 0x3c7   :  { %3256 = vmatpush1.bf16.msra.mxu1 %v8580_v20  ;;  %v8641_v20 = vld [vmem:[%s11261_s4 + $0x1c0] sm:$0xff]  }
 0x3c8   :  { %3257 = vmatprep.subr.bf16.mxu1 %v8585_v24  ;;  %v8642_v24 = vld [vmem:[%s11261_s4 + $0x180] sm:$0xff]   ;;  %7617 = vmatprep.subr.bf16.mxu0 %v8641_v20 }
 0x3c9   :  { %7618 = vmatpush3.bf16.msra.mxu0 %v8642_v24 }
 0x3ca   :  { %3167 = vmatmul.mubr.bf16.gmra.mrb[20].mxu1 %v9728_v55 }
 0x3cb   :  { %3176 = vmatprep.mubr.bf16.mxu1 %v9736_v26  ;;  %3258 = vmatpush1.bf16.msra.mxu1 %v8583_v28  ;;  %v8626_v28 = vld [vmem:[%s11260_s2 + $0x1e8] ss:$12 sps:$4 sm:$0xff]  }
 0x3cc   :  { %3259 = vmatprep.subr.bf16.mxu1 %v8588_v30  ;;  %v8627_v30 = vld [vmem:[%s11260_s2 + $0x2c0] ss:$12 sps:$4 sm:$0xff]  }
 0x3cf   :  { %3260 = vmatpush1.bf16.msra.mxu1 %v8586_v32  ;;  %v8643_v32 = vld [vmem:[%s11261_s4 + $0x1c8] sm:$0xff]  }
 0x3d0   :  { %3261 = vmatprep.subr.bf16.mxu1 %v8591_v33  ;;  %v8644_v33 = vld [vmem:[%s11261_s4 + $0x188] sm:$0xff]   ;;  %7619 = vmatprep.subr.bf16.mxu0 %v8643_v32  ;;  %v8662_v32 = vld [vmem:[%s11260_s2 + $0x398] ss:$12 sps:$4 sm:$0xff]  }
 0x3d1   :  { %7620 = vmatpush3.bf16.msra.mxu0 %v8644_v33 }
 0x3d2   :  { %3177 = vmatmul.mubr.bf16.gmra.mrb[24].mxu1 %v9734_v22 }
 0x3d3   :  { %3186 = vmatprep.mubr.bf16.mxu1 %v9742_v61  ;;  %3262 = vmatpush1.bf16.msra.mxu1 %v8589_v34  ;;  %v8628_v34 = vld [vmem:[%s11260_s2 + $0x200] ss:$12 sps:$4 sm:$0xff]  }
 0x3d4   :  { %3263 = vmatprep.subr.bf16.mxu1 %v8594_v35  ;;  %v8629_v35 = vld [vmem:[%s11260_s2 + $0x2d8] ss:$12 sps:$4 sm:$0xff]  }
 0x3d7   :  { %3264 = vmatpush1.bf16.msra.mxu1 %v8592_v36  ;;  %v8647_v36 = vld [vmem:[%s11261_s4 + $0x1d0] sm:$0xff]  }
 0x3d8   :  { %3265 = vmatprep.subr.bf16.mxu1 %v8597_v38  ;;  %v8648_v38 = vld [vmem:[%s11261_s4 + $0x190] sm:$0xff]   ;;  %7621 = vmatprep.subr.bf16.mxu0 %v8647_v36 }
 0x3d9   :  { %7622 = vmatpush3.bf16.msra.mxu0 %v8648_v38  ;;  %v8664_v38 = vld [vmem:[%s11260_s2 + $0x3b0] ss:$12 sps:$4 sm:$0xff]  }
 0x3da   :  { %3187 = vmatmul.mubr.bf16.gmra.mrb[28].mxu1 %v9740_v56 }
 0x3db   :  { %3196 = vmatprep.mubr.bf16.mxu1 %v9748_v31  ;;  %3266 = vmatpush1.bf16.msra.mxu1 %v8595_v40  ;;  %v8649_v40 = vld [vmem:[%s11261_s4 + $0x1d8] sm:$0xff]  }
 0x3dc   :  { %3267 = vmatprep.subr.bf16.mxu1 %v8600_v41  ;;  %v8630_v41 = vld [vmem:[%s11260_s2 + $0x218] ss:$12 sps:$4 sm:$0xff]   ;;  %7623 = vmatprep.subr.bf16.mxu0 %v8649_v40 }
 0x3df   :  { %3268 = vmatpush1.bf16.msra.mxu1 %v8598_v42  ;;  %v8631_v42 = vld [vmem:[%s11260_s2 + $0x2f0] ss:$12 sps:$4 sm:$0xff]  }
 0x3e0   :  { %7233 = vmatprep.subr.bf16.mxu1 %v8601_v43  ;;  %v8650_v43 = vld [vmem:[%s11261_s4 + $0x198] sm:$0xff]  }
 0x3e1   :  { %7624 = vmatpush3.bf16.msra.mxu0 %v8650_v43 }
 0x3e2   :  { %3197 = vmatmul.mubr.bf16.gmra.mrb[32].mxu1 %v9746_v29 }
 0x3e3   :  { %3206 = vmatprep.mubr.bf16.mxu1 %v9754_v3 }
 0x3ea   :  { %3207 = vmatmul.mubr.bf16.gmra.mrb[36].mxu1 %v9752_v1 }
 0x3eb   :  { %3216 = vmatprep.mubr.bf16.mxu1 %v9760_v39 }
 0x3f2   :  { %3217 = vmatmul.mubr.bf16.gmra.mrb[40].mxu1 %v9758_v37 }
 0x3f3   :  { %3226 = vmatprep.mubr.bf16.mxu1 %v9781_v19 }
 0x3fa   :  { %3227 = vmatmul.mubr.bf16.gmra.mrb[44].mxu1 %v9779_v17 }
 0x3fb   :  { %3269 = vmatprep.mubr.bf16.mxu1 %v9658_v51 }
 0x402   :  { %3270 = vmatmul.mubr.bf16.vlgmr.msra.gmra.mrb[0].mxu1 %v9656_v49 }
 0x403   :  { %3279 = vmatprep.mubr.bf16.mxu1 %v9688_v23  ;;  %7234 = vmatpush3.bf16.msra.mxu1 %v8602_v46  ;;  %v8632_v46 = vld [vmem:[%s11260_s2 + $0x230] ss:$12 sps:$4 sm:$0xff]  }
 0x404   :  { %7235 = vmatprep.subr.bf16.mxu1 %v8603_v48  ;;  %v8633_v48 = vld [vmem:[%s11260_s2 + $0x3c8] ss:$12 sps:$4 sm:$0xff]  }
 0x407   :  { %7236 = vmatpush3.bf16.msra.mxu1 %v8604_v45  ;;  %v8651_v45 = vld [vmem:[%s11261_s4 + $0x1e0] sm:$0xff]  }
 0x408   :  { %7237 = vmatprep.subr.bf16.mxu1 %v8605_v50  ;;  %v8652_v50 = vld [vmem:[%s11261_s4 + $0x1a0] sm:$0xff]   ;;  %7625 = vmatprep.subr.bf16.mxu0 %v8651_v45 }
 0x409   :  { %7626 = vmatpush3.bf16.msra.mxu0 %v8652_v50 }
 0x40a   :  { %3280 = vmatmul.mubr.bf16.gmra.mrb[4].mxu1 %v9686_v21 }
 0x40b   :  { %3289 = vmatprep.mubr.bf16.mxu1 %v9715_v60  ;;  %7238 = vmatpush3.bf16.msra.mxu1 %v8606_v52  ;;  %v8655_v52 = vld [vmem:[%s11261_s4 + $0x1e8] sm:$0xff]  }
 0x40c   :  { %7239 = vmatprep.subr.bf16.mxu1 %v8607_v53  ;;  %v8656_v53 = vld [vmem:[%s11261_s4 + $0x1a8] sm:$0xff]   ;;  %7627 = vmatprep.subr.bf16.mxu0 %v8655_v52 }
 0x40d   :  { %7628 = vmatpush3.bf16.msra.mxu0 %v8656_v53 }
 0x40f   :  { %7240 = vmatpush3.bf16.msra.mxu1 %v8608_v54  ;;  %v8657_v54 = vld [vmem:[%s11261_s4 + $0x1f0] sm:$0xff]  }
 0x410   :  { %7241 = vmatprep.subr.bf16.mxu1 %v8609_v59  ;;  %v8658_v59 = vld [vmem:[%s11261_s4 + $0x1b0] sm:$0xff]   ;;  %7629 = vmatprep.subr.bf16.mxu0 %v8657_v54 }
 0x411   :  { %7630 = vmatpush3.bf16.msra.mxu0 %v8658_v59 }
 0x412   :  { %3290 = vmatmul.mubr.bf16.gmra.mrb[8].mxu1 %v9713_v58 }
 0x413   :  { %3299 = vmatprep.mubr.bf16.mxu1 %v9724_v27  ;;  %7242 = vmatpush3.bf16.msra.mxu1 %v8610_v62  ;;  %v8659_v62 = vld [vmem:[%s11261_s4 + $0x1f8] sm:$0xff]  }
 0x414   :  { %7243 = vmatprep.subr.bf16.mxu1 %v8611_v63  ;;  %v8660_v63 = vld [vmem:[%s11261_s4 + $0x1b8] sm:$0xff]   ;;  %7631 = vmatprep.subr.bf16.mxu0 %v8659_v62 }
 0x415   :  { %7632 = vmatpush3.bf16.msra.mxu0 %v8660_v63  ;;  %v8665_v63 = vld [vmem:[%s11261_s4 + $0x40] sm:$0xff]  }
 0x417   :  { %7244 = vmatpush3.bf16.msra.mxu1 %v8612_v0  ;;  %v8634_v0 = vld [vmem:[%s11260_s2 + $0x308] ss:$12 sps:$4 sm:$0xff]  }
 0x418   :  { %7245 = vmatprep.subr.bf16.mxu1 %v8613_v2  ;;  %v8635_v2 = vld [vmem:[%s11260_s2 + $0x3e0] ss:$12 sps:$4 sm:$0xff]  }
 0x41a   :  { %3300 = vmatmul.mubr.bf16.gmra.mrb[12].mxu1 %v9722_v25 }
 0x41b   :  { %3309 = vmatprep.mubr.bf16.mxu1 %v9730_v57  ;;  %7246 = vmatpush3.bf16.msra.mxu1 %v8614_v4  ;;  %v8636_v4 = vld [vmem:[%s11260_s2 + $0x320] ss:$12 sps:$4 sm:$0xff]  }
 0x41c   :  { %7247 = vmatprep.subr.bf16.mxu1 %v8615_v5  ;;  %v8638_v5 = vld [vmem:[%s11260_s2 + $0x338] ss:$12 sps:$4 sm:$0xff]  }
 0x41f   :  { %7248 = vmatpush3.bf16.msra.mxu1 %v8616_v6  ;;  %v8640_v6 = vld [vmem:[%s11260_s2 + $0x350] ss:$12 sps:$4 sm:$0xff]  }
 0x420   :  { %7321 = vmatprep.subr.bf16.mxu1 %v8617_v7  ;;  %v2148_v7 = vlaneseq }
 0x422   :  { %3310 = vmatmul.mubr.bf16.gmra.mrb[16].mxu1 %v9728_v55 }
 0x423   :  { %3319 = vmatprep.mubr.bf16.mxu1 %v9736_v26 }
 0x42a   :  { %3320 = vmatmul.mubr.bf16.gmra.mrb[20].mxu1 %v9734_v22 }
 0x42b   :  { %3329 = vmatprep.mubr.bf16.mxu1 %v9742_v61 }
 0x432   :  { %3330 = vmatmul.mubr.bf16.gmra.mrb[24].mxu1 %v9740_v56 }
 0x433   :  { %3339 = vmatprep.mubr.bf16.mxu1 %v9748_v31 }
 0x43a   :  { %3340 = vmatmul.mubr.bf16.gmra.mrb[28].mxu1 %v9746_v29 }
 0x43b   :  { %3349 = vmatprep.mubr.bf16.mxu1 %v9754_v3 }
 0x442   :  { %3350 = vmatmul.mubr.bf16.gmra.mrb[32].mxu1 %v9752_v1 }
 0x443   :  { %3359 = vmatprep.mubr.bf16.mxu1 %v9760_v39 }
 0x44a   :  { %3360 = vmatmul.mubr.bf16.gmra.mrb[36].mxu1 %v9758_v37 }
 0x44b   :  { %3369 = vmatprep.mubr.bf16.mxu1 %v9781_v19 }
 0x452   :  { %3370 = vmatmul.mubr.bf16.gmra.mrb[40].mxu1 %v9779_v17 }
 0x453   :  { %3379 = vmatprep.mubr.bf16.mxu1 %v9816_v10 }
 0x45a   :  { %3380 = vmatmul.mubr.bf16.gmra.mrb[44].mxu1 %v9811_v8 }
 0x45b   :  { %3422 = vmatprep.mubr.bf16.mxu1 %v9598_v47  ;;  %v8621_v47 = vld [vmem:[%s11260_s2 + $0x278] ss:$12 sps:$4 sm:$0xff]  }
 0x462   :  { %3423 = vmatmul.mubr.bf16.vlgmr.msra.gmra.mrb[48].mxu1 %v9596_v44  ;;  %v8623_v44 = vld [vmem:[%s11260_s2 + $0x290] ss:$12 sps:$4 sm:$0xff]  }
 0x463   :  { %3430 = vmatprep.mubr.bf16.mxu1 %v9628_v15  ;;  %7322 = vmatpush3.bf16.msra.mxu1 %v8618_v9  ;;  %v8645_v9 = vld [vmem:[%s11260_s2 + $0x428] ss:$12 sps:$4 sm:$0xff]  }
 0x464   :  { %7323 = vmatprep.subr.bf16.mxu1 %v8619_v11  ;;  %v8646_v11 = vld [vmem:[%s11260_s2 + $0x368] ss:$12 sps:$4 sm:$0xff]  }
 0x467   :  { %7324 = vmatpush3.bf16.msra.mxu1 %v8620_v12  ;;  %v10116_v12 = vshrl.u32 %v2148_v7, 7 }
 0x468   :  { %7325 = vmatprep.subr.bf16.mxu1 %v8621_v47  ;;  %v8653_v47 = vld [vmem:[%s11260_s2 + $0x440] ss:$12 sps:$4 sm:$0xff]  }
 0x469   :  { %v2154_v24 = vsub.s32 1, %v10116_v12 }
 0x46a   :  { %3431 = vmatmul.mubr.bf16.gmra.mrb[52].mxu1 %v9626_v13 }
 0x46b   :  { %3438 = vmatprep.mubr.bf16.mxu1 %v9658_v51  ;;  %7326 = vmatpush3.bf16.msra.mxu1 %v8622_v14  ;;  %v8654_v14 = vld [vmem:[%s11260_s2 + $0x380] ss:$12 sps:$4 sm:$0xff]  }
 0x46c   :  { %7327 = vmatprep.subr.bf16.mxu1 %v8623_v44  ;;  %v2150_v44 = vsub.s32 0, %v10116_v12 }
 0x46f   :  { %7328 = vmatpush3.bf16.msra.mxu1 %v8624_v16  ;;  %v8661_v16 = vld [vmem:[%s11260_s2 + $0x458] ss:$12 sps:$4 sm:$0xff]  }
 0x470   :  { %7329 = vmatprep.subr.bf16.mxu1 %v8625_v18  ;;  %v10133_v18 = vld [vmem:[%s11262_s3] sm:$0x7] }
 0x471   :  { %v10140_v33 = vrot.slane %v10133_v18, %v2150_v44  ;;  %v10146_v36 = vrot.slane %v10133_v18, %v2154_v24 }
 0x472   :  { %3439 = vmatmul.mubr.bf16.gmra.mrb[56].mxu1 %v9656_v49 }
 0x473   :  { %3446 = vmatprep.mubr.bf16.mxu1 %v9688_v23  ;;  %7330 = vmatpush3.bf16.msra.mxu1 %v8626_v28 }
 0x474   :  { %7331 = vmatprep.subr.bf16.mxu1 %v8627_v30 }
 0x477   :  { %7332 = vmatpush3.bf16.msra.mxu1 %v8628_v34 }
 0x478   :  { %7333 = vmatprep.subr.bf16.mxu1 %v8629_v35  ;;  %v8663_v35 = vld [vmem:[%s11260_s2 + $0x470] ss:$12 sps:$4 sm:$0xff]  }
 0x47a   :  { %3447 = vmatmul.mubr.bf16.gmra.mrb[60].mxu1 %v9686_v21 }
 0x47b   :  { %3454 = vmatprep.mubr.bf16.mxu1 %v9715_v60  ;;  %7334 = vmatpush3.bf16.msra.mxu1 %v8630_v41 }
 0x47c   :  { %7335 = vmatprep.subr.bf16.mxu1 %v8631_v42 }
 0x47f   :  { %7336 = vmatpush3.bf16.msra.mxu1 %v8632_v46 }
 0x480   :  { %7409 = vmatprep.subr.bf16.mxu1 %v8633_v48 }
 0x482   :  { %3455 = vmatmul.mubr.bf16.gmra.mrb[64].mxu1 %v9713_v58 }
 0x483   :  { %3462 = vmatprep.mubr.bf16.mxu1 %v9724_v27 }
 0x48a   :  { %3463 = vmatmul.mubr.bf16.gmra.mrb[68].mxu1 %v9722_v25 }
 0x48b   :  { %3470 = vmatprep.mubr.bf16.mxu1 %v9730_v57 }
 0x492   :  { %3471 = vmatmul.mubr.bf16.gmra.mrb[72].mxu1 %v9728_v55 }
 0x493   :  { %3478 = vmatprep.mubr.bf16.mxu1 %v9736_v26 }
 0x49a   :  { %3479 = vmatmul.mubr.bf16.gmra.mrb[76].mxu1 %v9734_v22 }
 0x49b   :  { %3486 = vmatprep.mubr.bf16.mxu1 %v9742_v61 }
 0x4a2   :  { %3487 = vmatmul.mubr.bf16.gmra.mrb[80].mxu1 %v9740_v56 }
 0x4a3   :  { %3494 = vmatprep.mubr.bf16.mxu1 %v9748_v31 }
 0x4aa   :  { %3495 = vmatmul.mubr.bf16.gmra.mrb[84].mxu1 %v9746_v29 }
 0x4ab   :  { %3502 = vmatprep.mubr.bf16.mxu1 %v9754_v3 }
 0x4b2   :  { %3503 = vmatmul.mubr.bf16.gmra.mrb[88].mxu1 %v9752_v1 }
 0x4b3   :  { %3510 = vmatprep.mubr.bf16.mxu1 %v9760_v39 }
 0x4ba   :  { %3511 = vmatmul.mubr.bf16.gmra.mrb[92].mxu1 %v9758_v37 }
 0x4bb   :  { %3551 = vmatprep.mubr.bf16.mxu1 %v9628_v15  ;;  %v8637_v15 = vld [vmem:[%s11260_s2 + $0x3f8] ss:$12 sps:$4 sm:$0xff]  }
 0x4c2   :  { %3552 = vmatmul.mubr.bf16.vlgmr.msra.gmra.mrb[96].mxu1 %v9626_v13  ;;  %v8639_v13 = vld [vmem:[%s11260_s2 + $0x410] ss:$12 sps:$4 sm:$0xff]  }
 0x4c3   :  { %3559 = vmatprep.mubr.bf16.mxu1 %v9658_v51  ;;  %7410 = vmatpush3.bf16.msra.mxu1 %v8634_v0 }
 0x4c4   :  { %7411 = vmatprep.subr.bf16.mxu1 %v8635_v2 }
 0x4c7   :  { %7412 = vmatpush3.bf16.msra.mxu1 %v8636_v4 }
 0x4c8   :  { %7413 = vmatprep.subr.bf16.mxu1 %v8637_v15 }
 0x4ca   :  { %3560 = vmatmul.mubr.bf16.gmra.mrb[100].mxu1 %v9656_v49 }
 0x4cb   :  { %3567 = vmatprep.mubr.bf16.mxu1 %v9688_v23  ;;  %7414 = vmatpush3.bf16.msra.mxu1 %v8638_v5 }
 0x4cc   :  { %7415 = vmatprep.subr.bf16.mxu1 %v8639_v13 }
 0x4cf   :  { %7416 = vmatpush3.bf16.msra.mxu1 %v8640_v6 }
 0x4d0   :  { %7417 = vmatprep.subr.bf16.mxu1 %v8645_v9 }
 0x4d2   :  { %3568 = vmatmul.mubr.bf16.gmra.mrb[104].mxu1 %v9686_v21 }
 0x4d3   :  { %3575 = vmatprep.mubr.bf16.mxu1 %v9715_v60  ;;  %7418 = vmatpush3.bf16.msra.mxu1 %v8646_v11 }
 0x4d4   :  { %7419 = vmatprep.subr.bf16.mxu1 %v8653_v47 }
 0x4d5   :  { %v3271_v20 = vpop.f32.mrb[0].mxu1 }
 0x4d6   :  { %v3273_v28 = vpop.f32.mrb[1].mxu1  ;;  %v7935_v40 = vadd.f32 %v3271_v20, %v10140_v33 }
 0x4d7   :  { %v3275_v30 = vpop.f32.mrb[2].mxu1  ;;  %7420 = vmatpush3.bf16.msra.mxu1 %v8654_v14  ;;  %v7936_v41 = vadd.f32 %v3273_v28, %v10146_v36 }
 0x4d8   :  { %v3277_v34 = vpop.f32.mrb[3].mxu1  ;;  %7421 = vmatprep.subr.bf16.mxu1 %v8661_v16  ;;  %v7937_v43 = vadd.f32 %v3275_v30, %v10140_v33  ;;  %v3777_v53 = vmax.f32 %v7935_v40, 0.0 }
 0x4d9   :  { %v7938_v45 = vadd.f32 %v3277_v34, %v10146_v36  ;;  %v3778_v0 = vmax.f32 %v7936_v41, 0.0 }
 0x4da   :  { %3576 = vmatmul.mubr.bf16.gmra.mrb[108].mxu1 %v9713_v58  ;;  %v3780_v15 = vmax.f32 %v7937_v43, 0.0 }
 0x4db   :  { %3583 = vmatprep.mubr.bf16.mxu1 %v9724_v27  ;;  %7422 = vmatpush3.bf16.msra.mxu1 %v8662_v32  ;;  %v3781_v6 = vmax.f32 %v7938_v45, 0.0 }
 0x4dc   :  { %7423 = vmatprep.subr.bf16.mxu1 %v8663_v35 }
 0x4dd   :  { %v3281_v42 = vpop.f32.mrb[4].mxu1 }
 0x4de   :  { %v7939_v46 = vadd.f32 %v3281_v42, %v10140_v33  ;;  %v3283_v48 = vpop.f32.mrb[5].mxu1 }
 0x4df   :  { %v7940_v50 = vadd.f32 %v3283_v48, %v10146_v36  ;;  %v3285_v52 = vpop.f32.mrb[6].mxu1  ;;  %7424 = vmatpush3.bf16.msra.mxu1 %v8664_v38 }
 0x4e0   :  { %v3783_v54 = vmax.f32 %v7939_v46, 0.0  ;;  %v7941_v59 = vadd.f32 %v3285_v52, %v10140_v33  ;;  %v3287_v62 = vpop.f32.mrb[7].mxu1  ;;  %7497 = vmatprep.subr.bf16.mxu1 %v8665_v63 }
 0x4e1   :  { %v3784_v2 = vmax.f32 %v7940_v50, 0.0  ;;  %v7942_v4 = vadd.f32 %v3287_v62, %v10146_v36 }
 0x4e2   :  { %v3849_v5 = vadd.f32 %v3783_v54, %v3777_v53  ;;  %v3786_v13 = vmax.f32 %v7941_v59, 0.0  ;;  %3584 = vmatmul.mubr.bf16.gmra.mrb[112].mxu1 %v9722_v25 }
 0x4e3   :  { %v3850_v7 = vadd.f32 %v3784_v2, %v3778_v0  ;;  %v3787_v9 = vmax.f32 %v7942_v4, 0.0  ;;  %3591 = vmatprep.mubr.bf16.mxu1 %v9730_v57 }
 0x4e4   :  { %v3852_v11 = vadd.f32 %v3786_v13, %v3780_v15  ;;  %v3855_v44 = vmul.f32 0.5, %v3849_v5 }
 0x4e5   :  { %v3853_v47 = vadd.f32 %v3787_v9, %v3781_v6  ;;  %v3291_v14 = vpop.f32.mrb[8].mxu1  ;;  %v3856_v28 = vmul.f32 0.5, %v3850_v7 }
 0x4e6   :  { %v3858_v16 = vmul.f32 0.5, %v3852_v11  ;;  %v3293_v20 = vpop.f32.mrb[9].mxu1  ;;  %v7943_v38 = vadd.f32 %v3291_v14, %v10140_v33 }
 0x4e7   :  { %v3295_v24 = vpop.f32.mrb[10].mxu1  ;;  %v3859_v30 = vmul.f32 0.5, %v3853_v47  ;;  %v7944_v40 = vadd.f32 %v3293_v20, %v10146_v36 }
 0x4e8   :  { %v10166_v32 = vpack.c.bf16 %v3858_v16, %v3855_v44  ;;  %v3297_v34 = vpop.f32.mrb[11].mxu1  ;;  %v7945_v42 = vadd.f32 %v3295_v24, %v10140_v33  ;;  %v3789_v52 = vmax.f32 %v7943_v38, 0.0 }
 0x4e9   :  { %v10168_v35 = vpack.c.bf16 %v3859_v30, %v3856_v28  ;;  %v7946_v48 = vadd.f32 %v3297_v34, %v10146_v36  ;;  %v3790_v62 = vmax.f32 %v7944_v40, 0.0 }
 0x4ea   :  { %3592 = vmatmul.mubr.bf16.gmra.mrb[116].mxu1 %v9728_v55  ;;  %v3792_v2 = vmax.f32 %v7945_v42, 0.0 }
 0x4eb   :  { %3599 = vmatprep.mubr.bf16.mxu1 %v9736_v26  ;;  %v3793_v5 = vmax.f32 %v7946_v48, 0.0 }
 0x4ed   :  { %v3301_v41 = vpop.f32.mrb[12].mxu1 }
 0x4ee   :  { %v7947_v43 = vadd.f32 %v3301_v41, %v10140_v33  ;;  %v3303_v46 = vpop.f32.mrb[13].mxu1 }
 0x4ef   :  { %v7948_v45 = vadd.f32 %v3303_v46, %v10146_v36  ;;  %v3305_v50 = vpop.f32.mrb[14].mxu1 }
 0x4f0   :  { %v3795_v53 = vmax.f32 %v7947_v43, 0.0  ;;  %v7949_v54 = vadd.f32 %v3305_v50, %v10140_v33  ;;  %v3307_v59 = vpop.f32.mrb[15].mxu1 }
 0x4f1   :  { %v3796_v63 = vmax.f32 %v7948_v45, 0.0  ;;  %v7950_v0 = vadd.f32 %v3307_v59, %v10146_v36 }
 0x4f2   :  { %v3861_v4 = vadd.f32 %v3795_v53, %v3789_v52  ;;  %v3798_v15 = vmax.f32 %v7949_v54, 0.0  ;;  %3600 = vmatmul.mubr.bf16.gmra.mrb[120].mxu1 %v9734_v22 }
 0x4f3   :  { %v3862_v13 = vadd.f32 %v3796_v63, %v3790_v62  ;;  %v3799_v6 = vmax.f32 %v7950_v0, 0.0  ;;  %3607 = vmatprep.mubr.bf16.mxu1 %v9742_v61 }
 0x4f4   :  { %v3864_v7 = vadd.f32 %v3798_v15, %v3792_v2  ;;  %v3867_v47 = vmul.f32 0.5, %v3861_v4 }
 0x4f5   :  { %v3865_v9 = vadd.f32 %v3799_v6, %v3793_v5  ;;  %v3311_v11 = vpop.f32.mrb[16].mxu1  ;;  %v3868_v16 = vmul.f32 0.5, %v3862_v13 }
 0x4f6   :  { %v3870_v14 = vmul.f32 0.5, %v3864_v7  ;;  %v3313_v44 = vpop.f32.mrb[17].mxu1  ;;  %v7951_v38 = vadd.f32 %v3311_v11, %v10140_v33 }
 0x4f7   :  { %v3871_v20 = vmul.f32 0.5, %v3865_v9  ;;  %v3315_v24 = vpop.f32.mrb[18].mxu1  ;;  %v7952_v40 = vadd.f32 %v3313_v44, %v10146_v36 }
 0x4f8   :  { %v3317_v28 = vpop.f32.mrb[19].mxu1  ;;  %v10182_v30 = vpack.c.bf16 %v3870_v14, %v3867_v47  ;;  %v7953_v42 = vadd.f32 %v3315_v24, %v10140_v33  ;;  %v3801_v52 = vmax.f32 %v7951_v38, 0.0 }
 0x4f9   :  { %v10184_v34 = vpack.c.bf16 %v3871_v20, %v3868_v16  ;;  %v7954_v48 = vadd.f32 %v3317_v28, %v10146_v36  ;;  %v3802_v62 = vmax.f32 %v7952_v40, 0.0 }
 0x4fa   :  { %3608 = vmatmul.mubr.bf16.gmra.mrb[124].mxu1 %v9740_v56  ;;  %v3804_v2 = vmax.f32 %v7953_v42, 0.0 }
 0x4fb   :  { %3615 = vmatprep.mubr.bf16.mxu1 %v9748_v31  ;;  %v3805_v5 = vmax.f32 %v7954_v48, 0.0 }
 0x4fd   :  { %v3321_v41 = vpop.f32.mrb[20].mxu1 }
 0x4fe   :  { %v7955_v43 = vadd.f32 %v3321_v41, %v10140_v33  ;;  %v3323_v46 = vpop.f32.mrb[21].mxu1 }
 0x4ff   :  { %v7956_v45 = vadd.f32 %v3323_v46, %v10146_v36  ;;  %v3325_v50 = vpop.f32.mrb[22].mxu1 }
 0x500   :  { %v3807_v53 = vmax.f32 %v7955_v43, 0.0  ;;  %v7957_v54 = vadd.f32 %v3325_v50, %v10140_v33  ;;  %v3327_v59 = vpop.f32.mrb[23].mxu1 }
 0x501   :  { %v3808_v63 = vmax.f32 %v7956_v45, 0.0  ;;  %v7958_v0 = vadd.f32 %v3327_v59, %v10146_v36 }
 0x502   :  { %v3873_v4 = vadd.f32 %v3807_v53, %v3801_v52  ;;  %v3810_v15 = vmax.f32 %v7957_v54, 0.0  ;;  %3616 = vmatmul.mubr.bf16.gmra.mrb[128].mxu1 %v9746_v29 }
 0x503   :  { %v3874_v13 = vadd.f32 %v3808_v63, %v3802_v62  ;;  %v3811_v6 = vmax.f32 %v7958_v0, 0.0  ;;  %3623 = vmatprep.mubr.bf16.mxu1 %v9754_v3 }
 0x504   :  { %v3876_v7 = vadd.f32 %v3810_v15, %v3804_v2  ;;  %v3879_v47 = vmul.f32 0.5, %v3873_v4 }
 0x505   :  { %v3877_v9 = vadd.f32 %v3811_v6, %v3805_v5  ;;  %v3331_v11 = vpop.f32.mrb[24].mxu1  ;;  %v3880_v16 = vmul.f32 0.5, %v3874_v13 }
 0x506   :  { %v3882_v14 = vmul.f32 0.5, %v3876_v7  ;;  %v3333_v44 = vpop.f32.mrb[25].mxu1  ;;  %v7959_v41 = vadd.f32 %v3331_v11, %v10140_v33 }
 0x507   :  { %v3883_v20 = vmul.f32 0.5, %v3877_v9  ;;  %v3335_v24 = vpop.f32.mrb[26].mxu1  ;;  %v7960_v42 = vadd.f32 %v3333_v44, %v10146_v36 }
 0x508   :  { %v10198_v28 = vpack.c.bf16 %v3882_v14, %v3879_v47  ;;  %v3337_v38 = vpop.f32.mrb[27].mxu1  ;;  %v7961_v46 = vadd.f32 %v3335_v24, %v10140_v33  ;;  %v3813_v54 = vmax.f32 %v7959_v41, 0.0 }
 0x509   :  { %v10200_v40 = vpack.c.bf16 %v3883_v20, %v3880_v16  ;;  %v7962_v50 = vadd.f32 %v3337_v38, %v10146_v36  ;;  %v3814_v0 = vmax.f32 %v7960_v42, 0.0 }
 0x50a   :  { %3624 = vmatmul.mubr.bf16.gmra.mrb[132].mxu1 %v9752_v1  ;;  %v3816_v15 = vmax.f32 %v7961_v46, 0.0 }
 0x50b   :  { %3631 = vmatprep.mubr.bf16.mxu1 %v9760_v39  ;;  %4742 = vmatprep.mubr.bf16.mxu0 %v10200_v40  ;;  %v3817_v6 = vmax.f32 %v7962_v50, 0.0 }
 0x50c   :  { %4743 = vmatmul.mubr.bf16.vlgmr.msra.gmra.mrb[112].mxu0 %v10198_v28 }
 0x50d   :  { %v3341_v43 = vpop.f32.mrb[28].mxu1 }
 0x50e   :  { %v7963_v48 = vadd.f32 %v3341_v43, %v10140_v33  ;;  %v3343_v45 = vpop.f32.mrb[29].mxu1 }
 0x50f   :  { %v7964_v52 = vadd.f32 %v3343_v45, %v10146_v36  ;;  %v3345_v53 = vpop.f32.mrb[30].mxu1 }
 0x510   :  { %v3819_v59 = vmax.f32 %v7963_v48, 0.0  ;;  %v7965_v62 = vadd.f32 %v3345_v53, %v10140_v33  ;;  %v3347_v63 = vpop.f32.mrb[31].mxu1 }
 0x511   :  { %v3820_v2 = vmax.f32 %v7964_v52, 0.0  ;;  %v7966_v4 = vadd.f32 %v3347_v63, %v10146_v36 }
 0x512   :  { %v3885_v5 = vadd.f32 %v3819_v59, %v3813_v54  ;;  %v3822_v13 = vmax.f32 %v7965_v62, 0.0  ;;  %3632 = vmatmul.mubr.bf16.gmra.mrb[136].mxu1 %v9758_v37 }
 0x513   :  { %v3886_v7 = vadd.f32 %v3820_v2, %v3814_v0  ;;  %v3823_v9 = vmax.f32 %v7966_v4, 0.0  ;;  %3639 = vmatprep.mubr.bf16.mxu1 %v9781_v19 }
 0x514   :  { %v3888_v11 = vadd.f32 %v3822_v13, %v3816_v15  ;;  %v3891_v44 = vmul.f32 0.5, %v3885_v5  ;;  %v8667_v5 = vld [vmem:[%s11261_s4 + $0x48] sm:$0xff]  }
 0x515   :  { %v3889_v47 = vadd.f32 %v3823_v9, %v3817_v6  ;;  %v3351_v14 = vpop.f32.mrb[32].mxu1  ;;  %v3892_v24 = vmul.f32 0.5, %v3886_v7 }
 0x516   :  { %v3894_v16 = vmul.f32 0.5, %v3888_v11  ;;  %v3353_v20 = vpop.f32.mrb[33].mxu1  ;;  %v7967_v48 = vadd.f32 %v3351_v14, %v10140_v33 }
 0x517   :  { %v3895_v38 = vmul.f32 0.5, %v3889_v47  ;;  %v3355_v41 = vpop.f32.mrb[34].mxu1  ;;  %v7968_v45 = vadd.f32 %v3353_v20, %v10146_v36  ;;  %v8668_v20 = vld [vmem:[%s11261_s4 + $0x8] sm:$0xff]  }
 0x518   :  { %v10216_v42 = vpack.c.bf16 %v3894_v16, %v3891_v44  ;;  %v3357_v43 = vpop.f32.mrb[35].mxu1  ;;  %v7969_v52 = vadd.f32 %v3355_v41, %v10140_v33  ;;  %v3825_v0 = vmax.f32 %v7967_v48, 0.0 }
 0x519   :  { %v10218_v46 = vpack.c.bf16 %v3895_v38, %v3892_v24  ;;  %v7970_v59 = vadd.f32 %v3357_v43, %v10146_v36  ;;  %v3826_v13 = vmax.f32 %v7968_v45, 0.0  ;;  %v8669_v38 = vld [vmem:[%s11261_s4 + $0x50] sm:$0xff]  }
 0x51a   :  { %3640 = vmatmul.mubr.bf16.gmra.mrb[140].mxu1 %v9779_v17  ;;  %v3828_v9 = vmax.f32 %v7969_v52, 0.0 }
 0x51b   :  { %3680 = vmatprep.mubr.bf16.mxu1 %v9658_v51  ;;  %4750 = vmatprep.mubr.bf16.mxu0 %v10218_v46  ;;  %v8666_v51 = vld [vmem:[%s11261_s4] sm:$0xff]   ;;  %v3829_v14 = vmax.f32 %v7970_v59, 0.0  ;;  %v8670_v59 = vld [vmem:[%s11261_s4 + $0x10] sm:$0xff]  }
 0x51c   :  { %4751 = vmatmul.mubr.bf16.gmra.mrb[116].mxu0 %v10216_v42 }
 0x51d   :  { %v3361_v50 = vpop.f32.mrb[36].mxu1 }
 0x51e   :  { %v7971_v53 = vadd.f32 %v3361_v50, %v10140_v33  ;;  %v3363_v54 = vpop.f32.mrb[37].mxu1 }
 0x51f   :  { %v7972_v62 = vadd.f32 %v3363_v54, %v10146_v36  ;;  %v3365_v63 = vpop.f32.mrb[38].mxu1 }
 0x520   :  { %v3831_v2 = vmax.f32 %v7971_v53, 0.0  ;;  %v7973_v4 = vadd.f32 %v3365_v63, %v10140_v33  ;;  %v3367_v15 = vpop.f32.mrb[39].mxu1  ;;  %v8671_v63 = vld [vmem:[%s11261_s4 + $0x58] sm:$0xff]  }
 0x521   :  { %v3832_v6 = vmax.f32 %v7972_v62, 0.0  ;;  %v7974_v7 = vadd.f32 %v3367_v15, %v10146_v36 }
 0x522   :  { %v3897_v11 = vadd.f32 %v3831_v2, %v3825_v0  ;;  %v3834_v47 = vmax.f32 %v7973_v4, 0.0  ;;  %3681 = vmatmul.mubr.bf16.vlgmr.msra.gmra.mrb[144].mxu1 %v9656_v49  ;;  %v8672_v0 = vld [vmem:[%s11261_s4 + $0x18] sm:$0xff]  }
 0x523   :  { %v3898_v44 = vadd.f32 %v3832_v6, %v3826_v13  ;;  %v3835_v16 = vmax.f32 %v7974_v7, 0.0  ;;  %3688 = vmatprep.mubr.bf16.mxu1 %v9688_v23  ;;  %7498 = vmatpush3.bf16.msra.mxu1 %v8666_v51 }
 0x524   :  { %v3900_v24 = vadd.f32 %v3834_v47, %v3828_v9  ;;  %7499 = vmatprep.subr.bf16.mxu1 %v8667_v5  ;;  %v3903_v48 = vmul.f32 0.5, %v3897_v11 }
 0x525   :  { %v3901_v41 = vadd.f32 %v3835_v16, %v3829_v14  ;;  %v3371_v43 = vpop.f32.mrb[40].mxu1  ;;  %v3904_v50 = vmul.f32 0.5, %v3898_v44  ;;  %v8674_v44 = vld [vmem:[%s11261_s4 + $0x20] sm:$0xff]  }
 0x526   :  { %v3906_v49 = vmul.f32 0.5, %v3900_v24  ;;  %v3373_v45 = vpop.f32.mrb[41].mxu1  ;;  %v7975_v51 = vadd.f32 %v3371_v43, %v10140_v33 }
 0x527   :  { %v3907_v52 = vmul.f32 0.5, %v3901_v41  ;;  %v3375_v53 = vpop.f32.mrb[42].mxu1  ;;  %7500 = vmatpush3.bf16.msra.mxu1 %v8668_v20  ;;  %v7976_v2 = vadd.f32 %v3373_v45, %v10146_v36 }
 0x528   :  { %v3377_v23 = vpop.f32.mrb[43].mxu1  ;;  %v10246_v54 = vpack.c.bf16 %v3906_v49, %v3903_v48  ;;  %7501 = vmatprep.subr.bf16.mxu1 %v8669_v38  ;;  %v3837_v9 = vmax.f32 %v7975_v51, 0.0  ;;  %v8675_v38 = vld [vmem:[%s11261_s4 + $0x68] sm:$0xff]  }
 0x529   :  { %v10251_v62 = vpack.c.bf16 %v3907_v52, %v3904_v50  ;;  %v7978_v13 = vadd.f32 %v3377_v23, %v10146_v36  ;;  %v3838_v16 = vmax.f32 %v7976_v2, 0.0  ;;  %v8677_v23 = vld [vmem:[%s11261_s4 + $0x70] sm:$0xff]  }
 0x52a   :  { %3689 = vmatmul.mubr.bf16.gmra.mrb[148].mxu1 %v9686_v21  ;;  %v8673_v21 = vld [vmem:[%s11261_s4 + $0x60] sm:$0xff]  }
 0x52b   :  { %3696 = vmatprep.mubr.bf16.mxu1 %v9715_v60  ;;  %4758 = vmatprep.mubr.bf16.mxu0 %v10251_v62  ;;  %v7977_v60 = vadd.f32 %v3375_v53, %v10140_v33 }
 0x52c   :  { %4759 = vmatmul.mubr.bf16.gmra.mrb[120].mxu0 %v10246_v54  ;;  %7502 = vmatpush3.bf16.msra.mxu1 %v8670_v59 }
 0x52d   :  { %v3381_v4 = vpop.f32.mrb[44].mxu1  ;;  %7503 = vmatprep.subr.bf16.mxu1 %v8671_v63  ;;  %v3840_v41 = vmax.f32 %v7977_v60, 0.0  ;;  %v8678_v60 = vld [vmem:[%s11261_s4 + $0x30] sm:$0xff]  }
 0x52e   :  { %v7979_v15 = vadd.f32 %v3381_v4, %v10140_v33  ;;  %v3383_v5 = vpop.f32.mrb[45].mxu1 }
 0x52f   :  { %v7980_v6 = vadd.f32 %v3383_v5, %v10146_v36  ;;  %v3385_v7 = vpop.f32.mrb[46].mxu1 }
 0x530   :  { %v3843_v11 = vmax.f32 %v7979_v15, 0.0  ;;  %v7981_v47 = vadd.f32 %v3385_v7, %v10140_v33  ;;  %v3387_v14 = vpop.f32.mrb[47].mxu1  ;;  %7504 = vmatpush3.bf16.msra.mxu1 %v8672_v0  ;;  %v3841_v33 = vmax.f32 %v7978_v13, 0.0  ;;  %v8679_v13 = vld [vmem:[%s11261_s4 + $0x78] sm:$0xff]  }
 0x531   :  { %v3844_v20 = vmax.f32 %v7980_v6, 0.0  ;;  %v7982_v24 = vadd.f32 %v3387_v14, %v10146_v36  ;;  %7505 = vmatprep.subr.bf16.mxu1 %v8673_v21  ;;  %v8676_v36 = vld [vmem:[%s11261_s4 + $0x28] sm:$0xff]   ;;  %v8680_v6 = vld [vmem:[%s11261_s4 + $0x38] sm:$0xff]  }
 0x532   :  { %v3909_v43 = vadd.f32 %v3843_v11, %v3837_v9  ;;  %v3846_v48 = vmax.f32 %v7981_v47, 0.0  ;;  %3697 = vmatmul.mubr.bf16.gmra.mrb[152].mxu1 %v9713_v58 }
 0x533   :  { %v3910_v49 = vadd.f32 %v3844_v20, %v3838_v16  ;;  %v3847_v45 = vmax.f32 %v7982_v24, 0.0  ;;  %3704 = vmatprep.mubr.bf16.mxu1 %v9724_v27 }
 0x534   :  { %v3912_v50 = vadd.f32 %v3846_v48, %v3840_v41  ;;  %7506 = vmatpush3.bf16.msra.mxu1 %v8674_v44  ;;  %v3915_v59 = vmul.f32 0.5, %v3909_v43 }
 0x535   :  { %v3913_v52 = vadd.f32 %v3847_v45, %v3841_v33  ;;  %v7249_v53 = vpop.f32.mrb[48].mxu1  ;;  %7507 = vmatprep.subr.bf16.mxu1 %v8675_v38  ;;  %v3916_v51 = vmul.f32 0.5, %v3910_v49 }
 0x536   :  { %v3918_v58 = vmul.f32 0.5, %v3912_v50  ;;  %v7250_v63 = vpop.f32.mrb[49].mxu1 }
 0x537   :  { %v3919_v0 = vmul.f32 0.5, %v3913_v52  ;;  %v10288_v2 = vadd.f32 %v7250_v63, %v7249_v53  ;;  %v7252_v27 = vpop.f32.mrb[50].mxu1 }
 0x538   :  { %v7253_v4 = vpop.f32.mrb[51].mxu1  ;;  %v10290_v21 = vpack.c.bf16 %v3918_v58, %v3915_v59  ;;  %7508 = vmatpush3.bf16.msra.mxu1 %v8676_v36 }
 0x539   :  { %v10295_v15 = vadd.f32 %v7253_v4, %v7252_v27  ;;  %v10297_v5 = vpack.c.bf16 %v3919_v0, %v3916_v51  ;;  %7509 = vmatprep.subr.bf16.mxu1 %v8677_v23 }
 0x53a   :  { %3705 = vmatmul.mubr.bf16.gmra.mrb[156].mxu1 %v9722_v25 }
 0x53b   :  { %3712 = vmatprep.mubr.bf16.mxu1 %v9730_v57  ;;  %4766 = vmatprep.mubr.bf16.mxu0 %v10297_v5 }
 0x53c   :  { %4767 = vmatmul.mubr.bf16.gmra.mrb[124].mxu0 %v10290_v21  ;;  %7510 = vmatpush3.bf16.msra.mxu1 %v8678_v60 }
 0x53d   :  { %v7255_v7 = vpop.f32.mrb[52].mxu1  ;;  %7511 = vmatprep.subr.bf16.mxu1 %v8679_v13 }
 0x53e   :  { %v7256_v9 = vpop.f32.mrb[53].mxu1 }
 0x53f   :  { %v10309_v11 = vadd.f32 %v7256_v9, %v7255_v7  ;;  %v7258_v47 = vpop.f32.mrb[54].mxu1 }
 0x540   :  { %v7259_v14 = vpop.f32.mrb[55].mxu1  ;;  %7512 = vmatpush3.bf16.msra.mxu1 %v8680_v6 }
 0x541   :  { %v10311_v25 = vadd.f32 %v7259_v14, %v7258_v47 }
 0x542   :  { %3713 = vmatmul.mubr.bf16.gmra.mrb[160].mxu1 %v9728_v55 }
 0x543   :  { %3720 = vmatprep.mubr.bf16.mxu1 %v9736_v26 }
 0x545   :  { %v7261_v57 = vpop.f32.mrb[56].mxu1 }
 0x546   :  { %v7262_v44 = vpop.f32.mrb[57].mxu1 }
 0x547   :  { %v10315_v16 = vadd.f32 %v7262_v44, %v7261_v57  ;;  %v7264_v20 = vpop.f32.mrb[58].mxu1 }
 0x548   :  { %v7265_v24 = vpop.f32.mrb[59].mxu1 }
 0x549   :  { %v10317_v38 = vadd.f32 %v7265_v24, %v7264_v20 }
 0x54a   :  { %3721 = vmatmul.mubr.bf16.gmra.mrb[164].mxu1 %v9734_v22 }
 0x54b   :  { %3728 = vmatprep.mubr.bf16.mxu1 %v9742_v61 }
 0x54d   :  { %v7267_v41 = vpop.f32.mrb[60].mxu1 }
 0x54e   :  { %v7268_v43 = vpop.f32.mrb[61].mxu1 }
 0x54f   :  { %v10321_v48 = vadd.f32 %v7268_v43, %v7267_v41  ;;  %v7270_v33 = vpop.f32.mrb[62].mxu1  ;;  %v8683_v41 = vld [vmem:[%s11261_s4 + $0xc8] sm:$0xff]  }
 0x550   :  { %v7271_v55 = vpop.f32.mrb[63].mxu1 }
 0x551   :  { %v10323_v49 = vadd.f32 %v7271_v55, %v7270_v33  ;;  %v8685_v33 = vld [vmem:[%s11261_s4 + $0xd0] sm:$0xff]  }
 0x552   :  { %3729 = vmatmul.mubr.bf16.gmra.mrb[168].mxu1 %v9740_v56 }
 0x553   :  { %3736 = vmatprep.mubr.bf16.mxu1 %v9748_v31 }
 0x555   :  { %v7273_v26 = vpop.f32.mrb[64].mxu1 }
 0x556   :  { %v7274_v45 = vpop.f32.mrb[65].mxu1 }
 0x557   :  { %v10327_v50 = vadd.f32 %v7274_v45, %v7273_v26  ;;  %v7276_v36 = vpop.f32.mrb[66].mxu1 }
 0x558   :  { %v7277_v22 = vpop.f32.mrb[67].mxu1 }
 0x559   :  { %v10329_v52 = vadd.f32 %v7277_v22, %v7276_v36  ;;  %v8686_v22 = vld [vmem:[%s11261_s4 + $0x90] sm:$0xff]  }
 0x55a   :  { %3737 = vmatmul.mubr.bf16.gmra.mrb[172].mxu1 %v9746_v29 }
 0x55b   :  { %3744 = vmatprep.mubr.bf16.mxu1 %v9754_v3  ;;  %v8681_v3 = vld [vmem:[%s11261_s4 + $0xc0] sm:$0xff]  }
 0x55c   :  { %7537 = vmatprep.subr.bf16.mxu1 %v8681_v3 }
 0x55d   :  { %v7279_v61 = vpop.f32.mrb[68].mxu1 }
 0x55e   :  { %v7280_v53 = vpop.f32.mrb[69].mxu1 }
 0x55f   :  { %v10333_v23 = vadd.f32 %v7280_v53, %v7279_v61  ;;  %v7282_v59 = vpop.f32.mrb[70].mxu1  ;;  %v8687_v53 = vld [vmem:[%s11261_s4 + $0xd8] sm:$0xff]  }
 0x560   :  { %v7283_v56 = vpop.f32.mrb[71].mxu1 }
 0x561   :  { %v10335_v58 = vadd.f32 %v7283_v56, %v7282_v59  ;;  %v8688_v56 = vld [vmem:[%s11261_s4 + $0x98] sm:$0xff]  }
 0x562   :  { %3745 = vmatmul.mubr.bf16.gmra.mrb[176].mxu1 %v9752_v1 }
 0x563   :  { %3752 = vmatprep.mubr.bf16.mxu1 %v9760_v39 }
 0x565   :  { %v7285_v31 = vpop.f32.mrb[72].mxu1 }
 0x566   :  { %v7286_v63 = vpop.f32.mrb[73].mxu1 }
 0x567   :  { %v10339_v51 = vadd.f32 %v7286_v63, %v7285_v31  ;;  %v7288_v0 = vpop.f32.mrb[74].mxu1  ;;  %v8689_v31 = vld [vmem:[%s11261_s4 + $0xe0] sm:$0xff]  }
 0x568   :  { %v7289_v29 = vpop.f32.mrb[75].mxu1 }
 0x569   :  { %v10341_v27 = vadd.f32 %v7289_v29, %v7288_v0  ;;  %v2158_v29 = vsub.s32 2, %v10116_v12 }
 0x56a   :  { %3753 = vmatmul.mubr.bf16.gmra.mrb[180].mxu1 %v9758_v37 }
 0x56b   :  { %3760 = vmatprep.mubr.bf16.mxu1 %v9781_v19  ;;  %v10409_v12 = vrot.slane %v10133_v18, %v2158_v29 }
 0x56d   :  { %v7291_v4 = vpop.f32.mrb[76].mxu1 }
 0x56e   :  { %v7292_v1 = vpop.f32.mrb[77].mxu1 }
 0x56f   :  { %v10348_v39 = vadd.f32 %v7292_v1, %v7291_v4  ;;  %v7294_v60 = vpop.f32.mrb[78].mxu1  ;;  %v8690_v1 = vld [vmem:[%s11261_s4 + $0xa0] sm:$0xff]  }
 0x570   :  { %v7295_v13 = vpop.f32.mrb[79].mxu1 }
 0x571   :  { %v10350_v6 = vadd.f32 %v7295_v13, %v7294_v60  ;;  %v8691_v13 = vld [vmem:[%s11261_s4 + $0xe8] sm:$0xff]  }
 0x572   :  { %3761 = vmatmul.mubr.bf16.gmra.mrb[184].mxu1 %v9779_v17  ;;  %v8682_v17 = vld [vmem:[%s11261_s4 + $0x80] sm:$0xff]  }
 0x573   :  { %3768 = vmatprep.mubr.bf16.mxu1 %v9816_v10 }
 0x575   :  { %v7297_v37 = vpop.f32.mrb[80].mxu1 }
 0x576   :  { %v7298_v7 = vpop.f32.mrb[81].mxu1 }
 0x577   :  { %v10354_v19 = vadd.f32 %v7298_v7, %v7297_v37  ;;  %v7300_v9 = vpop.f32.mrb[82].mxu1  ;;  %v8692_v7 = vld [vmem:[%s11261_s4 + $0xa8] sm:$0xff]  }
 0x578   :  { %v7301_v47 = vpop.f32.mrb[83].mxu1 }
 0x579   :  { %v10356_v14 = vadd.f32 %v7301_v47, %v7300_v9  ;;  %v8693_v9 = vld [vmem:[%s11261_s4 + $0xf0] sm:$0xff]  }
 0x57a   :  { %3769 = vmatmul.mubr.bf16.gmra.mrb[188].mxu1 %v9811_v8  ;;  %v8684_v8 = vld [vmem:[%s11261_s4 + $0x88] sm:$0xff]  }
 0x57b   :  { %4547 = vmatprep.mubr.bf16.mxu1 %v10168_v35 }
 0x57d   :  { %v7303_v57 = vpop.f32.mrb[84].mxu1 }
 0x57e   :  { %v7304_v44 = vpop.f32.mrb[85].mxu1 }
 0x57f   :  { %v10360_v20 = vadd.f32 %v7304_v44, %v7303_v57  ;;  %v7306_v24 = vpop.f32.mrb[86].mxu1  ;;  %v3425_v44 = vadd.f32 %v10288_v2, %v10409_v12 }
 0x580   :  { %v7307_v10 = vpop.f32.mrb[87].mxu1 }
 0x581   :  { %v10368_v43 = vadd.f32 %v7307_v10, %v7306_v24 }
 0x582   :  { %4548 = vmatmul.mubr.bf16.vlgmr.msra.gmra.mrb[192].mxu1 %v10166_v32 }
 0x583   :  { %4555 = vmatprep.mubr.bf16.mxu1 %v10184_v34  ;;  %7538 = vmatpush3.bf16.msra.mxu1 %v8682_v17  ;;  %v8694_v17 = vld [vmem:[%s11261_s4 + $0xb0] sm:$0xff]  }
 0x584   :  { %7539 = vmatprep.subr.bf16.mxu1 %v8683_v41  ;;  %v8695_v41 = vld [vmem:[%s11261_s4 + $0xf8] sm:$0xff]  }
 0x585   :  { %v7309_v55 = vpop.f32.mrb[88].mxu1 }
 0x586   :  { %v7310_v26 = vpop.f32.mrb[89].mxu1 }
 0x587   :  { %v10378_v45 = vadd.f32 %v7310_v26, %v7309_v55  ;;  %v7312_v36 = vpop.f32.mrb[90].mxu1  ;;  %7540 = vmatpush3.bf16.msra.mxu1 %v8684_v8  ;;  %v3428_v8 = vadd.f32 %v10295_v15, %v10409_v12  ;;  %v8696_v26 = vld [vmem:[%s11261_s4 + $0xb8] sm:$0xff]   ;;  %v3433_v15 = vadd.f32 %v10309_v11, %v10409_v12  ;;  %v3441_v11 = vadd.f32 %v10315_v16, %v10409_v12 }
 0x588   :  { %v7313_v61 = vpop.f32.mrb[91].mxu1  ;;  %7541 = vmatprep.subr.bf16.mxu1 %v8685_v33  ;;  %v3452_v16 = vadd.f32 %v10323_v49, %v10409_v12 }
 0x589   :  { %v10386_v59 = vadd.f32 %v7313_v61, %v7312_v36 }
 0x58a   :  { %4556 = vmatmul.mubr.bf16.gmra.mrb[196].mxu1 %v10182_v30 }
 0x58b   :  { %4563 = vmatprep.mubr.bf16.mxu1 %v10200_v40  ;;  %7542 = vmatpush3.bf16.msra.mxu1 %v8686_v22 }
 0x58c   :  { %7543 = vmatprep.subr.bf16.mxu1 %v8687_v53 }
 0x58d   :  { %v7315_v63 = vpop.f32.mrb[92].mxu1 }
 0x58e   :  { %v7316_v0 = vpop.f32.mrb[93].mxu1 }
 0x58f   :  { %v10397_v3 = vadd.f32 %v7316_v0, %v7315_v63  ;;  %v7318_v4 = vpop.f32.mrb[94].mxu1  ;;  %7544 = vmatpush3.bf16.msra.mxu1 %v8688_v56 }
 0x590   :  { %v7319_v60 = vpop.f32.mrb[95].mxu1  ;;  %7545 = vmatprep.subr.bf16.mxu1 %v8689_v31  ;;  %v3436_v31 = vadd.f32 %v10311_v25, %v10409_v12  ;;  %v3444_v25 = vadd.f32 %v10317_v38, %v10409_v12 }
 0x591   :  { %v10405_v37 = vadd.f32 %v7319_v60, %v7318_v4  ;;  %v8697_v4 = vld [vmem:[%s11261_s4 + $0x140] sm:$0xff]  }
 0x592   :  { %4564 = vmatmul.mubr.bf16.gmra.mrb[200].mxu1 %v10198_v28 }
 0x593   :  { %4571 = vmatprep.mubr.bf16.mxu1 %v10218_v46  ;;  %7546 = vmatpush3.bf16.msra.mxu1 %v8690_v1 }
 0x594   :  { %7547 = vmatprep.subr.bf16.mxu1 %v8691_v13 }
 0x595   :  { %v7337_v47 = vpop.f32.mrb[96].mxu1 }
 0x596   :  { %v7338_v57 = vpop.f32.mrb[97].mxu1 }
 0x597   :  { %v7339_v24 = vadd.f32 %v7338_v57, %v7337_v47  ;;  %v7340_v18 = vpop.f32.mrb[98].mxu1  ;;  %7548 = vmatpush3.bf16.msra.mxu1 %v8692_v7 }
 0x598   :  { %v7341_v10 = vpop.f32.mrb[99].mxu1  ;;  %7549 = vmatprep.subr.bf16.mxu1 %v8693_v9 }
 0x599   :  { %v10428_v33 = vadd.f32 %v7339_v24, %v3425_v44  ;;  %v7342_v55 = vadd.f32 %v7341_v10, %v7340_v18 }
 0x59a   :  { %4572 = vmatmul.mubr.bf16.gmra.mrb[204].mxu1 %v10216_v42 }
 0x59b   :  { %v10431_v2 = vadd.f32 %v7342_v55, %v3428_v8  ;;  %4612 = vmatprep.mubr.bf16.mxu1 %v10182_v30  ;;  %7550 = vmatpush3.bf16.msra.mxu1 %v8694_v17  ;;  %v3449_v17 = vadd.f32 %v10321_v48, %v10409_v12  ;;  %v3460_v48 = vadd.f32 %v10329_v52, %v10409_v12 }
 0x59c   :  { %7551 = vmatprep.subr.bf16.mxu1 %v8695_v41 }
 0x59d   :  { %v7343_v36 = vpop.f32.mrb[100].mxu1 }
 0x59e   :  { %v7344_v22 = vpop.f32.mrb[101].mxu1 }
 0x59f   :  { %v7345_v61 = vadd.f32 %v7344_v22, %v7343_v36  ;;  %v7346_v53 = vpop.f32.mrb[102].mxu1  ;;  %7552 = vmatpush3.bf16.msra.mxu1 %v8696_v26 }
 0x5a0   :  { %v7347_v56 = vpop.f32.mrb[103].mxu1  ;;  %7577 = vmatprep.subr.bf16.mxu1 %v8697_v4 }
 0x5a1   :  { %v10441_v63 = vadd.f32 %v7345_v61, %v3433_v15  ;;  %v7348_v0 = vadd.f32 %v7347_v56, %v7346_v53  ;;  %v3457_v15 = vadd.f32 %v10327_v50, %v10409_v12  ;;  %v3468_v50 = vadd.f32 %v10335_v58, %v10409_v12 }
 0x5a3   :  { %v10443_v29 = vadd.f32 %v7348_v0, %v3436_v31 }
 0x5a5   :  { %v7349_v1 = vpop.f32.mrb[104].mxu1 }
 0x5a6   :  { %v7350_v60 = vpop.f32.mrb[105].mxu1 }
 0x5a7   :  { %v7351_v13 = vadd.f32 %v7350_v60, %v7349_v1  ;;  %v7352_v7 = vpop.f32.mrb[106].mxu1  ;;  %v3465_v60 = vadd.f32 %v10333_v23, %v10409_v12  ;;  %v3476_v23 = vadd.f32 %v10341_v27, %v10409_v12 }
 0x5a8   :  { %v7353_v9 = vpop.f32.mrb[107].mxu1 }
 0x5a9   :  { %v10452_v47 = vadd.f32 %v7351_v13, %v3441_v11  ;;  %v7354_v57 = vadd.f32 %v7353_v9, %v7352_v7 }
 0x5ab   :  { %v10454_v44 = vadd.f32 %v7354_v57, %v3444_v25 }
 0x5ad   :  { %v7355_v24 = vpop.f32.mrb[108].mxu1 }
 0x5ae   :  { %v7356_v18 = vpop.f32.mrb[109].mxu1 }
 0x5af   :  { %v7357_v10 = vadd.f32 %v7356_v18, %v7355_v24  ;;  %v7358_v41 = vpop.f32.mrb[110].mxu1  ;;  %v3473_v18 = vadd.f32 %v10339_v51, %v10409_v12  ;;  %v3484_v51 = vadd.f32 %v10350_v6, %v10409_v12 }
 0x5b0   :  { %v7359_v8 = vpop.f32.mrb[111].mxu1 }
 0x5b1   :  { %v10460_v55 = vadd.f32 %v7357_v10, %v3449_v17  ;;  %v7360_v26 = vadd.f32 %v7359_v8, %v7358_v41 }
 0x5b3   :  { %v10462_v38 = vadd.f32 %v7360_v26, %v3452_v16 }
 0x5b5   :  { %v7361_v36 = vpop.f32.mrb[112].mxu1 }
 0x5b6   :  { %v7362_v22 = vpop.f32.mrb[113].mxu1 }
 0x5b7   :  { %v7363_v61 = vadd.f32 %v7362_v22, %v7361_v36  ;;  %v7364_v53 = vpop.f32.mrb[114].mxu1  ;;  %v3481_v22 = vadd.f32 %v10348_v39, %v10409_v12  ;;  %v3492_v39 = vadd.f32 %v10356_v14, %v10409_v12 }
 0x5b8   :  { %v7365_v56 = vpop.f32.mrb[115].mxu1 }
 0x5b9   :  { %v10468_v31 = vadd.f32 %v7363_v61, %v3457_v15  ;;  %v7366_v0 = vadd.f32 %v7365_v56, %v7364_v53 }
 0x5bb   :  { %v10470_v49 = vadd.f32 %v7366_v0, %v3460_v48 }
 0x5bd   :  { %v7367_v4 = vpop.f32.mrb[116].mxu1 }
 0x5be   :  { %v7368_v1 = vpop.f32.mrb[117].mxu1 }
 0x5bf   :  { %v7369_v11 = vadd.f32 %v7368_v1, %v7367_v4  ;;  %v7370_v13 = vpop.f32.mrb[118].mxu1  ;;  %v3489_v1 = vadd.f32 %v10354_v19, %v10409_v12 }
 0x5c0   :  { %v7371_v7 = vpop.f32.mrb[119].mxu1 }
 0x5c1   :  { %v10476_v9 = vadd.f32 %v7369_v11, %v3465_v60  ;;  %v7372_v25 = vadd.f32 %v7371_v7, %v7370_v13 }
 0x5c3   :  { %v10478_v52 = vadd.f32 %v7372_v25, %v3468_v50 }
 0x5c5   :  { %v7373_v57 = vpop.f32.mrb[120].mxu1 }
 0x5c6   :  { %v7374_v24 = vpop.f32.mrb[121].mxu1 }
 0x5c7   :  { %v7375_v17 = vadd.f32 %v7374_v24, %v7373_v57  ;;  %v7376_v10 = vpop.f32.mrb[122].mxu1  ;;  %v3497_v24 = vadd.f32 %v10360_v20, %v10409_v12 }
 0x5c8   :  { %v7377_v41 = vpop.f32.mrb[123].mxu1 }
 0x5c9   :  { %v10484_v8 = vadd.f32 %v7375_v17, %v3473_v18  ;;  %v7378_v16 = vadd.f32 %v7377_v41, %v7376_v10 }
 0x5cb   :  { %v10486_v58 = vadd.f32 %v7378_v16, %v3476_v23  ;;  %v3500_v23 = vadd.f32 %v10368_v43, %v10409_v12  ;;  %v3508_v43 = vadd.f32 %v10386_v59, %v10409_v12 }
 0x5cd   :  { %v7379_v26 = vpop.f32.mrb[124].mxu1 }
 0x5ce   :  { %v7380_v36 = vpop.f32.mrb[125].mxu1 }
 0x5cf   :  { %v7381_v15 = vadd.f32 %v7380_v36, %v7379_v26  ;;  %v7382_v61 = vpop.f32.mrb[126].mxu1 }
 0x5d0   :  { %v7383_v53 = vpop.f32.mrb[127].mxu1 }
 0x5d1   :  { %v10492_v56 = vadd.f32 %v7381_v15, %v3481_v22  ;;  %v7384_v48 = vadd.f32 %v7383_v53, %v7382_v61 }
 0x5d3   :  { %v10494_v27 = vadd.f32 %v7384_v48, %v3484_v51  ;;  %v3505_v51 = vadd.f32 %v10378_v45, %v10409_v12 }
 0x5d5   :  { %v7385_v0 = vpop.f32.mrb[128].mxu1 }
 0x5d6   :  { %v7386_v4 = vpop.f32.mrb[129].mxu1 }
 0x5d7   :  { %v7387_v60 = vadd.f32 %v7386_v4, %v7385_v0  ;;  %v7388_v11 = vpop.f32.mrb[130].mxu1 }
 0x5d8   :  { %v7389_v13 = vpop.f32.mrb[131].mxu1 }
 0x5d9   :  { %v10500_v7 = vadd.f32 %v7387_v60, %v3489_v1  ;;  %v7390_v50 = vadd.f32 %v7389_v13, %v7388_v11 }
 0x5db   :  { %v10502_v6 = vadd.f32 %v7390_v50, %v3492_v39  ;;  %v3513_v50 = vadd.f32 %v10397_v3, %v10409_v12 }
 0x5dd   :  { %v7391_v25 = vpop.f32.mrb[132].mxu1 }
 0x5de   :  { %v7392_v57 = vpop.f32.mrb[133].mxu1 }
 0x5df   :  { %v7393_v18 = vadd.f32 %v7392_v57, %v7391_v25  ;;  %v7394_v17 = vpop.f32.mrb[134].mxu1  ;;  %v7633_v10 = vpop.f32.mrb[112].mxu0 }
 0x5e0   :  { %v7395_v19 = vpop.f32.mrb[135].mxu1  ;;  %v7634_v41 = vpop.f32.mrb[113].mxu0 }
 0x5e1   :  { %v10508_v16 = vadd.f32 %v7393_v18, %v3497_v24  ;;  %v7396_v14 = vadd.f32 %v7395_v19, %v7394_v17  ;;  %v10510_v26 = vadd.f32 %v7634_v41, %v7633_v10  ;;  %v7636_v36 = vpop.f32.mrb[114].mxu0  ;;  %v3516_v17 = vadd.f32 %v10405_v37, %v10409_v12 }
 0x5e2   :  { %v7637_v22 = vpop.f32.mrb[115].mxu0 }
 0x5e3   :  { %v10512_v15 = vadd.f32 %v7396_v14, %v3500_v23  ;;  %v10514_v61 = vadd.f32 %v7637_v22, %v7636_v36 }
 0x5e5   :  { %v7397_v20 = vpop.f32.mrb[136].mxu1 }
 0x5e6   :  { %v7398_v53 = vpop.f32.mrb[137].mxu1 }
 0x5e7   :  { %v7399_v48 = vadd.f32 %v7398_v53, %v7397_v20  ;;  %v7400_v0 = vpop.f32.mrb[138].mxu1 }
 0x5e8   :  { %v7401_v4 = vpop.f32.mrb[139].mxu1 }
 0x5e9   :  { %v10520_v1 = vadd.f32 %v7399_v48, %v3505_v51  ;;  %v7402_v60 = vadd.f32 %v7401_v4, %v7400_v0 }
 0x5eb   :  { %v10522_v11 = vadd.f32 %v7402_v60, %v3508_v43 }
 0x5ed   :  { %v7403_v13 = vpop.f32.mrb[140].mxu1 }
 0x5ee   :  { %v7404_v39 = vpop.f32.mrb[141].mxu1 }
 0x5ef   :  { %v7405_v25 = vadd.f32 %v7404_v39, %v7403_v13  ;;  %v7406_v57 = vpop.f32.mrb[142].mxu1  ;;  %v7639_v24 = vpop.f32.mrb[116].mxu0 }
 0x5f0   :  { %v7407_v45 = vpop.f32.mrb[143].mxu1  ;;  %v7640_v18 = vpop.f32.mrb[117].mxu0 }
 0x5f1   :  { %v10528_v10 = vadd.f32 %v7405_v25, %v3513_v50  ;;  %v7408_v59 = vadd.f32 %v7407_v45, %v7406_v57  ;;  %v10530_v19 = vadd.f32 %v7640_v18, %v7639_v24  ;;  %v7642_v41 = vpop.f32.mrb[118].mxu0 }
 0x5f2   :  { %v7643_v23 = vpop.f32.mrb[119].mxu0 }
 0x5f3   :  { %v10532_v14 = vadd.f32 %v7408_v59, %v3516_v17  ;;  %v10534_v36 = vadd.f32 %v7643_v23, %v7642_v41 }
 0x5f5   :  { %v7425_v3 = vpop.f32.mrb[144].mxu1 }
 0x5f6   :  { %v7426_v22 = vpop.f32.mrb[145].mxu1 }
 0x5f7   :  { %v7427_v20 = vadd.f32 %v7426_v22, %v7425_v3  ;;  %v7428_v53 = vpop.f32.mrb[146].mxu1 }
 0x5f8   :  { %v7429_v51 = vpop.f32.mrb[147].mxu1 }
 0x5f9   :  { %v3683_v48 = vadd.f32 %v7427_v20, %v10428_v33  ;;  %v7430_v0 = vadd.f32 %v7429_v51, %v7428_v53 }
 0x5fb   :  { %v3686_v37 = vadd.f32 %v7430_v0, %v10431_v2  ;;  %v3779_v17 = vmax.f32 %v3683_v48, 0.0 }
 0x5fd   :  { %v7431_v12 = vpop.f32.mrb[148].mxu1  ;;  %v3782_v2 = vmax.f32 %v3686_v37, 0.0 }
 0x5fe   :  { %v7432_v4 = vpop.f32.mrb[149].mxu1 }
 0x5ff   :  { %v7433_v43 = vadd.f32 %v7432_v4, %v7431_v12  ;;  %v7434_v60 = vpop.f32.mrb[150].mxu1  ;;  %v7645_v13 = vpop.f32.mrb[120].mxu0 }
 0x600   :  { %v7435_v39 = vpop.f32.mrb[151].mxu1  ;;  %v7646_v50 = vpop.f32.mrb[121].mxu0 }
 0x601   :  { %v3691_v25 = vadd.f32 %v7433_v43, %v10441_v63  ;;  %v7436_v57 = vadd.f32 %v7435_v39, %v7434_v60  ;;  %v10539_v24 = vadd.f32 %v7646_v50, %v7645_v13  ;;  %v7648_v45 = vpop.f32.mrb[122].mxu0  ;;  %v8699_v13 = vld [vmem:[%s11261_s4 + $0x148] sm:$0xff]  }
 0x602   :  { %v7649_v18 = vpop.f32.mrb[123].mxu0 }
 0x603   :  { %v3785_v59 = vmax.f32 %v3691_v25, 0.0  ;;  %v3694_v33 = vadd.f32 %v7436_v57, %v10443_v29  ;;  %v10542_v41 = vadd.f32 %v7649_v18, %v7648_v45  ;;  %v8698_v29 = vld [vmem:[%s11261_s4 + $0x100] sm:$0xff]  }
 0x605   :  { %v3851_v23 = vadd.f32 %v3785_v59, %v3779_v17  ;;  %v3788_v3 = vmax.f32 %v3694_v33, 0.0  ;;  %v7437_v22 = vpop.f32.mrb[152].mxu1 }
 0x606   :  { %v7438_v20 = vpop.f32.mrb[153].mxu1 }
 0x607   :  { %v3854_v53 = vadd.f32 %v3788_v3, %v3782_v2  ;;  %v7439_v51 = vadd.f32 %v7438_v20, %v7437_v22  ;;  %v7440_v0 = vpop.f32.mrb[154].mxu1  ;;  %v3857_v12 = vmul.f32 0.5, %v3851_v23  ;;  %v8702_v22 = vld [vmem:[%s11261_s4 + $0x110] sm:$0xff]  }
 0x608   :  { %v7441_v63 = vpop.f32.mrb[155].mxu1 }
 0x609   :  { %v3860_v4 = vmul.f32 0.5, %v3854_v53  ;;  %v3699_v43 = vadd.f32 %v7439_v51, %v10452_v47  ;;  %v7442_v60 = vadd.f32 %v7441_v63, %v7440_v0  ;;  %v8700_v47 = vld [vmem:[%s11261_s4 + $0x108] sm:$0xff]  }
 0x60b   :  { %v10548_v48 = vpack.c.bf16 %v3860_v4, %v3857_v12  ;;  %v3702_v37 = vadd.f32 %v7442_v60, %v10454_v44  ;;  %v8701_v44 = vld [vmem:[%s11261_s4 + $0x150] sm:$0xff]   ;;  %v3791_v20 = vmax.f32 %v3699_v43, 0.0  ;;  %v8704_v43 = vld [vmem:[%s11261_s4 + $0x118] sm:$0xff]  }
 0x60d   :  { %v7443_v39 = vpop.f32.mrb[156].mxu1  ;;  %4613 = vmatmul.mubr.bf16.vlgmr.msra.gmra.mrb[208].mxu1 %v10548_v48  ;;  %v3794_v63 = vmax.f32 %v3702_v37, 0.0 }
 0x60e   :  { %v7444_v50 = vpop.f32.mrb[157].mxu1  ;;  %4620 = vmatprep.mubr.bf16.mxu1 %v10198_v28  ;;  %7578 = vmatpush3.bf16.msra.mxu1 %v8698_v29 }
 0x60f   :  { %v7445_v25 = vadd.f32 %v7444_v50, %v7443_v39  ;;  %v7446_v57 = vpop.f32.mrb[158].mxu1  ;;  %v7651_v45 = vpop.f32.mrb[124].mxu0  ;;  %7579 = vmatprep.subr.bf16.mxu1 %v8699_v13  ;;  %v8705_v50 = vld [vmem:[%s11261_s4 + $0x160] sm:$0xff]  }
 0x610   :  { %v7447_v18 = vpop.f32.mrb[159].mxu1  ;;  %v7652_v17 = vpop.f32.mrb[125].mxu0 }
 0x611   :  { %v3707_v59 = vadd.f32 %v7445_v25, %v10460_v55  ;;  %v7448_v33 = vadd.f32 %v7447_v18, %v7446_v57  ;;  %v10563_v2 = vadd.f32 %v7652_v17, %v7651_v45  ;;  %v7654_v23 = vpop.f32.mrb[126].mxu0  ;;  %v8703_v55 = vld [vmem:[%s11261_s4 + $0x158] sm:$0xff]  }
 0x612   :  { %v7655_v3 = vpop.f32.mrb[127].mxu0  ;;  %7580 = vmatpush3.bf16.msra.mxu1 %v8700_v47 }
 0x613   :  { %v3797_v53 = vmax.f32 %v3707_v59, 0.0  ;;  %v3710_v51 = vadd.f32 %v7448_v33, %v10462_v38  ;;  %v10569_v0 = vadd.f32 %v7655_v3, %v7654_v23  ;;  %7581 = vmatprep.subr.bf16.mxu1 %v8701_v44  ;;  %v8706_v44 = vld [vmem:[%s11261_s4 + $0x120] sm:$0xff]   ;;  %v8707_v59 = vld [vmem:[%s11261_s4 + $0x168] sm:$0xff]  }
 0x615   :  { %v3863_v12 = vadd.f32 %v3797_v53, %v3791_v20  ;;  %v3800_v4 = vmax.f32 %v3710_v51, 0.0  ;;  %v7449_v60 = vpop.f32.mrb[160].mxu1 }
 0x616   :  { %v7450_v29 = vpop.f32.mrb[161].mxu1  ;;  %7582 = vmatpush3.bf16.msra.mxu1 %v8702_v22  ;;  %v8709_v22 = vld [vmem:[%s11261_s4 + $0x170] sm:$0xff]  }
 0x617   :  { %v3866_v13 = vadd.f32 %v3800_v4, %v3794_v63  ;;  %v7451_v39 = vadd.f32 %v7450_v29, %v7449_v60  ;;  %v7452_v38 = vpop.f32.mrb[162].mxu1  ;;  %7583 = vmatprep.subr.bf16.mxu1 %v8703_v55  ;;  %v3869_v25 = vmul.f32 0.5, %v3863_v12  ;;  %v8710_v55 = vld [vmem:[%s11261_s4 + $0x130] sm:$0xff]   ;;  %v8711_v60 = vld [vmem:[%s11261_s4 + $0x178] sm:$0xff]  }
 0x618   :  { %v7453_v47 = vpop.f32.mrb[163].mxu1 }
 0x619   :  { %v3872_v37 = vmul.f32 0.5, %v3866_v13  ;;  %v3715_v57 = vadd.f32 %v7451_v39, %v10468_v31  ;;  %v7454_v45 = vadd.f32 %v7453_v47, %v7452_v38  ;;  %v8708_v31 = vld [vmem:[%s11261_s4 + $0x128] sm:$0xff]   ;;  %v8712_v38 = vld [vmem:[%s11261_s4 + $0x138] sm:$0xff]  }
 0x61a   :  { %7584 = vmatpush3.bf16.msra.mxu1 %v8704_v43 }
 0x61b   :  { %v3718_v18 = vadd.f32 %v7454_v45, %v10470_v49  ;;  %v10585_v17 = vpack.c.bf16 %v3872_v37, %v3869_v25  ;;  %7585 = vmatprep.subr.bf16.mxu1 %v8705_v50  ;;  %v3803_v63 = vmax.f32 %v3715_v57, 0.0 }
 0x61d   :  { %v7455_v33 = vpop.f32.mrb[164].mxu1  ;;  %4621 = vmatmul.mubr.bf16.gmra.mrb[212].mxu1 %v10585_v17  ;;  %v3806_v29 = vmax.f32 %v3718_v18, 0.0 }
 0x61e   :  { %v7456_v23 = vpop.f32.mrb[165].mxu1  ;;  %4628 = vmatprep.mubr.bf16.mxu1 %v10216_v42  ;;  %7586 = vmatpush3.bf16.msra.mxu1 %v8706_v44 }
 0x61f   :  { %v7457_v3 = vadd.f32 %v7456_v23, %v7455_v33  ;;  %v7458_v49 = vpop.f32.mrb[166].mxu1  ;;  %7587 = vmatprep.subr.bf16.mxu1 %v8707_v59 }
 0x620   :  { %v7459_v20 = vpop.f32.mrb[167].mxu1 }
 0x621   :  { %v3723_v53 = vadd.f32 %v7457_v3, %v10476_v9  ;;  %v7460_v51 = vadd.f32 %v7459_v20, %v7458_v49 }
 0x622   :  { %7588 = vmatpush3.bf16.msra.mxu1 %v8708_v31 }
 0x623   :  { %v3809_v12 = vmax.f32 %v3723_v53, 0.0  ;;  %v3726_v4 = vadd.f32 %v7460_v51, %v10478_v52  ;;  %7589 = vmatprep.subr.bf16.mxu1 %v8709_v22  ;;  %v8713_v52 = vld [vmem:[%s11261_s4 + $0x200] sm:$0xff]  }
 0x625   :  { %v3875_v43 = vadd.f32 %v3809_v12, %v3803_v63  ;;  %v3812_v13 = vmax.f32 %v3726_v4, 0.0  ;;  %v7461_v39 = vpop.f32.mrb[168].mxu1 }
 0x626   :  { %v7462_v9 = vpop.f32.mrb[169].mxu1  ;;  %7590 = vmatpush3.bf16.msra.mxu1 %v8710_v55 }
 0x627   :  { %v3878_v50 = vadd.f32 %v3812_v13, %v3806_v29  ;;  %v7463_v47 = vadd.f32 %v7462_v9, %v7461_v39  ;;  %v7464_v25 = vpop.f32.mrb[170].mxu1  ;;  %7591 = vmatprep.subr.bf16.mxu1 %v8711_v60  ;;  %v3881_v57 = vmul.f32 0.5, %v3875_v43 }
 0x628   :  { %v7465_v37 = vpop.f32.mrb[171].mxu1 }
 0x629   :  { %v3884_v45 = vmul.f32 0.5, %v3878_v50  ;;  %v3731_v44 = vadd.f32 %v7463_v47, %v10484_v8  ;;  %v7466_v18 = vadd.f32 %v7465_v37, %v7464_v25 }
 0x62a   :  { %7592 = vmatpush3.bf16.msra.mxu1 %v8712_v38 }
 0x62b   :  { %v3734_v59 = vadd.f32 %v7466_v18, %v10486_v58  ;;  %v10614_v33 = vpack.c.bf16 %v3884_v45, %v3881_v57  ;;  %7911 = vmatprep.subr.bf16.mxu1 %v8713_v52  ;;  %v3815_v8 = vmax.f32 %v3731_v44, 0.0 }
 0x62d   :  { %v7467_v23 = vpop.f32.mrb[172].mxu1  ;;  %4629 = vmatmul.mubr.bf16.gmra.mrb[216].mxu1 %v10614_v33  ;;  %v3818_v58 = vmax.f32 %v3734_v59, 0.0 }
 0x62e   :  { %v7468_v31 = vpop.f32.mrb[173].mxu1  ;;  %4636 = vmatprep.mubr.bf16.mxu1 %v10246_v54 }
 0x62f   :  { %v7469_v3 = vadd.f32 %v7468_v31, %v7467_v23  ;;  %v7470_v49 = vpop.f32.mrb[174].mxu1 }
 0x630   :  { %v7471_v22 = vpop.f32.mrb[175].mxu1 }
 0x631   :  { %v3739_v20 = vadd.f32 %v7469_v3, %v10492_v56  ;;  %v7472_v53 = vadd.f32 %v7471_v22, %v7470_v49 }
 0x633   :  { %v3821_v51 = vmax.f32 %v3739_v20, 0.0  ;;  %v3742_v55 = vadd.f32 %v7472_v53, %v10494_v27 }
 0x635   :  { %v3887_v63 = vadd.f32 %v3821_v51, %v3815_v8  ;;  %v3824_v12 = vmax.f32 %v3742_v55, 0.0  ;;  %v7473_v4 = vpop.f32.mrb[176].mxu1 }
 0x636   :  { %v7474_v60 = vpop.f32.mrb[177].mxu1 }
 0x637   :  { %v3890_v29 = vadd.f32 %v3824_v12, %v3818_v58  ;;  %v7475_v43 = vadd.f32 %v7474_v60, %v7473_v4  ;;  %v7476_v13 = vpop.f32.mrb[178].mxu1  ;;  %v3893_v9 = vmul.f32 0.5, %v3887_v63 }
 0x638   :  { %v7477_v39 = vpop.f32.mrb[179].mxu1 }
 0x639   :  { %v3896_v38 = vmul.f32 0.5, %v3890_v29  ;;  %v3747_v50 = vadd.f32 %v7475_v43, %v10500_v7  ;;  %v7478_v47 = vadd.f32 %v7477_v39, %v7476_v13 }
 0x63b   :  { %v3750_v56 = vadd.f32 %v7478_v47, %v10502_v6  ;;  %v10622_v25 = vpack.c.bf16 %v3896_v38, %v3893_v9  ;;  %v3827_v23 = vmax.f32 %v3747_v50, 0.0  ;;  %v8714_v6 = vld [vmem:[%s11261_s4 + $0x208] sm:$0xff]  }
 0x63d   :  { %v7479_v37 = vpop.f32.mrb[180].mxu1  ;;  %4637 = vmatmul.mubr.bf16.gmra.mrb[220].mxu1 %v10622_v25  ;;  %v3830_v3 = vmax.f32 %v3750_v56, 0.0 }
 0x63e   :  { %v7480_v27 = vpop.f32.mrb[181].mxu1  ;;  %4677 = vmatprep.mubr.bf16.mxu1 %v10585_v17 }
 0x63f   :  { %v7481_v57 = vadd.f32 %v7480_v27, %v7479_v37  ;;  %v7482_v45 = vpop.f32.mrb[182].mxu1  ;;  %v8718_v27 = vld [vmem:[%s11261_s4 + $0x228] sm:$0xff]  }
 0x640   :  { %v7483_v44 = vpop.f32.mrb[183].mxu1 }
 0x641   :  { %v3755_v18 = vadd.f32 %v7481_v57, %v10508_v16  ;;  %v7484_v59 = vadd.f32 %v7483_v44, %v7482_v45 }
 0x643   :  { %v3833_v31 = vmax.f32 %v3755_v18, 0.0  ;;  %v3758_v7 = vadd.f32 %v7484_v59, %v10512_v15  ;;  %v8715_v15 = vld [vmem:[%s11261_s4 + $0x210] sm:$0xff]  }
 0x645   :  { %v3899_v49 = vadd.f32 %v3833_v31, %v3827_v23  ;;  %v3836_v22 = vmax.f32 %v3758_v7, 0.0  ;;  %v7485_v20 = vpop.f32.mrb[184].mxu1  ;;  %4678 = vmatmul.mubr.bf16.vlgmr.msra.gmra.mrb[224].mxu1 %v10184_v34 }
 0x646   :  { %v7486_v53 = vpop.f32.mrb[185].mxu1  ;;  %4685 = vmatprep.mubr.bf16.mxu1 %v10614_v33  ;;  %7912 = vmatpush3.bf16.msra.mxu1 %v8713_v52  ;;  %v8716_v52 = vld [vmem:[%s11261_s4 + $0x218] sm:$0xff]  }
 0x647   :  { %v3902_v16 = vadd.f32 %v3836_v22, %v3830_v3  ;;  %v7487_v8 = vadd.f32 %v7486_v53, %v7485_v20  ;;  %v7488_v51 = vpop.f32.mrb[186].mxu1  ;;  %7913 = vmatprep.subr.bf16.mxu1 %v8714_v6  ;;  %v3905_v58 = vmul.f32 0.5, %v3899_v49  ;;  %v8720_v22 = vld [vmem:[%s11261_s4 + $0x238] sm:$0xff]  }
 0x648   :  { %v7489_v55 = vpop.f32.mrb[187].mxu1 }
 0x649   :  { %v3908_v63 = vmul.f32 0.5, %v3902_v16  ;;  %v3763_v12 = vadd.f32 %v7487_v8, %v10520_v1  ;;  %v7490_v4 = vadd.f32 %v7489_v55, %v7488_v51 }
 0x64a   :  { %7914 = vmatpush3.bf16.msra.mxu1 %v8714_v6 }
 0x64b   :  { %v3766_v60 = vadd.f32 %v7490_v4, %v10522_v11  ;;  %7915 = vmatprep.subr.bf16.mxu1 %v8715_v15  ;;  %v10641_v29 = vpack.c.bf16 %v3908_v63, %v3905_v58  ;;  %v8717_v11 = vld [vmem:[%s11261_s4 + $0x220] sm:$0xff]   ;;  %v3839_v47 = vmax.f32 %v3763_v12, 0.0 }
 0x64d   :  { %v7491_v43 = vpop.f32.mrb[188].mxu1  ;;  %4686 = vmatmul.mubr.bf16.gmra.mrb[228].mxu1 %v10200_v40  ;;  %v3842_v57 = vmax.f32 %v3766_v60, 0.0 }
 0x64e   :  { %v7492_v13 = vpop.f32.mrb[189].mxu1  ;;  %4693 = vmatprep.mubr.bf16.mxu1 %v10622_v25  ;;  %7916 = vmatpush3.bf16.msra.mxu1 %v8715_v15 }
 0x64f   :  { %v7493_v39 = vadd.f32 %v7492_v13, %v7491_v43  ;;  %v7494_v1 = vpop.f32.mrb[190].mxu1  ;;  %7917 = vmatprep.subr.bf16.mxu1 %v8716_v52 }
 0x650   :  { %v7495_v9 = vpop.f32.mrb[191].mxu1 }
 0x651   :  { %v3771_v38 = vadd.f32 %v7493_v39, %v10528_v10  ;;  %v7496_v50 = vadd.f32 %v7495_v9, %v7494_v1 }
 0x652   :  { %7918 = vmatpush3.bf16.msra.mxu1 %v8716_v52 }
 0x653   :  { %v3845_v56 = vmax.f32 %v3771_v38, 0.0  ;;  %v3774_v37 = vadd.f32 %v7496_v50, %v10532_v14  ;;  %7919 = vmatprep.subr.bf16.mxu1 %v8717_v11  ;;  %v8719_v14 = vld [vmem:[%s11261_s4 + $0x230] sm:$0xff]   ;;  %v8721_v38 = vld [vmem:[%s11263_s5 + $0x40] sm:$0xff]  }
 0x654   :  { %v8722_v50 = vld [vmem:[%s11263_s5] sm:$0xff]   ;;  %7669 = vmatprep.subr.bf16.mxu0 %v8721_v38  ;;  %v8751_v38 = vld [vmem:[%s11263_s5 + $0xb0] sm:$0xff]  }
 0x655   :  { %v3911_v45 = vadd.f32 %v3845_v56, %v3839_v47  ;;  %v3848_v44 = vmax.f32 %v3774_v37, 0.0  ;;  %v7513_v18 = vpop.f32.mrb[192].mxu1  ;;  %4694 = vmatmul.mubr.bf16.gmra.mrb[232].mxu1 %v10218_v46  ;;  %7670 = vmatpush3.bf16.msra.mxu0 %v8722_v50  ;;  %v8723_v47 = vld [vmem:[%s11263_s5 + $0x48] sm:$0xff]   ;;  %v8725_v37 = vld [vmem:[%s11263_s5 + $0x50] sm:$0xff]   ;;  %v8753_v50 = vld [vmem:[%s11263_s5 + $0xf8] sm:$0xff]  }
 0x656   :  { %v7514_v59 = vpop.f32.mrb[193].mxu1  ;;  %4701 = vmatprep.mubr.bf16.mxu1 %v10641_v29  ;;  %7920 = vmatpush3.bf16.msra.mxu1 %v8717_v11  ;;  %v8724_v56 = vld [vmem:[%s11263_s5 + $0x8] sm:$0xff]  }
 0x657   :  { %v3914_v10 = vadd.f32 %v3848_v44, %v3842_v57  ;;  %v10655_v23 = vadd.f32 %v7514_v59, %v7513_v18  ;;  %v7516_v31 = vpop.f32.mrb[194].mxu1  ;;  %7921 = vmatprep.subr.bf16.mxu1 %v8718_v27  ;;  %v3917_v6 = vmul.f32 0.5, %v3911_v45  ;;  %7671 = vmatprep.subr.bf16.mxu0 %v8723_v47  ;;  %v8727_v57 = vld [vmem:[%s11263_s5 + $0x10] sm:$0xff]   ;;  %v8728_v45 = vld [vmem:[%s11263_s5 + $0x80] sm:$0xff]   ;;  %v8729_v44 = vld [vmem:[%s11263_s5 + $0x58] sm:$0xff]  }
 0x658   :  { %v7517_v7 = vpop.f32.mrb[195].mxu1  ;;  %v8730_v18 = vld [vmem:[%s11263_s5 + $0xc8] sm:$0xff]   ;;  %v8731_v59 = vld [vmem:[%s11263_s5 + $0x18] sm:$0xff]  }
 0x659   :  { %v3920_v3 = vmul.f32 0.5, %v3914_v10  ;;  %v10660_v49 = vadd.f32 %v7517_v7, %v7516_v31  ;;  %7672 = vmatpush3.bf16.msra.mxu0 %v8724_v56  ;;  %v8732_v10 = vld [vmem:[%s11263_s5 + $0x88] sm:$0xff]   ;;  %v8733_v31 = vld [vmem:[%s11263_s5 + $0x60] sm:$0xff]   ;;  %v8755_v47 = vld [vmem:[%s11263_s5 + $0xb8] sm:$0xff]  }
 0x65a   :  { %7922 = vmatpush3.bf16.msra.mxu1 %v8718_v27  ;;  %v8726_v27 = vld [vmem:[%s11263_s5 + $0xc0] sm:$0xff]   ;;  %7673 = vmatprep.subr.bf16.mxu0 %v8725_v37 }
 0x65b   :  { %7923 = vmatprep.subr.bf16.mxu1 %v8719_v14  ;;  %v10665_v20 = vpack.c.bf16 %v3920_v3, %v3917_v6  ;;  %v8735_v7 = vld [vmem:[%s11263_s5 + $0x20] sm:$0xff]   ;;  %v8736_v6 = vld [vmem:[%s11263_s5 + $0x90] sm:$0xff]   ;;  %v8737_v3 = vld [vmem:[%s11263_s5 + $0x68] sm:$0xff]  }
 0x65c   :  { %v8758_v56 = vld [vmem:[%s11264_s6 + $0xc0] sm:$0xff]  }
 0x65d   :  { %v7519_v53 = vpop.f32.mrb[196].mxu1  ;;  %4702 = vmatmul.mubr.bf16.gmra.mrb[236].mxu1 %v10251_v62  ;;  %7674 = vmatpush3.bf16.msra.mxu0 %v8727_v57 }
 0x65e   :  { %v7520_v16 = vpop.f32.mrb[197].mxu1  ;;  %7924 = vmatpush3.bf16.msra.mxu1 %v8719_v14  ;;  %7927 = vmatprep.mubr.bf16.mxu1 %v10614_v33  ;;  %v8734_v14 = vld [vmem:[%s11263_s5 + $0xd0] sm:$0xff]  }
 0x65f   :  { %v10669_v8 = vadd.f32 %v7520_v16, %v7519_v53  ;;  %v7522_v51 = vpop.f32.mrb[198].mxu1  ;;  %7925 = vmatprep.subr.bf16.mxu1 %v8720_v22  ;;  %7675 = vmatprep.subr.bf16.mxu0 %v8729_v44  ;;  %v8739_v53 = vld [vmem:[%s11263_s5 + $0x28] sm:$0xff]   ;;  %v8740_v16 = vld [vmem:[%s11263_s5 + $0x98] sm:$0xff]  }
 0x660   :  { %v7523_v15 = vpop.f32.mrb[199].mxu1 }
 0x661   :  { %v10671_v55 = vadd.f32 %v7523_v15, %v7522_v51  ;;  %7676 = vmatpush3.bf16.msra.mxu0 %v8731_v59  ;;  %v8741_v51 = vld [vmem:[%s11263_s5 + $0x70] sm:$0xff]   ;;  %v8742_v15 = vld [vmem:[%s11263_s5 + $0xe0] sm:$0xff]  }
 0x662   :  { %7926 = vmatpush3.bf16.msra.mxu1 %v8720_v22  ;;  %7677 = vmatprep.subr.bf16.mxu0 %v8733_v31  ;;  %v8738_v22 = vld [vmem:[%s11263_s5 + $0xd8] sm:$0xff]  }
 0x663   :  { %7691 = vmatprep.subr.bf16.mxu1 %v8726_v27 }
 0x665   :  { %v7525_v58 = vpop.f32.mrb[200].mxu1  ;;  %7928 = vmatmul.mubr.bf16.vlgmr.msra.gmra.mrb[240].mxu1 %v10622_v25  ;;  %7678 = vmatpush3.bf16.msra.mxu0 %v8735_v7 }
 0x666   :  { %v7526_v63 = vpop.f32.mrb[201].mxu1  ;;  %7931 = vmatprep.mubr.bf16.mxu1 %v10641_v29  ;;  %7692 = vmatpush3.bf16.msra.mxu1 %v8728_v45 }
 0x667   :  { %v10675_v12 = vadd.f32 %v7526_v63, %v7525_v58  ;;  %v7528_v4 = vpop.f32.mrb[202].mxu1  ;;  %7693 = vmatprep.subr.bf16.mxu1 %v8730_v18  ;;  %7679 = vmatprep.subr.bf16.mxu0 %v8737_v3  ;;  %v8743_v58 = vld [vmem:[%s11263_s5 + $0x30] sm:$0xff]   ;;  %v8744_v63 = vld [vmem:[%s11263_s5 + $0xa0] sm:$0xff]  }
 0x668   :  { %v7529_v60 = vpop.f32.mrb[203].mxu1 }
 0x669   :  { %v10677_v52 = vadd.f32 %v7529_v60, %v7528_v4  ;;  %7680 = vmatpush3.bf16.msra.mxu0 %v8739_v53  ;;  %v8745_v4 = vld [vmem:[%s11263_s5 + $0x78] sm:$0xff]   ;;  %v8746_v60 = vld [vmem:[%s11263_s5 + $0xe8] sm:$0xff]  }
 0x66a   :  { %7694 = vmatpush3.bf16.msra.mxu1 %v8732_v10  ;;  %7681 = vmatprep.subr.bf16.mxu0 %v8741_v51 }
 0x66b   :  { %7695 = vmatprep.subr.bf16.mxu1 %v8734_v14 }
 0x66d   :  { %v7531_v43 = vpop.f32.mrb[204].mxu1  ;;  %7932 = vmatmul.mubr.bf16.gmra.mrb[244].mxu1 %v10665_v20  ;;  %7682 = vmatpush3.bf16.msra.mxu0 %v8743_v58 }
 0x66e   :  { %v7532_v13 = vpop.f32.mrb[205].mxu1  ;;  %7696 = vmatpush3.bf16.msra.mxu1 %v8736_v6  ;;  %7683 = vmatprep.subr.bf16.mxu0 %v8745_v4 }
 0x66f   :  { %v10680_v39 = vadd.f32 %v7532_v13, %v7531_v43  ;;  %v7534_v1 = vpop.f32.mrb[206].mxu1  ;;  %7697 = vmatprep.subr.bf16.mxu1 %v8738_v22  ;;  %v8747_v43 = vld [vmem:[%s11263_s5 + $0x38] sm:$0xff]   ;;  %v8748_v13 = vld [vmem:[%s11263_s5 + $0xa8] sm:$0xff]  }
 0x670   :  { %v7535_v11 = vpop.f32.mrb[207].mxu1 }
 0x671   :  { %v10682_v9 = vadd.f32 %v7535_v11, %v7534_v1  ;;  %7684 = vmatpush3.bf16.msra.mxu0 %v8747_v43  ;;  %v8749_v1 = vld [vmem:[%s11263_s5 + $0xf0] sm:$0xff]   ;;  %v8750_v11 = vld [vmem:[%s11264_s6 + $0x40] sm:$0xff]  }
 0x672   :  { %7698 = vmatpush3.bf16.msra.mxu1 %v8740_v16  ;;  %7713 = vmatprep.subr.bf16.mxu0 %v8750_v11 }
 0x673   :  { %7699 = vmatprep.subr.bf16.mxu1 %v8742_v15 }
 0x676   :  { %7700 = vmatpush3.bf16.msra.mxu1 %v8744_v63 }
 0x677   :  { %7701 = vmatprep.subr.bf16.mxu1 %v8746_v60 }
 0x67a   :  { %7702 = vmatpush3.bf16.msra.mxu1 %v8748_v13 }
 0x67b   :  { %7703 = vmatprep.subr.bf16.mxu1 %v8749_v1 }
 0x67e   :  { %7704 = vmatpush3.bf16.msra.mxu1 %v8751_v38 }
 0x67f   :  { %7705 = vmatprep.subr.bf16.mxu1 %v8753_v50 }
 0x682   :  { %7706 = vmatpush3.bf16.msra.mxu1 %v8755_v47 }
 0x683   :  { %7735 = vmatprep.subr.bf16.mxu1 %v8758_v56 }
 0x6e0   :  { %v7553_v37 = vpop.f32.mrb[208].mxu1 }
 0x6e1   :  { %v7554_v27 = vpop.f32.mrb[209].mxu1 }
 0x6e2   :  { %v7555_v57 = vadd.f32 %v7554_v27, %v7553_v37  ;;  %v7556_v45 = vpop.f32.mrb[210].mxu1 }
 0x6e3   :  { %v7557_v44 = vpop.f32.mrb[211].mxu1 }
 0x6e4   :  { %v4615_v18 = vadd.f32 %v7555_v57, %v10655_v23  ;;  %v7558_v59 = vadd.f32 %v7557_v44, %v7556_v45 }
 0x6e6   :  { %v4618_v10 = vadd.f32 %v7558_v59, %v10660_v49 }
 0x6f0   :  { %v7559_v31 = vpop.f32.mrb[212].mxu1 }
 0x6f1   :  { %v7560_v14 = vpop.f32.mrb[213].mxu1 }
 0x6f2   :  { %v7561_v7 = vadd.f32 %v7560_v14, %v7559_v31  ;;  %v7562_v6 = vpop.f32.mrb[214].mxu1 }
 0x6f3   :  { %v7563_v3 = vpop.f32.mrb[215].mxu1 }
 0x6f4   :  { %v4623_v22 = vadd.f32 %v7561_v7, %v10669_v8  ;;  %v7564_v53 = vadd.f32 %v7563_v3, %v7562_v6 }
 0x6f6   :  { %v4626_v16 = vadd.f32 %v7564_v53, %v10671_v55 }
 0x700   :  { %v7565_v51 = vpop.f32.mrb[216].mxu1 }
 0x701   :  { %v7566_v15 = vpop.f32.mrb[217].mxu1 }
 0x702   :  { %v7567_v58 = vadd.f32 %v7566_v15, %v7565_v51  ;;  %v7568_v63 = vpop.f32.mrb[218].mxu1 }
 0x703   :  { %v7569_v4 = vpop.f32.mrb[219].mxu1 }
 0x704   :  { %v4631_v23 = vadd.f32 %v7567_v58, %v10675_v12  ;;  %v7570_v60 = vadd.f32 %v7569_v4, %v7568_v63 }
 0x706   :  { %v4634_v49 = vadd.f32 %v7570_v60, %v10677_v52 }
 0x710   :  { %v7571_v43 = vpop.f32.mrb[220].mxu1 }
 0x711   :  { %v7572_v13 = vpop.f32.mrb[221].mxu1 }
 0x712   :  { %v7573_v1 = vadd.f32 %v7572_v13, %v7571_v43  ;;  %v7574_v11 = vpop.f32.mrb[222].mxu1 }
 0x713   :  { %v7575_v38 = vpop.f32.mrb[223].mxu1 }
 0x714   :  { %v4639_v8 = vadd.f32 %v7573_v1, %v10680_v39  ;;  %v7576_v50 = vadd.f32 %v7575_v38, %v7574_v11 }
 0x716   :  { %v4642_v55 = vadd.f32 %v7576_v50, %v10682_v9 }
 0x718   :  { %v7593_v47 = vpop.f32.mrb[224].mxu1 }
 0x719   :  { %v7594_v56 = vpop.f32.mrb[225].mxu1 }
 0x71a   :  { %v7595_v37 = vadd.f32 %v7594_v56, %v7593_v47  ;;  %v7596_v27 = vpop.f32.mrb[226].mxu1 }
 0x71b   :  { %v7597_v57 = vpop.f32.mrb[227].mxu1 }
 0x71c   :  { %v4680_v45 = vadd.f32 %v7595_v37, %v4615_v18  ;;  %v7598_v12 = vadd.f32 %v7597_v57, %v7596_v27 }
 0x71e   :  { %v4683_v44 = vadd.f32 %v7598_v12, %v4618_v10  ;;  %v4745_v52 = vadd.f32 %v10510_v26, %v4680_v45 }
 0x720   :  { %v7599_v59 = vpop.f32.mrb[228].mxu1  ;;  %v4748_v31 = vadd.f32 %v10514_v61, %v4683_v44 }
 0x721   :  { %v7600_v14 = vpop.f32.mrb[229].mxu1 }
 0x722   :  { %v7601_v7 = vadd.f32 %v7600_v14, %v7599_v59  ;;  %v7602_v6 = vpop.f32.mrb[230].mxu1 }
 0x723   :  { %v7603_v39 = vpop.f32.mrb[231].mxu1 }
 0x724   :  { %v4688_v3 = vadd.f32 %v7601_v7, %v4623_v22  ;;  %v7604_v53 = vadd.f32 %v7603_v39, %v7602_v6 }
 0x726   :  { %v4691_v9 = vadd.f32 %v7604_v53, %v4626_v16  ;;  %v4753_v51 = vadd.f32 %v10530_v19, %v4688_v3 }
 0x728   :  { %v7605_v15 = vpop.f32.mrb[232].mxu1  ;;  %v4756_v58 = vadd.f32 %v10534_v36, %v4691_v9  ;;  %v8756_v9 = vld [vmem:[%s11264_s6 + $0x8] sm:$0xff]  }
 0x729   :  { %v7606_v18 = vpop.f32.mrb[233].mxu1 }
 0x72a   :  { %v7607_v63 = vadd.f32 %v7606_v18, %v7605_v15  ;;  %v7608_v10 = vpop.f32.mrb[234].mxu1  ;;  %v8757_v15 = vld [vmem:[%s11264_s6 + $0x50] sm:$0xff]  }
 0x72b   :  { %v7609_v4 = vpop.f32.mrb[235].mxu1 }
 0x72c   :  { %v4696_v26 = vadd.f32 %v7607_v63, %v4631_v23  ;;  %v7610_v60 = vadd.f32 %v7609_v4, %v7608_v10  ;;  %v8759_v63 = vld [vmem:[%s11264_s6 + $0x10] sm:$0xff]  }
 0x72e   :  { %v4699_v43 = vadd.f32 %v7610_v60, %v4634_v49  ;;  %v4761_v61 = vadd.f32 %v10539_v24, %v4696_v26  ;;  %v8761_v26 = vld [vmem:[%s11264_s6 + $0x58] sm:$0xff]  }
 0x730   :  { %v7611_v13 = vpop.f32.mrb[236].mxu1  ;;  %v4764_v1 = vadd.f32 %v10542_v41, %v4699_v43  ;;  %v8762_v43 = vld [vmem:[%s11264_s6 + $0xc8] sm:$0xff]  }
 0x731   :  { %v7612_v22 = vpop.f32.mrb[237].mxu1 }
 0x732   :  { %v7613_v11 = vadd.f32 %v7612_v22, %v7611_v13  ;;  %v7614_v16 = vpop.f32.mrb[238].mxu1  ;;  %v8763_v13 = vld [vmem:[%s11264_s6 + $0x18] sm:$0xff]   ;;  %v8765_v22 = vld [vmem:[%s11264_s6 + $0x60] sm:$0xff]  }
 0x733   :  { %v7615_v38 = vpop.f32.mrb[239].mxu1 }
 0x734   :  { %v4704_v19 = vadd.f32 %v7613_v11, %v4639_v8  ;;  %v7616_v50 = vadd.f32 %v7615_v38, %v7614_v16  ;;  %v8752_v8 = vld [vmem:[%s11264_s6] sm:$0xff]   ;;  %v8766_v11 = vld [vmem:[%s11264_s6 + $0xd0] sm:$0xff]  }
 0x735   :  { %v8767_v16 = vld [vmem:[%s11264_s6 + $0x20] sm:$0xff]   ;;  %v8768_v38 = vld [vmem:[%s11264_s6 + $0x90] sm:$0xff]  }
 0x736   :  { %v4707_v47 = vadd.f32 %v7616_v50, %v4642_v55  ;;  %v4769_v36 = vadd.f32 %v10563_v2, %v4704_v19  ;;  %v8770_v19 = vld [vmem:[%s11264_s6 + $0xd8] sm:$0xff]   ;;  %v8771_v50 = vld [vmem:[%s11264_s6 + $0x28] sm:$0xff]  }
 0x738   :  { %v7929_v56 = vpop.f32.mrb[240].mxu1  ;;  %v4772_v37 = vadd.f32 %v10569_v0, %v4707_v47  ;;  %v8754_v0 = vld [vmem:[%s11264_s6 + $0x48] sm:$0xff]   ;;  %v8772_v47 = vld [vmem:[%s11264_s6 + $0x98] sm:$0xff]  }
 0x739   :  { %v4818_v23 = vadd.f32 %v7929_v56, %v4753_v51  ;;  %v4809_v27 = vpop.f32.mrb[241].mxu1  ;;  %v8774_v56 = vld [vmem:[%s11264_s6 + $0xe0] sm:$0xff]  }
 0x73a   :  { %v4810_v49 = vadd.f32 %v4809_v27, %v4745_v52  ;;  %v7930_v57 = vpop.f32.mrb[242].mxu1  ;;  %v8777_v27 = vld [vmem:[%s11264_s6 + $0x78] sm:$0xff]  }
 0x73b   :  { %v4821_v24 = vadd.f32 %v7930_v57, %v4756_v58  ;;  %v4812_v45 = vpop.f32.mrb[243].mxu1  ;;  %v4842_v41 = vmax.f32 %v4818_v23, 0.0  ;;  %v8776_v23 = vld [vmem:[%s11264_s6 + $0xa0] sm:$0xff]   ;;  %v8779_v57 = vld [vmem:[%s11264_s6 + $0x38] sm:$0xff]  }
 0x73c   :  { %v4813_v12 = vadd.f32 %v4812_v45, %v4748_v31  ;;  %v4840_v59 = vmax.f32 %v4810_v49, 0.0  ;;  %v8778_v49 = vld [vmem:[%s11264_s6 + $0xe8] sm:$0xff]   ;;  %v8781_v45 = vld [vmem:[%s11264_s6 + $0xf0] sm:$0xff]  }
 0x73d   :  { %v4843_v44 = vmax.f32 %v4821_v24, 0.0  ;;  %v8780_v24 = vld [vmem:[%s11264_s6 + $0xa8] sm:$0xff]  }
 0x73e   :  { %v4841_v55 = vmax.f32 %v4813_v12, 0.0  ;;  %v8782_v12 = vld [vmem:[%s11264_s6 + $0x140] sm:$0xff]  }
 0x73f   :  { %v4849_v14 = vpack.c.bf16 %v4843_v44, %v4842_v41  ;;  %v8783_v41 = vld [vmem:[%s11264_s6 + $0xb0] sm:$0xff]   ;;  %v8784_v44 = vld [vmem:[%s11264_s6 + $0x100] sm:$0xff]  }
 0x740   :  { %v4848_v2 = vpack.c.bf16 %v4841_v55, %v4840_v59  ;;  %v7933_v7 = vpop.f32.mrb[244].mxu1  ;;  %v8786_v59 = vld [vmem:[%s11264_s6 + $0x148] sm:$0xff]   ;;  %v8787_v55 = vld [vmem:[%s11264_s6 + $0xb8] sm:$0xff]  }
 0x741   :  { %v4834_v52 = vadd.f32 %v7933_v7, %v4769_v36  ;;  %v4825_v6 = vpop.f32.mrb[245].mxu1  ;;  %5140 = vmatprep.mubr.bf16.mxu0 %v4849_v14  ;;  %v8773_v36 = vld [vmem:[%s11264_s6 + $0x70] sm:$0xff]   ;;  %v8788_v14 = vld [vmem:[%s11264_s6 + $0x108] sm:$0xff]  }
 0x742   :  { %v4826_v39 = vadd.f32 %v4825_v6, %v4761_v61  ;;  %v7934_v31 = vpop.f32.mrb[246].mxu1  ;;  %5141 = vmatmul.mubr.bf16.vlgmr.msra.gmra.mrb[128].mxu0 %v4848_v2  ;;  %v8789_v2 = vld [vmem:[%s11264_s6 + $0x150] sm:$0xff]   ;;  %v8795_v6 = vld [vmem:[%s11264_s6 + $0x118] sm:$0xff]  }
 0x743   :  { %v4837_v3 = vadd.f32 %v7934_v31, %v4772_v37  ;;  %7714 = vmatpush3.bf16.msra.mxu0 %v8752_v8  ;;  %v4828_v53 = vpop.f32.mrb[247].mxu1  ;;  %6374 = vmatprep.mubr.bf16.mxu0 %v10168_v35  ;;  %v4846_v58 = vmax.f32 %v4834_v52, 0.0  ;;  %v8760_v35 = vld [vmem:[%s11264_s6 + $0x80] sm:$0xff]   ;;  %v8775_v37 = vld [vmem:[%s11264_s6 + $0x30] sm:$0xff]   ;;  %v8785_v8 = vld [vmem:[%s11264_s6 + $0xf8] sm:$0xff]  }
 0x744   :  { %v4829_v51 = vadd.f32 %v4828_v53, %v4764_v1  ;;  %7715 = vmatprep.subr.bf16.mxu0 %v8754_v0  ;;  %v4844_v10 = vmax.f32 %v4826_v39, 0.0  ;;  %v8764_v1 = vld [vmem:[%s11264_s6 + $0x88] sm:$0xff]   ;;  %v8791_v7 = vld [vmem:[%s11264_s6 + $0x110] sm:$0xff]   ;;  %v8793_v0 = vld [vmem:[%s11264_s6 + $0x158] sm:$0xff]  }
 0x745   :  { %v4847_v18 = vmax.f32 %v4837_v3, 0.0  ;;  %v8794_v52 = vld [vmem:[%s11264_s6 + $0x1c8] sm:$0xff]   ;;  %v8797_v31 = vld [vmem:[%s11264_s6 + $0x160] sm:$0xff]  }
 0x746   :  { %v4845_v4 = vmax.f32 %v4829_v51, 0.0  ;;  %v8796_v39 = vld [vmem:[%s11264_s6 + $0x188] sm:$0xff]   ;;  %v8799_v3 = vld [vmem:[%s11264_s6 + $0x120] sm:$0xff]  }
 0x747   :  { %v4851_v60 = vpack.c.bf16 %v4847_v18, %v4846_v58  ;;  %7716 = vmatpush3.bf16.msra.mxu0 %v8756_v9  ;;  %v8801_v53 = vld [vmem:[%s11264_s6 + $0x168] sm:$0xff]   ;;  %v8802_v9 = vld [vmem:[%s11264_s6 + $0x1d8] sm:$0xff]   ;;  %v8805_v58 = vld [vmem:[%s11264_s6 + $0x170] sm:$0xff]  }
 0x748   :  { %v4850_v61 = vpack.c.bf16 %v4845_v4, %v4844_v10  ;;  %7717 = vmatprep.subr.bf16.mxu0 %v8757_v15  ;;  %v8803_v51 = vld [vmem:[%s11264_s6 + $0x128] sm:$0xff]   ;;  %v8804_v15 = vld [vmem:[%s11264_s6 + $0x198] sm:$0xff]   ;;  %v8806_v18 = vld [vmem:[%s11264_s6 + $0x1e0] sm:$0xff]  }
 0x749   :  { %5181 = vmatprep.mubr.bf16.mxu1 %v4851_v60  ;;  %v8809_v10 = vld [vmem:[%s11264_s6 + $0x178] sm:$0xff]   ;;  %v8810_v4 = vld [vmem:[%s11264_s6 + $0x1e8] sm:$0xff]  }
 0x74a   :  { %5182 = vmatmul.mubr.bf16.vlgmr.msra.gmra.mrb[248].mxu1 %v4850_v61  ;;  %v8812_v60 = vld [vmem:[%s11264_s6 + $0x1a8] sm:$0xff]   ;;  %v8814_v61 = vld [vmem:[%s11264_s6 + $0x240] sm:$0xff]  }
 0x74b   :  { %7718 = vmatpush3.bf16.msra.mxu0 %v8759_v63  ;;  %7736 = vmatpush3.bf16.msra.mxu1 %v8760_v35  ;;  %v8807_v63 = vld [vmem:[%s11264_s6 + $0x130] sm:$0xff]   ;;  %v8808_v35 = vld [vmem:[%s11264_s6 + $0x1a0] sm:$0xff]  }
 0x74c   :  { %6415 = vmatprep.mubr.bf16.mxu1 %v10182_v30  ;;  %7719 = vmatprep.subr.bf16.mxu0 %v8761_v26  ;;  %v8769_v30 = vld [vmem:[%s11264_s6 + $0x68] sm:$0xff]   ;;  %v8811_v26 = vld [vmem:[%s11264_s6 + $0x138] sm:$0xff]  }
 0x74d   :  { %7737 = vmatprep.subr.bf16.mxu1 %v8762_v43  ;;  %v8813_v43 = vld [vmem:[%s11264_s6 + $0x1f0] sm:$0xff]  }
 0x74f   :  { %7720 = vmatpush3.bf16.msra.mxu0 %v8763_v13  ;;  %7738 = vmatpush3.bf16.msra.mxu1 %v8764_v1  ;;  %v8815_v13 = vld [vmem:[%s11264_s6 + $0x1b0] sm:$0xff]   ;;  %v8816_v1 = vld [vmem:[%s11264_s6 + $0x200] sm:$0xff]  }
 0x750   :  { %7721 = vmatprep.subr.bf16.mxu0 %v8765_v22  ;;  %7739 = vmatprep.subr.bf16.mxu1 %v8766_v11  ;;  %v8817_v22 = vld [vmem:[%s11264_s6 + $0x1f8] sm:$0xff]   ;;  %v8818_v11 = vld [vmem:[%s11264_s6 + $0x248] sm:$0xff]  }
 0x753   :  { %7722 = vmatpush3.bf16.msra.mxu0 %v8767_v16  ;;  %7740 = vmatpush3.bf16.msra.mxu1 %v8768_v38  ;;  %v8819_v16 = vld [vmem:[%s11264_s6 + $0x1b8] sm:$0xff]   ;;  %v8820_v38 = vld [vmem:[%s11264_s6 + $0x208] sm:$0xff]  }
 0x754   :  { %7723 = vmatprep.subr.bf16.mxu0 %v8769_v30  ;;  %7741 = vmatprep.subr.bf16.mxu1 %v8770_v19  ;;  %v8821_v30 = vld [vmem:[%s11264_s6 + $0x250] sm:$0xff]  }
 0x755   :  { %v8823_v19 = vld [vmem:[%s11264_s6 + $0x210] sm:$0xff]  }
 0x757   :  { %7724 = vmatpush3.bf16.msra.mxu0 %v8771_v50  ;;  %7742 = vmatpush3.bf16.msra.mxu1 %v8772_v47  ;;  %v8825_v50 = vld [vmem:[%s11264_s6 + $0x258] sm:$0xff]   ;;  %v8826_v47 = vld [vmem:[%s11264_s6 + $0x2c8] sm:$0xff]  }
 0x758   :  { %7725 = vmatprep.subr.bf16.mxu0 %v8773_v36  ;;  %7743 = vmatprep.subr.bf16.mxu1 %v8774_v56  ;;  %v8827_v36 = vld [vmem:[%s11264_s6 + $0x218] sm:$0xff]   ;;  %v8828_v56 = vld [vmem:[%s11264_s6 + $0x288] sm:$0xff]  }
 0x75b   :  { %7726 = vmatpush3.bf16.msra.mxu0 %v8775_v37  ;;  %7744 = vmatpush3.bf16.msra.mxu1 %v8776_v23  ;;  %v8829_v37 = vld [vmem:[%s11264_s6 + $0x260] sm:$0xff]  }
 0x75c   :  { %7727 = vmatprep.subr.bf16.mxu0 %v8777_v27  ;;  %7745 = vmatprep.subr.bf16.mxu1 %v8778_v49  ;;  %v8831_v23 = vld [vmem:[%s11264_s6 + $0x220] sm:$0xff]   ;;  %v8833_v27 = vld [vmem:[%s11264_s6 + $0x268] sm:$0xff]   ;;  %v8834_v49 = vld [vmem:[%s11264_s6 + $0x2d8] sm:$0xff]  }
 0x75f   :  { %7728 = vmatpush3.bf16.msra.mxu0 %v8779_v57  ;;  %7746 = vmatpush3.bf16.msra.mxu1 %v8780_v24  ;;  %v8835_v57 = vld [vmem:[%s11264_s6 + $0x228] sm:$0xff]   ;;  %v8836_v24 = vld [vmem:[%s11264_s6 + $0x298] sm:$0xff]  }
 0x760   :  { %7747 = vmatprep.subr.bf16.mxu1 %v8781_v45  ;;  %7757 = vmatprep.subr.bf16.mxu0 %v8782_v12  ;;  %v8837_v45 = vld [vmem:[%s11264_s6 + $0x270] sm:$0xff]   ;;  %v8838_v12 = vld [vmem:[%s11264_s6 + $0x2e0] sm:$0xff]  }
 0x762   :  { %6375 = vmatmul.mubr.bf16.vlgmr.msra.gmra.mrb[132].mxu0 %v10166_v32  ;;  %v8790_v32 = vld [vmem:[%s11264_s6 + $0x1c0] sm:$0xff]  }
 0x763   :  { %7748 = vmatpush3.bf16.msra.mxu1 %v8783_v41  ;;  %7758 = vmatpush3.bf16.msra.mxu0 %v8784_v44  ;;  %v8839_v41 = vld [vmem:[%s11264_s6 + $0x230] sm:$0xff]   ;;  %v8840_v44 = vld [vmem:[%s11264_s6 + $0x2a0] sm:$0xff]  }
 0x764   :  { %6456 = vmatprep.mubr.bf16.mxu0 %v10585_v17  ;;  %7749 = vmatprep.subr.bf16.mxu1 %v8785_v8  ;;  %v8792_v17 = vld [vmem:[%s11264_s6 + $0x180] sm:$0xff]   ;;  %v8841_v8 = vld [vmem:[%s11264_s6 + $0x278] sm:$0xff]  }
 0x765   :  { %7759 = vmatprep.subr.bf16.mxu0 %v8786_v59  ;;  %v8842_v59 = vld [vmem:[%s11264_s6 + $0x2e8] sm:$0xff]  }
 0x767   :  { %7750 = vmatpush3.bf16.msra.mxu1 %v8787_v55  ;;  %7760 = vmatpush3.bf16.msra.mxu0 %v8788_v14  ;;  %v8843_v55 = vld [vmem:[%s11264_s6 + $0x238] sm:$0xff]   ;;  %v8844_v14 = vld [vmem:[%s11264_s6 + $0x2a8] sm:$0xff]  }
 0x768   :  { %7761 = vmatprep.subr.bf16.mxu0 %v8789_v2  ;;  %7779 = vmatprep.subr.bf16.mxu1 %v8790_v32  ;;  %v8845_v2 = vld [vmem:[%s11264_s6 + $0x2f0] sm:$0xff]   ;;  %v8846_v32 = vld [vmem:[%s11264_s6 + $0x340] sm:$0xff]  }
 0x76a   :  { %6416 = vmatmul.mubr.bf16.vlgmr.msra.gmra.mrb[252].mxu1 %v10548_v48  ;;  %v8798_v48 = vld [vmem:[%s11264_s6 + $0x1d0] sm:$0xff]  }
 0x76b   :  { %7762 = vmatpush3.bf16.msra.mxu0 %v8791_v7  ;;  %7780 = vmatpush3.bf16.msra.mxu1 %v8792_v17  ;;  %v8847_v7 = vld [vmem:[%s11264_s6 + $0x2b0] sm:$0xff]   ;;  %v8848_v17 = vld [vmem:[%s11264_s6 + $0x300] sm:$0xff]  }
 0x76c   :  { %6497 = vmatprep.mubr.bf16.mxu1 %v10200_v40  ;;  %7763 = vmatprep.subr.bf16.mxu0 %v8793_v0  ;;  %v8800_v40 = vld [vmem:[%s11264_s6 + $0x190] sm:$0xff]   ;;  %v8849_v0 = vld [vmem:[%s11264_s6 + $0x2f8] sm:$0xff]  }
 0x76d   :  { %7781 = vmatprep.subr.bf16.mxu1 %v8794_v52  ;;  %v8850_v52 = vld [vmem:[%s11264_s6 + $0x348] sm:$0xff]  }
 0x76f   :  { %7764 = vmatpush3.bf16.msra.mxu0 %v8795_v6  ;;  %7782 = vmatpush3.bf16.msra.mxu1 %v8796_v39  ;;  %v8851_v6 = vld [vmem:[%s11264_s6 + $0x2b8] sm:$0xff]   ;;  %v8852_v39 = vld [vmem:[%s11264_s6 + $0x308] sm:$0xff]  }
 0x770   :  { %7765 = vmatprep.subr.bf16.mxu0 %v8797_v31  ;;  %7783 = vmatprep.subr.bf16.mxu1 %v8798_v48  ;;  %v8853_v31 = vld [vmem:[%s11264_s6 + $0x350] sm:$0xff]  }
 0x771   :  { %v8855_v48 = vld [vmem:[%s11264_s6 + $0x310] sm:$0xff]  }
 0x773   :  { %7766 = vmatpush3.bf16.msra.mxu0 %v8799_v3  ;;  %7784 = vmatpush3.bf16.msra.mxu1 %v8800_v40  ;;  %v8857_v3 = vld [vmem:[%s11264_s6 + $0x358] sm:$0xff]   ;;  %v8858_v40 = vld [vmem:[%s11264_s6 + $0x3c8] sm:$0xff]  }
 0x774   :  { %7767 = vmatprep.subr.bf16.mxu0 %v8801_v53  ;;  %7785 = vmatprep.subr.bf16.mxu1 %v8802_v9  ;;  %v8859_v53 = vld [vmem:[%s11264_s6 + $0x318] sm:$0xff]   ;;  %v8860_v9 = vld [vmem:[%s11264_s6 + $0x388] sm:$0xff]  }
 0x777   :  { %7768 = vmatpush3.bf16.msra.mxu0 %v8803_v51  ;;  %7786 = vmatpush3.bf16.msra.mxu1 %v8804_v15  ;;  %v8861_v51 = vld [vmem:[%s11264_s6 + $0x360] sm:$0xff]  }
 0x778   :  { %7769 = vmatprep.subr.bf16.mxu0 %v8805_v58  ;;  %7787 = vmatprep.subr.bf16.mxu1 %v8806_v18  ;;  %v8863_v15 = vld [vmem:[%s11264_s6 + $0x320] sm:$0xff]   ;;  %v8865_v58 = vld [vmem:[%s11264_s6 + $0x368] sm:$0xff]   ;;  %v8866_v18 = vld [vmem:[%s11264_s6 + $0x3d8] sm:$0xff]  }
 0x77b   :  { %7770 = vmatpush3.bf16.msra.mxu0 %v8807_v63  ;;  %7788 = vmatpush3.bf16.msra.mxu1 %v8808_v35  ;;  %v8867_v63 = vld [vmem:[%s11264_s6 + $0x328] sm:$0xff]   ;;  %v8868_v35 = vld [vmem:[%s11264_s6 + $0x398] sm:$0xff]  }
 0x77c   :  { %7771 = vmatprep.subr.bf16.mxu0 %v8809_v10  ;;  %7789 = vmatprep.subr.bf16.mxu1 %v8810_v4  ;;  %v8869_v10 = vld [vmem:[%s11264_s6 + $0x370] sm:$0xff]   ;;  %v8870_v4 = vld [vmem:[%s11264_s6 + $0x3e0] sm:$0xff]  }
 0x77f   :  { %7772 = vmatpush3.bf16.msra.mxu0 %v8811_v26  ;;  %7790 = vmatpush3.bf16.msra.mxu1 %v8812_v60  ;;  %v8871_v26 = vld [vmem:[%s11264_s6 + $0x330] sm:$0xff]   ;;  %v8872_v60 = vld [vmem:[%s11264_s6 + $0x3a0] sm:$0xff]  }
 0x780   :  { %7791 = vmatprep.subr.bf16.mxu1 %v8813_v43  ;;  %7801 = vmatprep.subr.bf16.mxu0 %v8814_v61  ;;  %v8873_v43 = vld [vmem:[%s11264_s6 + $0x378] sm:$0xff]   ;;  %v8874_v61 = vld [vmem:[%s11264_s6 + $0x3e8] sm:$0xff]  }
 0x782   :  { %6457 = vmatmul.mubr.bf16.vlgmr.msra.gmra.mrb[136].mxu0 %v10184_v34  ;;  %v8822_v34 = vld [vmem:[%s11264_s6 + $0x2c0] sm:$0xff]  }
 0x783   :  { %7792 = vmatpush3.bf16.msra.mxu1 %v8815_v13  ;;  %7802 = vmatpush3.bf16.msra.mxu0 %v8816_v1  ;;  %v8875_v13 = vld [vmem:[%s11264_s6 + $0x338] sm:$0xff]   ;;  %v8876_v1 = vld [vmem:[%s11264_s6 + $0x3a8] sm:$0xff]  }
 0x784   :  { %6538 = vmatprep.mubr.bf16.mxu0 %v10216_v42  ;;  %7793 = vmatprep.subr.bf16.mxu1 %v8817_v22  ;;  %v8824_v42 = vld [vmem:[%s11264_s6 + $0x280] sm:$0xff]   ;;  %v8877_v22 = vld [vmem:[%s11264_s6 + $0x3f0] sm:$0xff]  }
 0x785   :  { %7803 = vmatprep.subr.bf16.mxu0 %v8818_v11  ;;  %v8878_v11 = vld [vmem:[%s11264_s6 + $0x440] sm:$0xff]  }
 0x787   :  { %7794 = vmatpush3.bf16.msra.mxu1 %v8819_v16  ;;  %7804 = vmatpush3.bf16.msra.mxu0 %v8820_v38  ;;  %v8879_v16 = vld [vmem:[%s11264_s6 + $0x3b0] sm:$0xff]   ;;  %v8880_v38 = vld [vmem:[%s11264_s6 + $0x400] sm:$0xff]  }
 0x788   :  { %7805 = vmatprep.subr.bf16.mxu0 %v8821_v30  ;;  %7823 = vmatprep.subr.bf16.mxu1 %v8822_v34  ;;  %v8881_v30 = vld [vmem:[%s11264_s6 + $0x3f8] sm:$0xff]   ;;  %v8882_v34 = vld [vmem:[%s11264_s6 + $0x448] sm:$0xff]  }
 0x78a   :  { %6498 = vmatmul.mubr.bf16.vlgmr.msra.gmra.mrb[0].mxu1 %v10198_v28  ;;  %v8830_v28 = vld [vmem:[%s11264_s6 + $0x2d0] sm:$0xff]  }
 0x78b   :  { %7806 = vmatpush3.bf16.msra.mxu0 %v8823_v19  ;;  %7824 = vmatpush3.bf16.msra.mxu1 %v8824_v42  ;;  %v8883_v19 = vld [vmem:[%s11264_s6 + $0x3b8] sm:$0xff]   ;;  %v8884_v42 = vld [vmem:[%s11264_s6 + $0x408] sm:$0xff]  }
 0x78c   :  { %6579 = vmatprep.mubr.bf16.mxu1 %v10622_v25  ;;  %7807 = vmatprep.subr.bf16.mxu0 %v8825_v50  ;;  %v8832_v25 = vld [vmem:[%s11264_s6 + $0x290] sm:$0xff]  }
 0x78d   :  { %7825 = vmatprep.subr.bf16.mxu1 %v8826_v47  ;;  %v8885_v50 = vld [vmem:[%s11264_s6 + $0x450] sm:$0xff]   ;;  %v8887_v47 = vld [vmem:[%s11264_s6 + $0x458] sm:$0xff]  }
 0x78f   :  { %7808 = vmatpush3.bf16.msra.mxu0 %v8827_v36  ;;  %7826 = vmatpush3.bf16.msra.mxu1 %v8828_v56  ;;  %v8889_v36 = vld [vmem:[%s11264_s6 + $0x460] sm:$0xff]  }
 0x790   :  { %7809 = vmatprep.subr.bf16.mxu0 %v8829_v37  ;;  %7827 = vmatprep.subr.bf16.mxu1 %v8830_v28  ;;  %v8890_v56 = vld [vmem:[%s11264_s6 + $0x420] sm:$0xff]   ;;  %v8892_v37 = vld [vmem:[%s11264_s6 + $0x428] sm:$0xff]   ;;  %v8893_v28 = vld [vmem:[%s11264_s6 + $0x470] sm:$0xff]  }
 0x793   :  { %7810 = vmatpush3.bf16.msra.mxu0 %v8831_v23  ;;  %7828 = vmatpush3.bf16.msra.mxu1 %v8832_v25  ;;  %v8894_v23 = vld [vmem:[%s11264_s6 + $0x430] sm:$0xff]   ;;  %v8895_v25 = vld [vmem:[%s11264_s6 + $0x478] sm:$0xff]  }
 0x794   :  { %7811 = vmatprep.subr.bf16.mxu0 %v8833_v27  ;;  %7829 = vmatprep.subr.bf16.mxu1 %v8834_v49  ;;  %v8896_v27 = vld [vmem:[%s11264_s6 + $0x438] sm:$0xff]  }
 0x797   :  { %7812 = vmatpush3.bf16.msra.mxu0 %v8835_v57  ;;  %7830 = vmatpush3.bf16.msra.mxu1 %v8836_v24 }
 0x798   :  { %7813 = vmatprep.subr.bf16.mxu0 %v8837_v45  ;;  %7831 = vmatprep.subr.bf16.mxu1 %v8838_v12 }
 0x79b   :  { %7814 = vmatpush3.bf16.msra.mxu0 %v8839_v41  ;;  %7832 = vmatpush3.bf16.msra.mxu1 %v8840_v44 }
 0x79c   :  { %7815 = vmatprep.subr.bf16.mxu0 %v8841_v8  ;;  %7833 = vmatprep.subr.bf16.mxu1 %v8842_v59 }
 0x79f   :  { %7816 = vmatpush3.bf16.msra.mxu0 %v8843_v55  ;;  %7834 = vmatpush3.bf16.msra.mxu1 %v8844_v14 }
 0x7a0   :  { %7835 = vmatprep.subr.bf16.mxu1 %v8845_v2  ;;  %7845 = vmatprep.subr.bf16.mxu0 %v8846_v32 }
 0x7a2   :  { %6539 = vmatmul.mubr.bf16.vlgmr.msra.gmra.mrb[140].mxu0 %v10614_v33  ;;  %v8854_v33 = vld [vmem:[%s11264_s6 + $0x3c0] sm:$0xff]  }
 0x7a3   :  { %7836 = vmatpush3.bf16.msra.mxu1 %v8847_v7  ;;  %7846 = vmatpush3.bf16.msra.mxu0 %v8848_v17 }
 0x7a4   :  { %6620 = vmatprep.mubr.bf16.mxu0 %v10251_v62  ;;  %7837 = vmatprep.subr.bf16.mxu1 %v8849_v0  ;;  %v8856_v62 = vld [vmem:[%s11264_s6 + $0x380] sm:$0xff]  }
 0x7a5   :  { %7847 = vmatprep.subr.bf16.mxu0 %v8850_v52 }
 0x7a7   :  { %7838 = vmatpush3.bf16.msra.mxu1 %v8851_v6  ;;  %7848 = vmatpush3.bf16.msra.mxu0 %v8852_v39 }
 0x7a8   :  { %7849 = vmatprep.subr.bf16.mxu0 %v8853_v31  ;;  %7867 = vmatprep.subr.bf16.mxu1 %v8854_v33 }
 0x7aa   :  { %6580 = vmatmul.mubr.bf16.vlgmr.msra.gmra.mrb[4].mxu1 %v10218_v46  ;;  %v8862_v46 = vld [vmem:[%s11264_s6 + $0x3d0] sm:$0xff]  }
 0x7ab   :  { %7850 = vmatpush3.bf16.msra.mxu0 %v8855_v48  ;;  %7868 = vmatpush3.bf16.msra.mxu1 %v8856_v62 }
 0x7ac   :  { %6661 = vmatprep.mubr.bf16.mxu1 %v10290_v21  ;;  %7851 = vmatprep.subr.bf16.mxu0 %v8857_v3  ;;  %v8864_v21 = vld [vmem:[%s11264_s6 + $0x390] sm:$0xff]  }
 0x7ad   :  { %7869 = vmatprep.subr.bf16.mxu1 %v8858_v40 }
 0x7af   :  { %7852 = vmatpush3.bf16.msra.mxu0 %v8859_v53  ;;  %7870 = vmatpush3.bf16.msra.mxu1 %v8860_v9 }
 0x7b0   :  { %7853 = vmatprep.subr.bf16.mxu0 %v8861_v51  ;;  %7871 = vmatprep.subr.bf16.mxu1 %v8862_v46 }
 0x7b3   :  { %7854 = vmatpush3.bf16.msra.mxu0 %v8863_v15  ;;  %7872 = vmatpush3.bf16.msra.mxu1 %v8864_v21 }
 0x7b4   :  { %7855 = vmatprep.subr.bf16.mxu0 %v8865_v58  ;;  %7873 = vmatprep.subr.bf16.mxu1 %v8866_v18 }
 0x7b7   :  { %7856 = vmatpush3.bf16.msra.mxu0 %v8867_v63  ;;  %7874 = vmatpush3.bf16.msra.mxu1 %v8868_v35 }
 0x7b8   :  { %7857 = vmatprep.subr.bf16.mxu0 %v8869_v10  ;;  %7875 = vmatprep.subr.bf16.mxu1 %v8870_v4 }
 0x7bb   :  { %7858 = vmatpush3.bf16.msra.mxu0 %v8871_v26  ;;  %7876 = vmatpush3.bf16.msra.mxu1 %v8872_v60 }
 0x7bc   :  { %7859 = vmatprep.subr.bf16.mxu0 %v8873_v43  ;;  %7877 = vmatprep.subr.bf16.mxu1 %v8874_v61 }
 0x7bf   :  { %7860 = vmatpush3.bf16.msra.mxu0 %v8875_v13  ;;  %7878 = vmatpush3.bf16.msra.mxu1 %v8876_v1 }
 0x7c0   :  { %7879 = vmatprep.subr.bf16.mxu1 %v8877_v22  ;;  %7889 = vmatprep.subr.bf16.mxu0 %v8878_v11 }
 0x7c2   :  { %6621 = vmatmul.mubr.bf16.vlgmr.msra.gmra.mrb[144].mxu0 %v10246_v54  ;;  %v8886_v54 = vld [vmem:[%s11264_s6 + $0x410] sm:$0xff]  }
 0x7c3   :  { %7880 = vmatpush3.bf16.msra.mxu1 %v8879_v16  ;;  %7890 = vmatpush3.bf16.msra.mxu0 %v8880_v38 }
 0x7c4   :  { %6702 = vmatprep.mubr.bf16.mxu0 %v10665_v20  ;;  %7881 = vmatprep.subr.bf16.mxu1 %v8881_v30  ;;  %v8888_v20 = vld [vmem:[%s11264_s6 + $0x418] sm:$0xff]  }
 0x7c5   :  { %7891 = vmatprep.subr.bf16.mxu0 %v8882_v34 }
 0x7c7   :  { %7882 = vmatpush3.bf16.msra.mxu1 %v8883_v19  ;;  %7892 = vmatpush3.bf16.msra.mxu0 %v8884_v42 }
 0x7c8   :  { %7893 = vmatprep.subr.bf16.mxu0 %v8885_v50 }
 0x7ca   :  { %6662 = vmatmul.mubr.bf16.vlgmr.msra.gmra.mrb[8].mxu1 %v10641_v29  ;;  %v8891_v29 = vld [vmem:[%s11264_s6 + $0x468] sm:$0xff]   ;;  %s8898_s6 = smov 16  }
 0x7cb   :  { %7894 = vmatpush3.bf16.msra.mxu0 %v8886_v54 }
 0x7cc   :  { %7895 = vmatprep.subr.bf16.mxu0 %v8887_v47 }
 0x7cf   :  { %7896 = vmatpush3.bf16.msra.mxu0 %v8888_v20 }
 0x7d0   :  { %7897 = vmatprep.subr.bf16.mxu0 %v8889_v36 }
 0x7d3   :  { %7898 = vmatpush3.bf16.msra.mxu0 %v8890_v56 }
 0x7d4   :  { %7899 = vmatprep.subr.bf16.mxu0 %v8891_v29 }
 0x7d7   :  { %7900 = vmatpush3.bf16.msra.mxu0 %v8892_v37 }
 0x7d8   :  { %7901 = vmatprep.subr.bf16.mxu0 %v8893_v28 }
 0x7db   :  { %7902 = vmatpush3.bf16.msra.mxu0 %v8894_v23 }
 0x7dc   :  { %7903 = vmatprep.subr.bf16.mxu0 %v8895_v25 }
 0x7df   :  { %7904 = vmatpush3.bf16.msra.mxu0 %v8896_v27 }
 0x7e2   :  { %6703 = vmatmul.mubr.bf16.vlgmr.msra.gmra.mrb[148].mxu0 %v10297_v5 }
 0x815   :  { %v7685_v49 = vpop.f32.mrb[128].mxu0 }
 0x816   :  { %v7686_v57 = vpop.f32.mrb[129].mxu0 }
 0x817   :  { %v7687_v24 = vadd.f32 %v7686_v57, %v7685_v49  ;;  %v7688_v45 = vpop.f32.mrb[130].mxu0 }
 0x818   :  { %v7689_v12 = vpop.f32.mrb[131].mxu0 }
 0x819   :  { %v7690_v41 = vadd.f32 %v7689_v12, %v7688_v45 }
 0x81d   :  { %v7707_v44 = vpop.f32.mrb[248].mxu1 }
 0x81e   :  { %v7708_v8 = vpop.f32.mrb[249].mxu1 }
 0x81f   :  { %v7709_v59 = vadd.f32 %v7708_v8, %v7707_v44  ;;  %v7710_v55 = vpop.f32.mrb[250].mxu1 }
 0x820   :  { %v7711_v14 = vpop.f32.mrb[251].mxu1 }
 0x821   :  { %v11246_v2 = vadd.f32 %v7709_v59, %v7687_v24  ;;  %v7712_v32 = vadd.f32 %v7711_v14, %v7710_v55 }
 0x823   :  { %v11248_v7 = vadd.f32 %v7712_v32, %v7690_v41 }
 0x835   :  { %v7729_v17 = vpop.f32.mrb[132].mxu0 }
 0x836   :  { %v7730_v0 = vpop.f32.mrb[133].mxu0 }
 0x837   :  { %v7731_v52 = vadd.f32 %v7730_v0, %v7729_v17  ;;  %v7732_v5 = vpop.f32.mrb[134].mxu0 }
 0x838   :  { %v7733_v6 = vpop.f32.mrb[135].mxu0 }
 0x839   :  { %v7734_v39 = vadd.f32 %v7733_v6, %v7732_v5 }
 0x83d   :  { %v7751_v31 = vpop.f32.mrb[252].mxu1 }
 0x83e   :  { %v7752_v33 = vpop.f32.mrb[253].mxu1 }
 0x83f   :  { %v7753_v48 = vadd.f32 %v7752_v33, %v7751_v31  ;;  %v7754_v62 = vpop.f32.mrb[254].mxu1 }
 0x840   :  { %v7755_v3 = vpop.f32.mrb[255].mxu1 }
 0x841   :  { %v6418_v40 = vadd.f32 %v7753_v48, %v7731_v52  ;;  %v7756_v53 = vadd.f32 %v7755_v3, %v7754_v62 }
 0x843   :  { %v6421_v9 = vadd.f32 %v7756_v53, %v7734_v39 }
 0x855   :  { %v7773_v51 = vpop.f32.mrb[136].mxu0 }
 0x856   :  { %v7774_v46 = vpop.f32.mrb[137].mxu0 }
 0x857   :  { %v7775_v15 = vadd.f32 %v7774_v46, %v7773_v51  ;;  %v7776_v21 = vpop.f32.mrb[138].mxu0 }
 0x858   :  { %v7777_v58 = vpop.f32.mrb[139].mxu0 }
 0x859   :  { %v6459_v18 = vadd.f32 %v7775_v15, %v6418_v40  ;;  %v7778_v63 = vadd.f32 %v7777_v58, %v7776_v21 }
 0x85b   :  { %v6462_v35 = vadd.f32 %v7778_v63, %v6421_v9 }
 0x85d   :  { %v7795_v10 = vpop.f32.mrb[0].mxu1 }
 0x85e   :  { %v7796_v4 = vpop.f32.mrb[1].mxu1 }
 0x85f   :  { %v7797_v26 = vadd.f32 %v7796_v4, %v7795_v10  ;;  %v7798_v60 = vpop.f32.mrb[2].mxu1 }
 0x860   :  { %v7799_v43 = vpop.f32.mrb[3].mxu1 }
 0x861   :  { %v6500_v61 = vadd.f32 %v7797_v26, %v6459_v18  ;;  %v7800_v13 = vadd.f32 %v7799_v43, %v7798_v60 }
 0x863   :  { %v6503_v1 = vadd.f32 %v7800_v13, %v6462_v35 }
 0x875   :  { %v7817_v22 = vpop.f32.mrb[140].mxu0 }
 0x876   :  { %v7818_v11 = vpop.f32.mrb[141].mxu0 }
 0x877   :  { %v7819_v16 = vadd.f32 %v7818_v11, %v7817_v22  ;;  %v7820_v38 = vpop.f32.mrb[142].mxu0 }
 0x878   :  { %v7821_v30 = vpop.f32.mrb[143].mxu0 }
 0x879   :  { %v6541_v34 = vadd.f32 %v7819_v16, %v6500_v61  ;;  %v7822_v19 = vadd.f32 %v7821_v30, %v7820_v38 }
 0x87b   :  { %v6544_v42 = vadd.f32 %v7822_v19, %v6503_v1 }
 0x87d   :  { %v7839_v50 = vpop.f32.mrb[4].mxu1 }
 0x87e   :  { %v7840_v54 = vpop.f32.mrb[5].mxu1 }
 0x87f   :  { %v7841_v47 = vadd.f32 %v7840_v54, %v7839_v50  ;;  %v7842_v20 = vpop.f32.mrb[6].mxu1 }
 0x880   :  { %v7843_v36 = vpop.f32.mrb[7].mxu1 }
 0x881   :  { %v6582_v56 = vadd.f32 %v7841_v47, %v6541_v34  ;;  %v7844_v29 = vadd.f32 %v7843_v36, %v7842_v20 }
 0x883   :  { %v6585_v37 = vadd.f32 %v7844_v29, %v6544_v42 }
 0x895   :  { %v7861_v28 = vpop.f32.mrb[144].mxu0 }
 0x896   :  { %v7862_v23 = vpop.f32.mrb[145].mxu0 }
 0x897   :  { %v7863_v25 = vadd.f32 %v7862_v23, %v7861_v28  ;;  %v7864_v27 = vpop.f32.mrb[146].mxu0 }
 0x898   :  { %v7865_v49 = vpop.f32.mrb[147].mxu0 }
 0x899   :  { %v6623_v57 = vadd.f32 %v7863_v25, %v6582_v56  ;;  %v7866_v24 = vadd.f32 %v7865_v49, %v7864_v27 }
 0x89b   :  { %v6626_v45 = vadd.f32 %v7866_v24, %v6585_v37 }
 0x89d   :  { %v7883_v12 = vpop.f32.mrb[8].mxu1 }
 0x89e   :  { %v7884_v41 = vpop.f32.mrb[9].mxu1 }
 0x89f   :  { %v7885_v44 = vadd.f32 %v7884_v41, %v7883_v12  ;;  %v7886_v8 = vpop.f32.mrb[10].mxu1 }
 0x8a0   :  { %v7887_v59 = vpop.f32.mrb[11].mxu1 }
 0x8a1   :  { %v6664_v55 = vadd.f32 %v7885_v44, %v6623_v57  ;;  %v7888_v14 = vadd.f32 %v7887_v59, %v7886_v8 }
 0x8a3   :  { %v6667_v32 = vadd.f32 %v7888_v14, %v6626_v45 }
 0x8b5   :  { %v7905_v17 = vpop.f32.mrb[148].mxu0 }
 0x8b6   :  { %v7906_v0 = vpop.f32.mrb[149].mxu0 }
 0x8b7   :  { %v7907_v52 = vadd.f32 %v7906_v0, %v7905_v17  ;;  %v7908_v5 = vpop.f32.mrb[150].mxu0 }
 0x8b8   :  { %v7909_v6 = vpop.f32.mrb[151].mxu0 }
 0x8b9   :  { %v7910_v39 = vadd.f32 %v7909_v6, %v7908_v5  ;;  %v6705_v31 = vadd.f32 %v7907_v52, %v6664_v55 }
 0x8bb   :  { %v6708_v33 = vadd.f32 %v7910_v39, %v6667_v32  ;;  %6713 = vrot.lane.b32.xlu0 %v6705_v31, %s8898_s6 }
 0x8bf   :  { %6715 = vrot.lane.b32.xlu0 %v6708_v33, %s8898_s6 }
 0x92d   :  { %v6714_v48 = vpop.permute.xlu0 %6713 }
 0x92e   :  { %v6720_v62 = vsel %vm6719_vm0, %v11246_v2, %v6714_v48 }
 0x92f   :  { %6723 = vst.msk [vmem:[%s11265_s7] sm:$0xff] %vm6722_vm1, %v6720_v62 }
 0x931   :  { %v6716_v3 = vpop.permute.xlu0 %6715 }
 0x932   :  { %v6721_v40 = vsel %vm6719_vm0, %v11248_v7, %v6716_v3 }
 0x933   :  { %6724 = vst.msk [vmem:[%s11265_s7 + $0x8] sm:$0xff] %vm6722_vm1, %v6721_v40 }

</bundles_post_ra>
